<compile_context>
chip_gen: v7x
topology: tpu7x:2x2x1
jax: 0.10.0
libtpu: 0.0.40
codegen_flags: <defaults>
</compile_context>

<pallas_src>
import math
import functools

import jax
import jax.numpy as jnp
from jax import lax
from jax.experimental import pallas as pl
from jax.experimental.pallas import tpu as pltpu

LN_EPS = 1e-5
MASK_VALUE = -10000.0                  # GPT-2 masked_bias
VMEM_LIMIT = 48 * 1024 * 1024          # explicit scoped-VMEM limit


# --------------------------------------------------------------------------
# small helpers
# --------------------------------------------------------------------------
def _layernorm(h, gamma, beta):
    mu = jnp.mean(h, axis=-1, keepdims=True)
    var = jnp.mean((h - mu) ** 2, axis=-1, keepdims=True)
    return (h - mu) * lax.rsqrt(var + LN_EPS) * gamma + beta


def _gelu(x):
    return 0.5 * x * (1.0 + jnp.tanh(math.sqrt(2.0 / math.pi)
                                     * (x + 0.044715 * x ** 3)))


_BUFFERED1_OK = None


def _probe_copy_kernel(x_ref, o_ref):
    o_ref[...] = x_ref[...]


def _single_buffer_supported():
    """Feature-probe pipeline_mode=pl.Buffered(1) once (tiny copy kernel)."""
    global _BUFFERED1_OK
    if _BUFFERED1_OK is not None:
        return _BUFFERED1_OK
    ok = False
    if hasattr(pl, "Buffered"):
        try:
            x = jnp.zeros((8, 128), jnp.float32)
            spec = pl.BlockSpec((8, 128), lambda i: (0, 0),
                                pipeline_mode=pl.Buffered(1))
            y = pl.pallas_call(
                _probe_copy_kernel,
                out_shape=jax.ShapeDtypeStruct((8, 128), jnp.float32),
                grid=(1,),
                in_specs=[spec],
                out_specs=pl.BlockSpec((8, 128), lambda i: (0, 0)),
            )(x)
            jax.block_until_ready(y)
            ok = True
        except Exception:
            ok = False
    _BUFFERED1_OK = ok
    return ok


def _const_full_spec(arr):
    """Whole-array block with a grid-constant index_map.

    Single-buffered when supported: the block never changes across the grid,
    so double-buffering would only waste VMEM (key on v7x's 64 MiB).
    """
    shape = tuple(arr.shape)
    index_map = lambda *_: (0,) * len(shape)
    if _single_buffer_supported():
        return pl.BlockSpec(shape, index_map, pipeline_mode=pl.Buffered(1))
    return pl.BlockSpec(shape, index_map)


# --------------------------------------------------------------------------
# Kernel 1: LayerNorm_1 + fused QKV projection (head-major output)
# --------------------------------------------------------------------------
def qkv_kernel(x_ref, ln1g_ref, ln1b_ref, wqkv_ref, bqkv_ref,
               q_ref, k_ref, v_ref, *, n_head):
    x = x_ref[0].astype(jnp.float32)                    # (tq, D)
    tq, D = x.shape
    dh = D // n_head
    scale = 1.0 / math.sqrt(dh)

    h1 = _layernorm(x, ln1g_ref[...], ln1b_ref[...])
    qkv = jnp.dot(h1.astype(jnp.bfloat16), wqkv_ref[...],
                  preferred_element_type=jnp.float32) + bqkv_ref[...]  # (tq, 3D)

    # Head split via static lane slices (no swapaxes relayout); 1/sqrt(dh)
    # folded into q before the bf16 cast.
    for hh in range(n_head):
        q_ref[0, hh] = (qkv[:, hh * dh:(hh + 1) * dh] * scale
                        ).astype(jnp.bfloat16)
        k_ref[0, hh] = qkv[:, D + hh * dh:D + (hh + 1) * dh
                           ].astype(jnp.bfloat16)
        v_ref[0, hh] = qkv[:, 2 * D + hh * dh:2 * D + (hh + 1) * dh
                           ].astype(jnp.bfloat16)


def run_qkv(h, layer, n_head, t_seq):
    B, S, D = h.shape
    assert S % t_seq == 0 and D % n_head == 0
    dh = D // n_head
    grid = (B, S // t_seq)

    qkv_out = jax.ShapeDtypeStruct((B, n_head, S, dh), jnp.bfloat16)
    head_major_spec = pl.BlockSpec((1, n_head, t_seq, dh),
                                   lambda b, qi: (b, 0, qi, 0))
    return pl.pallas_call(
        functools.partial(qkv_kernel, n_head=n_head),
        out_shape=(qkv_out, qkv_out, qkv_out),
        grid_spec=pltpu.PrefetchScalarGridSpec(
            num_scalar_prefetch=0,
            grid=grid,
            in_specs=[
                pl.BlockSpec((1, t_seq, D), lambda b, qi: (b, qi, 0)),
                _const_full_spec(layer["ln1_g"]),
                _const_full_spec(layer["ln1_b"]),
                _const_full_spec(layer["w_qkv"]),
                _const_full_spec(layer["b_qkv"]),
            ],
            out_specs=(head_major_spec, head_major_spec, head_major_spec),
        ),
        compiler_params=pltpu.CompilerParams(
            dimension_semantics=("parallel", "parallel"),
            vmem_limit_bytes=VMEM_LIMIT),
    )(h, layer["ln1_g"], layer["ln1_b"], layer["w_qkv"], layer["b_qkv"])


# --------------------------------------------------------------------------
# Kernel 2: flash-style causal attention (online softmax, tile skipping)
# --------------------------------------------------------------------------
def flash_kernel(q_ref, k_ref, v_ref, o_ref, m_sc, l_sc, acc_sc):
    qi = pl.program_id(2)
    ki = pl.program_id(3)
    nk = pl.num_programs(3)

    @pl.when(ki == 0)
    def _():
        m_sc[...] = jnp.full(m_sc.shape, -jnp.inf, jnp.float32)
        l_sc[...] = jnp.zeros(l_sc.shape, jnp.float32)
        acc_sc[...] = jnp.zeros(acc_sc.shape, jnp.float32)

    # Causal: kv tiles strictly above the diagonal are fully masked -> skip.
    @pl.when(ki <= qi)
    def _():
        q = q_ref[0, 0]                                  # (tq, dh), pre-scaled
        k = k_ref[0, 0]
        v = v_ref[0, 0]
        s = jnp.dot(q, k.T, preferred_element_type=jnp.float32)   # (tq, tk)

        # Mask only matters on the diagonal tile (tq == tk, same offsets).
        tq, tk = s.shape
        row = lax.broadcasted_iota(jnp.int32, (tq, tk), 0)
        col = lax.broadcasted_iota(jnp.int32, (tq, tk), 1)
        keep = jnp.logical_or(ki < qi, col <= row)
        s = jnp.where(keep, s, MASK_VALUE)

        m_prev = m_sc[...]
        m_new = jnp.maximum(m_prev, jnp.max(s, axis=-1, keepdims=True))
        alpha = jnp.exp(m_prev - m_new)
        p = jnp.exp(s - m_new)
        l_sc[...] = alpha * l_sc[...] + jnp.sum(p, axis=-1, keepdims=True)
        acc_sc[...] = alpha * acc_sc[...] + jnp.dot(
            p.astype(jnp.bfloat16), v, preferred_element_type=jnp.float32)
        m_sc[...] = m_new

    @pl.when(ki == nk - 1)
    def _():
        o_ref[0, 0] = (acc_sc[...] *
                       pl.reciprocal(l_sc[...], approx=True)
                       ).astype(o_ref.dtype)


def run_attention(q, k, v, t_seq):
    B, H, S, dh = q.shape
    assert S % t_seq == 0
    nq = S // t_seq
    grid = (B, H, nq, nq)

    q_spec = pl.BlockSpec((1, 1, t_seq, dh),
                          lambda b, hh, qi, ki: (b, hh, qi, 0))
    # Clamp the kv block index to the diagonal tile: skipped (fully masked)
    # steps then reuse the previous block and their K/V DMAs are elided.
    kv_spec = pl.BlockSpec((1, 1, t_seq, dh),
                           lambda b, hh, qi, ki: (b, hh, jnp.minimum(ki, qi), 0))
    return pl.pallas_call(
        flash_kernel,
        out_shape=jax.ShapeDtypeStruct((B, H, S, dh), jnp.bfloat16),
        grid_spec=pltpu.PrefetchScalarGridSpec(
            num_scalar_prefetch=0,
            grid=grid,
            in_specs=[q_spec, kv_spec, kv_spec],
            out_specs=pl.BlockSpec((1, 1, t_seq, dh),
                                   lambda b, hh, qi, ki: (b, hh, qi, 0)),
            scratch_shapes=[pltpu.VMEM((t_seq, 1), jnp.float32),
                            pltpu.VMEM((t_seq, 1), jnp.float32),
                            pltpu.VMEM((t_seq, dh), jnp.float32)],
        ),
        compiler_params=pltpu.CompilerParams(
            dimension_semantics=("parallel", "parallel", "parallel",
                                 "arbitrary"),
            vmem_limit_bytes=VMEM_LIMIT),
    )(q, k, v)


# --------------------------------------------------------------------------
# Kernel 3: attn projection + residual + LayerNorm_2 + tiled MLP (+ ln_f)
# --------------------------------------------------------------------------
def proj_mlp_kernel(x_ref, ctx_ref, wproj_ref, bproj_ref,
                    ln2g_ref, ln2b_ref,
                    wfc_ref, bfc_ref, wout_ref, bout_ref,
                    lnfg_ref, lnfb_ref, o_ref,
                    h2_sc, acc_sc, *, n_head, apply_ln_f):
    f = pl.program_id(2)
    nf = pl.num_programs(2)

    @pl.when(f == 0)
    def _():
        x = x_ref[0].astype(jnp.float32)                 # (tq, D)
        tq, D = x.shape
        dh = D // n_head
        # Attention output projection accumulated per head
        # (equivalent to merge_heads + matmul, without the transpose).
        a = jnp.zeros((tq, D), jnp.float32)
        for hh in range(n_head):
            a = a + jnp.dot(ctx_ref[0, hh],
                            wproj_ref[hh * dh:(hh + 1) * dh, :],
                            preferred_element_type=jnp.float32)
        a = a + bproj_ref[...]
        hs = x + a                                       # residual 1
        h2_sc[...] = _layernorm(hs, ln2g_ref[...], ln2b_ref[...]
                                ).astype(jnp.bfloat16)
        acc_sc[...] = hs + bout_ref[...]                 # residual 2 + out bias

    # One tile (t_ff columns of w_fc / rows of w_out) of the MLP hidden dim.
    m = jnp.dot(h2_sc[...], wfc_ref[...],
                preferred_element_type=jnp.float32) + bfc_ref[...]
    m = _gelu(m)
    acc_sc[...] += jnp.dot(m.astype(jnp.bfloat16), wout_ref[...],
                           preferred_element_type=jnp.float32)

    @pl.when(f == nf - 1)
    def _():
        out = acc_sc[...]
        if apply_ln_f:                                   # fused final LayerNorm
            out = _layernorm(out, lnfg_ref[...], lnfb_ref[...])
        o_ref[0] = out.astype(o_ref.dtype)


def run_proj_mlp(h, ctx, layer, lnf_g, lnf_b, n_head, t_seq, t_ff,
                 apply_ln_f, out_dtype):
    B, S, D = h.shape
    F = 4 * D
    assert S % t_seq == 0 and F % t_ff == 0
    dh = D // n_head
    grid = (B, S // t_seq, F // t_ff)

    in_specs = [
        pl.BlockSpec((1, t_seq, D), lambda b, qi, f: (b, qi, 0)),        # x
        pl.BlockSpec((1, n_head, t_seq, dh),
                     lambda b, qi, f: (b, 0, qi, 0)),                    # ctx
        _const_full_spec(layer["w_proj"]),
        _const_full_spec(layer["b_proj"]),
        _const_full_spec(layer["ln2_g"]),
        _const_full_spec(layer["ln2_b"]),
        pl.BlockSpec((D, t_ff), lambda b, qi, f: (0, f)),                # w_fc
        pl.BlockSpec((1, t_ff), lambda b, qi, f: (0, f)),                # b_fc
        pl.BlockSpec((t_ff, D), lambda b, qi, f: (f, 0)),                # w_out
        _const_full_spec(layer["b_out"]),
        _const_full_spec(lnf_g),
        _const_full_spec(lnf_b),
    ]
    # In-place residual-stream update when dtypes match (all but last layer).
    aliases = {0: 0} if jnp.dtype(h.dtype) == jnp.dtype(out_dtype) else {}
    return pl.pallas_call(
        functools.partial(proj_mlp_kernel, n_head=n_head,
                          apply_ln_f=apply_ln_f),
        out_shape=jax.ShapeDtypeStruct((B, S, D), out_dtype),
        grid_spec=pltpu.PrefetchScalarGridSpec(
            num_scalar_prefetch=0,
            grid=grid,
            in_specs=in_specs,
            out_specs=pl.BlockSpec((1, t_seq, D), lambda b, qi, f: (b, qi, 0)),
            scratch_shapes=[pltpu.VMEM((t_seq, D), jnp.bfloat16),   # ln_2(hs)
                            pltpu.VMEM((t_seq, D), jnp.float32)],   # accum
        ),
        input_output_aliases=aliases,
        compiler_params=pltpu.CompilerParams(
            dimension_semantics=("parallel", "parallel", "arbitrary"),
            vmem_limit_bytes=VMEM_LIMIT),
    )(h, ctx, layer["w_proj"], layer["b_proj"],
      layer["ln2_g"], layer["ln2_b"],
      layer["w_fc"], layer["b_fc"], layer["w_out"], layer["b_out"],
      lnf_g, lnf_b)


# --------------------------------------------------------------------------
# Parameters & forward pass
# --------------------------------------------------------------------------
def init_params(key, embed_dim, num_heads, num_layers, num_positions,
                vocab_size):
    D = embed_dim
    keys = jax.random.split(key, 2 + 4 * num_layers)
    ki = iter(keys)

    def normal(k, shape, std, dtype=jnp.float32):
        return (std * jax.random.normal(k, shape)).astype(dtype)

    params = {
        "tok_emb": normal(next(ki), (vocab_size, D), 1.0),   # nn.Embedding N(0,1)
        "pos_emb": normal(next(ki), (num_positions, D), 1.0),
        "ln_f_g": jnp.ones((1, D), jnp.float32),
        "ln_f_b": jnp.zeros((1, D), jnp.float32),
        "layers": [],
    }
    for _ in range(num_layers):
        params["layers"].append({
            "ln1_g": jnp.ones((1, D), jnp.float32),
            "ln1_b": jnp.zeros((1, D), jnp.float32),
            # matmul weights stored bf16 (MXU operands, halved DMA bytes)
            "w_qkv": normal(next(ki), (D, 3 * D), 0.02, jnp.bfloat16),
            "b_qkv": jnp.zeros((1, 3 * D), jnp.float32),
            "w_proj": normal(next(ki), (D, D), 0.02, jnp.bfloat16),
            "b_proj": jnp.zeros((1, D), jnp.float32),
            "ln2_g": jnp.ones((1, D), jnp.float32),
            "ln2_b": jnp.zeros((1, D), jnp.float32),
            "w_fc": normal(next(ki), (D, 4 * D), 0.02, jnp.bfloat16),
            "b_fc": jnp.zeros((1, 4 * D), jnp.float32),
            "w_out": normal(next(ki), (4 * D, D), 0.02, jnp.bfloat16),
            "b_out": jnp.zeros((1, D), jnp.float32),
        })
    return params


def gpt2_forward(tokens, params, n_head, t_seq, t_ff):
    # Embedding gathers done as plain-JAX glue (embedding dropout = identity).
    S = tokens.shape[1]
    h = params["tok_emb"][tokens] + params["pos_emb"][:S][None, :, :]
    h = h.astype(jnp.bfloat16)                     # bf16 residual stream in HBM

    n_layers = len(params["layers"])
    for i, layer in enumerate(params["layers"]):
        last = (i == n_layers - 1)
        q, k, v = run_qkv(h, layer, n_head, t_seq)
        ctx = run_attention(q, k, v, t_seq)
        h = run_proj_mlp(h, ctx, layer, params["ln_f_g"], params["ln_f_b"],
                         n_head, t_seq, t_ff, apply_ln_f=last,
                         out_dtype=jnp.float32 if last else jnp.bfloat16)
    return h


if __name__ == "__main__":
    # Small, lane-aligned demo shapes (D multiple of 128).
    EMBED_DIM = 128
    NUM_HEADS = 4          # dh = 32
    NUM_LAYERS = 2
    NUM_POSITIONS = 32
    VOCAB_SIZE = 64
    BATCH = 2
    SEQ = 16
    T_SEQ = 8              # 2 q/kv tiles -> exercises causal tile skipping
    T_FF = 256             # 4*D = 512 -> 2 MLP tiles -> exercises accumulator

    _single_buffer_supported()   # prime the Buffered(1) feature probe

    root = jax.random.PRNGKey(0)
    k_param, k_tok = jax.random.split(root)
    params = init_params(k_param, EMBED_DIM, NUM_HEADS, NUM_LAYERS,
                         NUM_POSITIONS, VOCAB_SIZE)
    tokens = jax.random.randint(k_tok, (BATCH, SEQ), 0, VOCAB_SIZE,
                                dtype=jnp.int32)

    forward = jax.jit(functools.partial(gpt2_forward, n_head=NUM_HEADS,
                                        t_seq=T_SEQ, t_ff=T_FF))
    out = forward(tokens, params)
    jax.block_until_ready(out)
    assert out.shape == (BATCH, SEQ, EMBED_DIM)
    assert bool(jnp.all(jnp.isfinite(out)))
    print("KERNEL_OK")
</pallas_src>

<mosaic_0001>
module attributes {stable_mosaic.version = 11 : i64} {
  func.func @_probe_copy_kernel(%arg0: i32, %arg1: memref<8x128xf32, #tpu.memory_space<vmem>>, %arg2: memref<8x128xf32, #tpu.memory_space<vmem>>) attributes {dimension_semantics = [#tpu.dimension_semantics<arbitrary>], iteration_bounds = array<i64: 1>, scalar_prefetch = 0 : i64, scratch_operands = 0 : i64, tpu.core_type = #tpu.core_type<tc>, window_params = [{pipeline_mode = #tpu.pipeline_mode<synchronous>, transform_indices = @transform_0, window_bounds = array<i64: 8, 128>}, {pipeline_mode = #tpu.pipeline_mode<synchronous>, transform_indices = @transform_1, window_bounds = array<i64: 8, 128>}]} {
    %c0 = arith.constant 0 : index
    %c0_0 = arith.constant 0 : index
    %0 = vector.load %arg1[%c0, %c0_0] : memref<8x128xf32, #tpu.memory_space<vmem>>, vector<8x128xf32>
    %c0_1 = arith.constant 0 : index
    %c0_2 = arith.constant 0 : index
    %1 = vector.load %arg2[%c0_1, %c0_2] : memref<8x128xf32, #tpu.memory_space<vmem>>, vector<8x128xf32>
    tpu.vector_store %arg2[%c0_1, %c0_2], %0 {strides = array<i32>} : memref<8x128xf32, #tpu.memory_space<vmem>>, vector<8x128xf32>,
    return
  }
  func.func @transform_0(%arg0: i32) -> (i32, i32) {
    %c0_i32 = arith.constant 0 : i32
    %c0_i32_0 = arith.constant 0 : i32
    %c0_i32_1 = arith.constant 0 : i32
    return %c0_i32, %c0_i32_0 : i32, i32
  }
  func.func @transform_1(%arg0: i32) -> (i32, i32) {
    %c0_i32 = arith.constant 0 : i32
    %c0_i32_0 = arith.constant 0 : i32
    %c0_i32_1 = arith.constant 0 : i32
    return %c0_i32, %c0_i32_0 : i32, i32
  }
}

module attributes {stable_mosaic.version = 11 : i64} {
  func.func @proj_mlp_kernel(%arg0: i32, %arg1: i32, %arg2: i32, %arg3: memref<1x8x128xbf16, #tpu.memory_space<vmem>>, %arg4: memref<1x4x8x32xbf16, #tpu.memory_space<vmem>>, %arg5: memref<128x128xbf16, #tpu.memory_space<vmem>>, %arg6: memref<1x128xf32, #tpu.memory_space<vmem>>, %arg7: memref<1x128xf32, #tpu.memory_space<vmem>>, %arg8: memref<1x128xf32, #tpu.memory_space<vmem>>, %arg9: memref<128x256xbf16, #tpu.memory_space<vmem>>, %arg10: memref<1x256xf32, #tpu.memory_space<vmem>>, %arg11: memref<256x128xbf16, #tpu.memory_space<vmem>>, %arg12: memref<1x128xf32, #tpu.memory_space<vmem>>, %arg13: memref<1x128xf32, #tpu.memory_space<vmem>>, %arg14: memref<1x128xf32, #tpu.memory_space<vmem>>, %arg15: memref<1x8x128xf32, #tpu.memory_space<vmem>>, %arg16: memref<8x128xbf16, #tpu.memory_space<vmem>>, %arg17: memref<8x128xf32, #tpu.memory_space<vmem>>) attributes {dimension_semantics = [#tpu.dimension_semantics<parallel>, #tpu.dimension_semantics<parallel>, #tpu.dimension_semantics<arbitrary>], iteration_bounds = array<i64: 2, 2, 2>, scalar_prefetch = 0 : i64, scratch_operands = 2 : i64, tpu.core_type = #tpu.core_type<tc>, window_params = [{transform_indices = @transform_0, window_bounds = array<i64: 1, 8, 128>}, {transform_indices = @transform_1, window_bounds = array<i64: 1, 4, 8, 32>}, {pipeline_mode = #tpu.pipeline_mode<synchronous>, transform_indices = @transform_2, window_bounds = array<i64: 128, 128>}, {pipeline_mode = #tpu.pipeline_mode<synchronous>, transform_indices = @transform_3, window_bounds = array<i64: 1, 128>}, {pipeline_mode = #tpu.pipeline_mode<synchronous>, transform_indices = @transform_4, window_bounds = array<i64: 1, 128>}, {pipeline_mode = #tpu.pipeline_mode<synchronous>, transform_indices = @transform_5, window_bounds = array<i64: 1, 128>}, {transform_indices = @transform_6, window_bounds = array<i64: 128, 256>}, {transform_indices = @transform_7, window_bounds = array<i64: 1, 256>}, {transform_indices = @transform_8, window_bounds = array<i64: 256, 128>}, {pipeline_mode = #tpu.pipeline_mode<synchronous>, transform_indices = @transform_9, window_bounds = array<i64: 1, 128>}, {pipeline_mode = #tpu.pipeline_mode<synchronous>, transform_indices = @transform_10, window_bounds = array<i64: 1, 128>}, {pipeline_mode = #tpu.pipeline_mode<synchronous>, transform_indices = @transform_11, window_bounds = array<i64: 1, 128>}, {transform_indices = @transform_12, window_bounds = array<i64: 1, 8, 128>}]} {
    %c0_i32 = arith.constant 0 : i32
    %0 = arith.cmpi eq, %arg2, %c0_i32 : i32
    %1 = arith.extui %0 : i1 to i32
    %c0_i32_0 = arith.constant 0 : i32
    %2 = arith.cmpi ne, %1, %c0_i32_0 : i32
    scf.if %2 {
      %c0_18 = arith.constant 0 : index
      %c0_19 = arith.constant 0 : index
      %c0_20 = arith.constant 0 : index
      %31 = vector.load %arg3[%c0_18, %c0_19, %c0_20] : memref<1x8x128xbf16, #tpu.memory_space<vmem>>, vector<1x8x128xbf16>
      %32 = vector.shape_cast %31 : vector<1x8x128xbf16> to vector<8x128xbf16>
      %33 = arith.extf %32 : vector<8x128xbf16> to vector<8x128xf32>
      %cst_21 = arith.constant 0.000000e+00 : f32
      %34 = vector.broadcast %cst_21 : f32 to vector<8x128xf32>
      %c0_22 = arith.constant 0 : index
      %c0_23 = arith.constant 0 : index
      %c0_24 = arith.constant 0 : index
      %c0_25 = arith.constant 0 : index
      %35 = vector.load %arg4[%c0_22, %c0_23, %c0_24, %c0_25] : memref<1x4x8x32xbf16, #tpu.memory_space<vmem>>, vector<1x1x8x32xbf16>
      %36 = vector.shape_cast %35 : vector<1x1x8x32xbf16> to vector<8x32xbf16>
      %c0_26 = arith.constant 0 : index
      %c0_27 = arith.constant 0 : index
      %37 = vector.load %arg5[%c0_26, %c0_27] : memref<128x128xbf16, #tpu.memory_space<vmem>>, vector<32x128xbf16>
      %cst_28 = arith.constant dense<0.000000e+00> : vector<8x128xf32>
      %38 = tpu.matmul %36, %37, %cst_28 {dimension_numbers = #tpu.dot_dimension_numbers<[1], [0], [0], [1], [0, 0, 1, 1], [], []>} : vector<8x32xbf16>, vector<32x128xbf16>, vector<8x128xf32> -> vector<8x128xf32>
      %39 = arith.addf %34, %38 : vector<8x128xf32>
      %c0_29 = arith.constant 0 : index
      %c1 = arith.constant 1 : index
      %c0_30 = arith.constant 0 : index
      %c0_31 = arith.constant 0 : index
      %40 = vector.load %arg4[%c0_29, %c1, %c0_30, %c0_31] : memref<1x4x8x32xbf16, #tpu.memory_space<vmem>>, vector<1x1x8x32xbf16>
      %41 = vector.shape_cast %40 : vector<1x1x8x32xbf16> to vector<8x32xbf16>
      %c32 = arith.constant 32 : index
      %c0_32 = arith.constant 0 : index
      %42 = vector.load %arg5[%c32, %c0_32] : memref<128x128xbf16, #tpu.memory_space<vmem>>, vector<32x128xbf16>
      %cst_33 = arith.constant dense<0.000000e+00> : vector<8x128xf32>
      %43 = tpu.matmul %41, %42, %cst_33 {dimension_numbers = #tpu.dot_dimension_numbers<[1], [0], [0], [1], [0, 0, 1, 1], [], []>} : vector<8x32xbf16>, vector<32x128xbf16>, vector<8x128xf32> -> vector<8x128xf32>
      %44 = arith.addf %39, %43 : vector<8x128xf32>
      %c0_34 = arith.constant 0 : index
      %c2 = arith.constant 2 : index
      %c0_35 = arith.constant 0 : index
      %c0_36 = arith.constant 0 : index
      %45 = vector.load %arg4[%c0_34, %c2, %c0_35, %c0_36] : memref<1x4x8x32xbf16, #tpu.memory_space<vmem>>, vector<1x1x8x32xbf16>
      %46 = vector.shape_cast %45 : vector<1x1x8x32xbf16> to vector<8x32xbf16>
      %c64 = arith.constant 64 : index
      %c0_37 = arith.constant 0 : index
      %47 = vector.load %arg5[%c64, %c0_37] : memref<128x128xbf16, #tpu.memory_space<vmem>>, vector<32x128xbf16>
      %cst_38 = arith.constant dense<0.000000e+00> : vector<8x128xf32>
      %48 = tpu.matmul %46, %47, %cst_38 {dimension_numbers = #tpu.dot_dimension_numbers<[1], [0], [0], [1], [0, 0, 1, 1], [], []>} : vector<8x32xbf16>, vector<32x128xbf16>, vector<8x128xf32> -> vector<8x128xf32>
      %49 = arith.addf %44, %48 : vector<8x128xf32>
      %c0_39 = arith.constant 0 : index
      %c3 = arith.constant 3 : index
      %c0_40 = arith.constant 0 : index
      %c0_41 = arith.constant 0 : index
      %50 = vector.load %arg4[%c0_39, %c3, %c0_40, %c0_41] : memref<1x4x8x32xbf16, #tpu.memory_space<vmem>>, vector<1x1x8x32xbf16>
      %51 = vector.shape_cast %50 : vector<1x1x8x32xbf16> to vector<8x32xbf16>
      %c96 = arith.constant 96 : index
      %c0_42 = arith.constant 0 : index
      %52 = vector.load %arg5[%c96, %c0_42] : memref<128x128xbf16, #tpu.memory_space<vmem>>, vector<32x128xbf16>
      %cst_43 = arith.constant dense<0.000000e+00> : vector<8x128xf32>
      %53 = tpu.matmul %51, %52, %cst_43 {dimension_numbers = #tpu.dot_dimension_numbers<[1], [0], [0], [1], [0, 0, 1, 1], [], []>} : vector<8x32xbf16>, vector<32x128xbf16>, vector<8x128xf32> -> vector<8x128xf32>
      %54 = arith.addf %49, %53 : vector<8x128xf32>
      %c0_44 = arith.constant 0 : index
      %c0_45 = arith.constant 0 : index
      %55 = vector.load %arg6[%c0_44, %c0_45] : memref<1x128xf32, #tpu.memory_space<vmem>>, vector<1x128xf32>
      %56 = vector.broadcast %55 : vector<1x128xf32> to vector<8x128xf32>
      %57 = arith.addf %54, %56 : vector<8x128xf32>
      %58 = arith.addf %33, %57 : vector<8x128xf32>
      %c0_46 = arith.constant 0 : index
      %c0_47 = arith.constant 0 : index
      %59 = vector.load %arg7[%c0_46, %c0_47] : memref<1x128xf32, #tpu.memory_space<vmem>>, vector<1x128xf32>
      %c0_48 = arith.constant 0 : index
      %c0_49 = arith.constant 0 : index
      %60 = vector.load %arg8[%c0_48, %c0_49] : memref<1x128xf32, #tpu.memory_space<vmem>>, vector<1x128xf32>
      %cst_50 = arith.constant dense<0.000000e+00> : vector<8xf32>
      %61 = vector.multi_reduction <add>, %58, %cst_50 [1] : vector<8x128xf32> to vector<8xf32>
      %62 = vector.shape_cast %61 : vector<8xf32> to vector<8x1xf32>
      %cst_51 = arith.constant 1.280000e+02 : f32
      %63 = vector.broadcast %cst_51 : f32 to vector<8x1xf32>
      %64 = arith.divf %62, %63 : vector<8x1xf32>
      %65 = vector.broadcast %64 : vector<8x1xf32> to vector<8x128xf32>
      %66 = arith.subf %58, %65 : vector<8x128xf32>
      %67 = arith.mulf %66, %66 : vector<8x128xf32>
      %cst_52 = arith.constant dense<0.000000e+00> : vector<8xf32>
      %68 = vector.multi_reduction <add>, %67, %cst_52 [1] : vector<8x128xf32> to vector<8xf32>
      %69 = vector.shape_cast %68 : vector<8xf32> to vector<8x1xf32>
      %cst_53 = arith.constant 1.280000e+02 : f32
      %70 = vector.broadcast %cst_53 : f32 to vector<8x1xf32>
      %71 = arith.divf %69, %70 : vector<8x1xf32>
      %72 = vector.broadcast %64 : vector<8x1xf32> to vector<8x128xf32>
      %73 = arith.subf %58, %72 : vector<8x128xf32>
      %cst_54 = arith.constant 9.99999974E-6 : f32
      %74 = vector.broadcast %cst_54 : f32 to vector<8x1xf32>
      %75 = arith.addf %71, %74 : vector<8x1xf32>
      %76 = math.rsqrt %75 : vector<8x1xf32>
      %77 = vector.broadcast %76 : vector<8x1xf32> to vector<8x128xf32>
      %78 = arith.mulf %73, %77 : vector<8x128xf32>
      %79 = vector.broadcast %59 : vector<1x128xf32> to vector<8x128xf32>
      %80 = arith.mulf %78, %79 : vector<8x128xf32>
      %81 = vector.broadcast %60 : vector<1x128xf32> to vector<8x128xf32>
      %82 = arith.addf %80, %81 : vector<8x128xf32>
      %83 = arith.truncf %82 : vector<8x128xf32> to vector<8x128xbf16>
      %c0_55 = arith.constant 0 : index
      %c0_56 = arith.constant 0 : index
      %84 = vector.load %arg16[%c0_55, %c0_56] : memref<8x128xbf16, #tpu.memory_space<vmem>>, vector<8x128xbf16>
      tpu.vector_store %arg16[%c0_55, %c0_56], %83 {strides = array<i32>} : memref<8x128xbf16, #tpu.memory_space<vmem>>, vector<8x128xbf16>,
      %c0_57 = arith.constant 0 : index
      %c0_58 = arith.constant 0 : index
      %85 = vector.load %arg12[%c0_57, %c0_58] : memref<1x128xf32, #tpu.memory_space<vmem>>, vector<1x128xf32>
      %86 = vector.broadcast %85 : vector<1x128xf32> to vector<8x128xf32>
      %87 = arith.addf %58, %86 : vector<8x128xf32>
      %c0_59 = arith.constant 0 : index
      %c0_60 = arith.constant 0 : index
      %88 = vector.load %arg17[%c0_59, %c0_60] : memref<8x128xf32, #tpu.memory_space<vmem>>, vector<8x128xf32>
      tpu.vector_store %arg17[%c0_59, %c0_60], %87 {strides = array<i32>} : memref<8x128xf32, #tpu.memory_space<vmem>>, vector<8x128xf32>,
    } else {
    }
    %c0 = arith.constant 0 : index
    %c0_1 = arith.constant 0 : index
    %3 = vector.load %arg16[%c0, %c0_1] : memref<8x128xbf16, #tpu.memory_space<vmem>>, vector<8x128xbf16>
    %c0_2 = arith.constant 0 : index
    %c0_3 = arith.constant 0 : index
    %4 = vector.load %arg9[%c0_2, %c0_3] : memref<128x256xbf16, #tpu.memory_space<vmem>>, vector<128x256xbf16>
    %cst = arith.constant dense<0.000000e+00> : vector<8x256xf32>
    %5 = tpu.matmul %3, %4, %cst {dimension_numbers = #tpu.dot_dimension_numbers<[1], [0], [0], [1], [0, 0, 1, 1], [], []>} : vector<8x128xbf16>, vector<128x256xbf16>, vector<8x256xf32> -> vector<8x256xf32>
    %c0_4 = arith.constant 0 : index
    %c0_5 = arith.constant 0 : index
    %6 = vector.load %arg10[%c0_4, %c0_5] : memref<1x256xf32, #tpu.memory_space<vmem>>, vector<1x256xf32>
    %7 = vector.broadcast %6 : vector<1x256xf32> to vector<8x256xf32>
    %8 = arith.addf %5, %7 : vector<8x256xf32>
    %cst_6 = arith.constant 5.000000e-01 : f32
    %9 = vector.broadcast %cst_6 : f32 to vector<8x256xf32>
    %10 = arith.mulf %9, %8 : vector<8x256xf32>
    %11 = arith.mulf %8, %8 : vector<8x256xf32>
    %12 = arith.mulf %8, %11 : vector<8x256xf32>
    %cst_7 = arith.constant 4.471500e-02 : f32
    %13 = vector.broadcast %cst_7 : f32 to vector<8x256xf32>
    %14 = arith.mulf %13, %12 : vector<8x256xf32>
    %15 = arith.addf %8, %14 : vector<8x256xf32>
    %cst_8 = arith.constant 0.797884583 : f32
    %16 = vector.broadcast %cst_8 : f32 to vector<8x256xf32>
    %17 = arith.mulf %16, %15 : vector<8x256xf32>
    %18 = math.tanh %17 : vector<8x256xf32>
    %cst_9 = arith.constant 1.000000e+00 : f32
    %19 = vector.broadcast %cst_9 : f32 to vector<8x256xf32>
    %20 = arith.addf %19, %18 : vector<8x256xf32>
    %21 = arith.mulf %10, %20 : vector<8x256xf32>
    %c0_10 = arith.constant 0 : index
    %c0_11 = arith.constant 0 : index
    %22 = vector.load %arg17[%c0_10, %c0_11] : memref<8x128xf32, #tpu.memory_space<vmem>>, vector<8x128xf32>
    %23 = arith.truncf %21 : vector<8x256xf32> to vector<8x256xbf16>
    %c0_12 = arith.constant 0 : index
    %c0_13 = arith.constant 0 : index
    %24 = vector.load %arg11[%c0_12, %c0_13] : memref<256x128xbf16, #tpu.memory_space<vmem>>, vector<256x128xbf16>
    %cst_14 = arith.constant dense<0.000000e+00> : vector<8x128xf32>
    %25 = tpu.matmul %23, %24, %cst_14 {dimension_numbers = #tpu.dot_dimension_numbers<[1], [0], [0], [1], [0, 0, 1, 1], [], []>} : vector<8x256xbf16>, vector<256x128xbf16>, vector<8x128xf32> -> vector<8x128xf32>
    %26 = arith.addf %22, %25 : vector<8x128xf32>
    %c0_15 = arith.constant 0 : index
    %c0_16 = arith.constant 0 : index
    %27 = vector.load %arg17[%c0_15, %c0_16] : memref<8x128xf32, #tpu.memory_space<vmem>>, vector<8x128xf32>
    tpu.vector_store %arg17[%c0_15, %c0_16], %26 {strides = array<i32>} : memref<8x128xf32, #tpu.memory_space<vmem>>, vector<8x128xf32>,
    %c1_i32 = arith.constant 1 : i32
    %28 = arith.cmpi eq, %arg2, %c1_i32 : i32
    %29 = arith.extui %28 : i1 to i32
    %c0_i32_17 = arith.constant 0 : i32
    %30 = arith.cmpi ne, %29, %c0_i32_17 : i32
    scf.if %30 {
      %c0_18 = arith.constant 0 : index
      %c0_19 = arith.constant 0 : index
      %31 = vector.load %arg17[%c0_18, %c0_19] : memref<8x128xf32, #tpu.memory_space<vmem>>, vector<8x128xf32>
      %c0_20 = arith.constant 0 : index
      %c0_21 = arith.constant 0 : index
      %32 = vector.load %arg13[%c0_20, %c0_21] : memref<1x128xf32, #tpu.memory_space<vmem>>, vector<1x128xf32>
      %c0_22 = arith.constant 0 : index
      %c0_23 = arith.constant 0 : index
      %33 = vector.load %arg14[%c0_22, %c0_23] : memref<1x128xf32, #tpu.memory_space<vmem>>, vector<1x128xf32>
      %cst_24 = arith.constant dense<0.000000e+00> : vector<8xf32>
      %34 = vector.multi_reduction <add>, %31, %cst_24 [1] : vector<8x128xf32> to vector<8xf32>
      %35 = vector.shape_cast %34 : vector<8xf32> to vector<8x1xf32>
      %cst_25 = arith.constant 1.280000e+02 : f32
      %36 = vector.broadcast %cst_25 : f32 to vector<8x1xf32>
      %37 = arith.divf %35, %36 : vector<8x1xf32>
      %38 = vector.broadcast %37 : vector<8x1xf32> to vector<8x128xf32>
      %39 = arith.subf %31, %38 : vector<8x128xf32>
      %40 = arith.mulf %39, %39 : vector<8x128xf32>
      %cst_26 = arith.constant dense<0.000000e+00> : vector<8xf32>
      %41 = vector.multi_reduction <add>, %40, %cst_26 [1] : vector<8x128xf32> to vector<8xf32>
      %42 = vector.shape_cast %41 : vector<8xf32> to vector<8x1xf32>
      %cst_27 = arith.constant 1.280000e+02 : f32
      %43 = vector.broadcast %cst_27 : f32 to vector<8x1xf32>
      %44 = arith.divf %42, %43 : vector<8x1xf32>
      %45 = vector.broadcast %37 : vector<8x1xf32> to vector<8x128xf32>
      %46 = arith.subf %31, %45 : vector<8x128xf32>
      %cst_28 = arith.constant 9.99999974E-6 : f32
      %47 = vector.broadcast %cst_28 : f32 to vector<8x1xf32>
      %48 = arith.addf %44, %47 : vector<8x1xf32>
      %49 = math.rsqrt %48 : vector<8x1xf32>
      %50 = vector.broadcast %49 : vector<8x1xf32> to vector<8x128xf32>
      %51 = arith.mulf %46, %50 : vector<8x128xf32>
      %52 = vector.broadcast %32 : vector<1x128xf32> to vector<8x128xf32>
      %53 = arith.mulf %51, %52 : vector<8x128xf32>
      %54 = vector.broadcast %33 : vector<1x128xf32> to vector<8x128xf32>
      %55 = arith.addf %53, %54 : vector<8x128xf32>
      %c0_29 = arith.constant 0 : index
      %c0_30 = arith.constant 0 : index
      %c0_31 = arith.constant 0 : index
      %56 = vector.load %arg15[%c0_29, %c0_30, %c0_31] : memref<1x8x128xf32, #tpu.memory_space<vmem>>, vector<1x8x128xf32>
      %57 = vector.shape_cast %56 : vector<1x8x128xf32> to vector<8x128xf32>
      %58 = vector.shape_cast %55 : vector<8x128xf32> to vector<1x8x128xf32>
      tpu.vector_store %arg15[%c0_29, %c0_30, %c0_31], %58 {strides = array<i32>} : memref<1x8x128xf32, #tpu.memory_space<vmem>>, vector<1x8x128xf32>,
    } else {
    }
    return
  }
  func.func @transform_0(%arg0: i32, %arg1: i32, %arg2: i32) -> (i32, i32, i32) {
    %c0_i32 = arith.constant 0 : i32
    %c0_i32_0 = arith.constant 0 : i32
    return %arg0, %arg1, %c0_i32 : i32, i32, i32
  }
  func.func @transform_1(%arg0: i32, %arg1: i32, %arg2: i32) -> (i32, i32, i32, i32) {
    %c0_i32 = arith.constant 0 : i32
    %c0_i32_0 = arith.constant 0 : i32
    %c0_i32_1 = arith.constant 0 : i32
    return %arg0, %c0_i32, %arg1, %c0_i32_0 : i32, i32, i32, i32
  }
  func.func @transform_2(%arg0: i32, %arg1: i32, %arg2: i32) -> (i32, i32) {
    %c0_i32 = arith.constant 0 : i32
    %c0_i32_0 = arith.constant 0 : i32
    %c0_i32_1 = arith.constant 0 : i32
    return %c0_i32, %c0_i32_0 : i32, i32
  }
  func.func @transform_3(%arg0: i32, %arg1: i32, %arg2: i32) -> (i32, i32) {
    %c0_i32 = arith.constant 0 : i32
    %c0_i32_0 = arith.constant 0 : i32
    %c0_i32_1 = arith.constant 0 : i32
    return %c0_i32, %c0_i32_0 : i32, i32
  }
  func.func @transform_4(%arg0: i32, %arg1: i32, %arg2: i32) -> (i32, i32) {
    %c0_i32 = arith.constant 0 : i32
    %c0_i32_0 = arith.constant 0 : i32
    %c0_i32_1 = arith.constant 0 : i32
    return %c0_i32, %c0_i32_0 : i32, i32
  }
  func.func @transform_5(%arg0: i32, %arg1: i32, %arg2: i32) -> (i32, i32) {
    %c0_i32 = arith.constant 0 : i32
    %c0_i32_0 = arith.constant 0 : i32
    %c0_i32_1 = arith.constant 0 : i32
    return %c0_i32, %c0_i32_0 : i32, i32
  }
  func.func @transform_6(%arg0: i32, %arg1: i32, %arg2: i32) -> (i32, i32) {
    %c0_i32 = arith.constant 0 : i32
    %c0_i32_0 = arith.constant 0 : i32
    return %c0_i32, %arg2 : i32, i32
  }
  func.func @transform_7(%arg0: i32, %arg1: i32, %arg2: i32) -> (i32, i32) {
    %c0_i32 = arith.constant 0 : i32
    %c0_i32_0 = arith.constant 0 : i32
    return %c0_i32, %arg2 : i32, i32
  }
  func.func @transform_8(%arg0: i32, %arg1: i32, %arg2: i32) -> (i32, i32) {
    %c0_i32 = arith.constant 0 : i32
    %c0_i32_0 = arith.constant 0 : i32
    return %arg2, %c0_i32 : i32, i32
  }
  func.func @transform_9(%arg0: i32, %arg1: i32, %arg2: i32) -> (i32, i32) {
    %c0_i32 = arith.constant 0 : i32
    %c0_i32_0 = arith.constant 0 : i32
    %c0_i32_1 = arith.constant 0 : i32
    return %c0_i32, %c0_i32_0 : i32, i32
  }
  func.func @transform_10(%arg0: i32, %arg1: i32, %arg2: i32) -> (i32, i32) {
    %c0_i32 = arith.constant 0 : i32
    %c0_i32_0 = arith.constant 0 : i32
    %c0_i32_1 = arith.constant 0 : i32
    return %c0_i32, %c0_i32_0 : i32, i32
  }
  func.func @transform_11(%arg0: i32, %arg1: i32, %arg2: i32) -> (i32, i32) {
    %c0_i32 = arith.constant 0 : i32
    %c0_i32_0 = arith.constant 0 : i32
    %c0_i32_1 = arith.constant 0 : i32
    return %c0_i32, %c0_i32_0 : i32, i32
  }
  func.func @transform_12(%arg0: i32, %arg1: i32, %arg2: i32) -> (i32, i32, i32) {
    %c0_i32 = arith.constant 0 : i32
    %c0_i32_0 = arith.constant 0 : i32
    return %arg0, %arg1, %c0_i32 : i32, i32, i32
  }
}

module attributes {stable_mosaic.version = 11 : i64} {
  func.func @qkv_kernel(%arg0: i32, %arg1: i32, %arg2: memref<1x8x128xbf16, #tpu.memory_space<vmem>>, %arg3: memref<1x128xf32, #tpu.memory_space<vmem>>, %arg4: memref<1x128xf32, #tpu.memory_space<vmem>>, %arg5: memref<128x384xbf16, #tpu.memory_space<vmem>>, %arg6: memref<1x384xf32, #tpu.memory_space<vmem>>, %arg7: memref<1x4x8x32xbf16, #tpu.memory_space<vmem>>, %arg8: memref<1x4x8x32xbf16, #tpu.memory_space<vmem>>, %arg9: memref<1x4x8x32xbf16, #tpu.memory_space<vmem>>) attributes {dimension_semantics = [#tpu.dimension_semantics<parallel>, #tpu.dimension_semantics<parallel>], iteration_bounds = array<i64: 2, 2>, scalar_prefetch = 0 : i64, scratch_operands = 0 : i64, tpu.core_type = #tpu.core_type<tc>, window_params = [{transform_indices = @transform_0, window_bounds = array<i64: 1, 8, 128>}, {pipeline_mode = #tpu.pipeline_mode<synchronous>, transform_indices = @transform_1, window_bounds = array<i64: 1, 128>}, {pipeline_mode = #tpu.pipeline_mode<synchronous>, transform_indices = @transform_2, window_bounds = array<i64: 1, 128>}, {pipeline_mode = #tpu.pipeline_mode<synchronous>, transform_indices = @transform_3, window_bounds = array<i64: 128, 384>}, {pipeline_mode = #tpu.pipeline_mode<synchronous>, transform_indices = @transform_4, window_bounds = array<i64: 1, 384>}, {transform_indices = @transform_5, window_bounds = array<i64: 1, 4, 8, 32>}, {transform_indices = @transform_6, window_bounds = array<i64: 1, 4, 8, 32>}, {transform_indices = @transform_7, window_bounds = array<i64: 1, 4, 8, 32>}]} {
    %c0 = arith.constant 0 : index
    %c0_0 = arith.constant 0 : index
    %c0_1 = arith.constant 0 : index
    %0 = vector.load %arg2[%c0, %c0_0, %c0_1] : memref<1x8x128xbf16, #tpu.memory_space<vmem>>, vector<1x8x128xbf16>
    %1 = vector.shape_cast %0 : vector<1x8x128xbf16> to vector<8x128xbf16>
    %2 = arith.extf %1 : vector<8x128xbf16> to vector<8x128xf32>
    %c0_2 = arith.constant 0 : index
    %c0_3 = arith.constant 0 : index
    %3 = vector.load %arg3[%c0_2, %c0_3] : memref<1x128xf32, #tpu.memory_space<vmem>>, vector<1x128xf32>
    %c0_4 = arith.constant 0 : index
    %c0_5 = arith.constant 0 : index
    %4 = vector.load %arg4[%c0_4, %c0_5] : memref<1x128xf32, #tpu.memory_space<vmem>>, vector<1x128xf32>
    %cst = arith.constant dense<0.000000e+00> : vector<8xf32>
    %5 = vector.multi_reduction <add>, %2, %cst [1] : vector<8x128xf32> to vector<8xf32>
    %6 = vector.shape_cast %5 : vector<8xf32> to vector<8x1xf32>
    %cst_6 = arith.constant 1.280000e+02 : f32
    %7 = vector.broadcast %cst_6 : f32 to vector<8x1xf32>
    %8 = arith.divf %6, %7 : vector<8x1xf32>
    %9 = vector.broadcast %8 : vector<8x1xf32> to vector<8x128xf32>
    %10 = arith.subf %2, %9 : vector<8x128xf32>
    %11 = arith.mulf %10, %10 : vector<8x128xf32>
    %cst_7 = arith.constant dense<0.000000e+00> : vector<8xf32>
    %12 = vector.multi_reduction <add>, %11, %cst_7 [1] : vector<8x128xf32> to vector<8xf32>
    %13 = vector.shape_cast %12 : vector<8xf32> to vector<8x1xf32>
    %cst_8 = arith.constant 1.280000e+02 : f32
    %14 = vector.broadcast %cst_8 : f32 to vector<8x1xf32>
    %15 = arith.divf %13, %14 : vector<8x1xf32>
    %16 = vector.broadcast %8 : vector<8x1xf32> to vector<8x128xf32>
    %17 = arith.subf %2, %16 : vector<8x128xf32>
    %cst_9 = arith.constant 9.99999974E-6 : f32
    %18 = vector.broadcast %cst_9 : f32 to vector<8x1xf32>
    %19 = arith.addf %15, %18 : vector<8x1xf32>
    %20 = math.rsqrt %19 : vector<8x1xf32>
    %21 = vector.broadcast %20 : vector<8x1xf32> to vector<8x128xf32>
    %22 = arith.mulf %17, %21 : vector<8x128xf32>
    %23 = vector.broadcast %3 : vector<1x128xf32> to vector<8x128xf32>
    %24 = arith.mulf %22, %23 : vector<8x128xf32>
    %25 = vector.broadcast %4 : vector<1x128xf32> to vector<8x128xf32>
    %26 = arith.addf %24, %25 : vector<8x128xf32>
    %27 = arith.truncf %26 : vector<8x128xf32> to vector<8x128xbf16>
    %c0_10 = arith.constant 0 : index
    %c0_11 = arith.constant 0 : index
    %28 = vector.load %arg5[%c0_10, %c0_11] : memref<128x384xbf16, #tpu.memory_space<vmem>>, vector<128x384xbf16>
    %cst_12 = arith.constant dense<0.000000e+00> : vector<8x384xf32>
    %29 = tpu.matmul %27, %28, %cst_12 {dimension_numbers = #tpu.dot_dimension_numbers<[1], [0], [0], [1], [0, 0, 1, 1], [], []>} : vector<8x128xbf16>, vector<128x384xbf16>, vector<8x384xf32> -> vector<8x384xf32>
    %c0_13 = arith.constant 0 : index
    %c0_14 = arith.constant 0 : index
    %30 = vector.load %arg6[%c0_13, %c0_14] : memref<1x384xf32, #tpu.memory_space<vmem>>, vector<1x384xf32>
    %31 = vector.broadcast %30 : vector<1x384xf32> to vector<8x384xf32>
    %32 = arith.addf %29, %31 : vector<8x384xf32>
    %33 = vector.extract_strided_slice %32 {offsets = [0, 0], sizes = [8, 32], strides = [1, 1]} : vector<8x384xf32> to vector<8x32xf32>
    %cst_15 = arith.constant 0.176776692 : f32
    %34 = vector.broadcast %cst_15 : f32 to vector<8x32xf32>
    %35 = arith.mulf %33, %34 : vector<8x32xf32>
    %36 = arith.truncf %35 : vector<8x32xf32> to vector<8x32xbf16>
    %c0_16 = arith.constant 0 : index
    %c0_17 = arith.constant 0 : index
    %c0_18 = arith.constant 0 : index
    %c0_19 = arith.constant 0 : index
    %37 = vector.load %arg7[%c0_16, %c0_17, %c0_18, %c0_19] : memref<1x4x8x32xbf16, #tpu.memory_space<vmem>>, vector<1x1x8x32xbf16>
    %38 = vector.shape_cast %37 : vector<1x1x8x32xbf16> to vector<8x32xbf16>
    %39 = vector.shape_cast %36 : vector<8x32xbf16> to vector<1x1x8x32xbf16>
    tpu.vector_store %arg7[%c0_16, %c0_17, %c0_18, %c0_19], %39 {strides = array<i32>} : memref<1x4x8x32xbf16, #tpu.memory_space<vmem>>, vector<1x1x8x32xbf16>,
    %40 = vector.extract_strided_slice %32 {offsets = [0, 128], sizes = [8, 32], strides = [1, 1]} : vector<8x384xf32> to vector<8x32xf32>
    %41 = arith.truncf %40 : vector<8x32xf32> to vector<8x32xbf16>
    %c0_20 = arith.constant 0 : index
    %c0_21 = arith.constant 0 : index
    %c0_22 = arith.constant 0 : index
    %c0_23 = arith.constant 0 : index
    %42 = vector.load %arg8[%c0_20, %c0_21, %c0_22, %c0_23] : memref<1x4x8x32xbf16, #tpu.memory_space<vmem>>, vector<1x1x8x32xbf16>
    %43 = vector.shape_cast %42 : vector<1x1x8x32xbf16> to vector<8x32xbf16>
    %44 = vector.shape_cast %41 : vector<8x32xbf16> to vector<1x1x8x32xbf16>
    tpu.vector_store %arg8[%c0_20, %c0_21, %c0_22, %c0_23], %44 {strides = array<i32>} : memref<1x4x8x32xbf16, #tpu.memory_space<vmem>>, vector<1x1x8x32xbf16>,
    %45 = vector.extract_strided_slice %32 {offsets = [0, 256], sizes = [8, 32], strides = [1, 1]} : vector<8x384xf32> to vector<8x32xf32>
    %46 = arith.truncf %45 : vector<8x32xf32> to vector<8x32xbf16>
    %c0_24 = arith.constant 0 : index
    %c0_25 = arith.constant 0 : index
    %c0_26 = arith.constant 0 : index
    %c0_27 = arith.constant 0 : index
    %47 = vector.load %arg9[%c0_24, %c0_25, %c0_26, %c0_27] : memref<1x4x8x32xbf16, #tpu.memory_space<vmem>>, vector<1x1x8x32xbf16>
    %48 = vector.shape_cast %47 : vector<1x1x8x32xbf16> to vector<8x32xbf16>
    %49 = vector.shape_cast %46 : vector<8x32xbf16> to vector<1x1x8x32xbf16>
    tpu.vector_store %arg9[%c0_24, %c0_25, %c0_26, %c0_27], %49 {strides = array<i32>} : memref<1x4x8x32xbf16, #tpu.memory_space<vmem>>, vector<1x1x8x32xbf16>,
    %50 = vector.extract_strided_slice %32 {offsets = [0, 32], sizes = [8, 32], strides = [1, 1]} : vector<8x384xf32> to vector<8x32xf32>
    %cst_28 = arith.constant 0.176776692 : f32
    %51 = vector.broadcast %cst_28 : f32 to vector<8x32xf32>
    %52 = arith.mulf %50, %51 : vector<8x32xf32>
    %53 = arith.truncf %52 : vector<8x32xf32> to vector<8x32xbf16>
    %c0_29 = arith.constant 0 : index
    %c1 = arith.constant 1 : index
    %c0_30 = arith.constant 0 : index
    %c0_31 = arith.constant 0 : index
    %54 = vector.load %arg7[%c0_29, %c1, %c0_30, %c0_31] : memref<1x4x8x32xbf16, #tpu.memory_space<vmem>>, vector<1x1x8x32xbf16>
    %55 = vector.shape_cast %54 : vector<1x1x8x32xbf16> to vector<8x32xbf16>
    %56 = vector.shape_cast %53 : vector<8x32xbf16> to vector<1x1x8x32xbf16>
    tpu.vector_store %arg7[%c0_29, %c1, %c0_30, %c0_31], %56 {strides = array<i32>} : memref<1x4x8x32xbf16, #tpu.memory_space<vmem>>, vector<1x1x8x32xbf16>,
    %57 = vector.extract_strided_slice %32 {offsets = [0, 160], sizes = [8, 32], strides = [1, 1]} : vector<8x384xf32> to vector<8x32xf32>
    %58 = arith.truncf %57 : vector<8x32xf32> to vector<8x32xbf16>
    %c0_32 = arith.constant 0 : index
    %c1_33 = arith.constant 1 : index
    %c0_34 = arith.constant 0 : index
    %c0_35 = arith.constant 0 : index
    %59 = vector.load %arg8[%c0_32, %c1_33, %c0_34, %c0_35] : memref<1x4x8x32xbf16, #tpu.memory_space<vmem>>, vector<1x1x8x32xbf16>
    %60 = vector.shape_cast %59 : vector<1x1x8x32xbf16> to vector<8x32xbf16>
    %61 = vector.shape_cast %58 : vector<8x32xbf16> to vector<1x1x8x32xbf16>
    tpu.vector_store %arg8[%c0_32, %c1_33, %c0_34, %c0_35], %61 {strides = array<i32>} : memref<1x4x8x32xbf16, #tpu.memory_space<vmem>>, vector<1x1x8x32xbf16>,
    %62 = vector.extract_strided_slice %32 {offsets = [0, 288], sizes = [8, 32], strides = [1, 1]} : vector<8x384xf32> to vector<8x32xf32>
    %63 = arith.truncf %62 : vector<8x32xf32> to vector<8x32xbf16>
    %c0_36 = arith.constant 0 : index
    %c1_37 = arith.constant 1 : index
    %c0_38 = arith.constant 0 : index
    %c0_39 = arith.constant 0 : index
    %64 = vector.load %arg9[%c0_36, %c1_37, %c0_38, %c0_39] : memref<1x4x8x32xbf16, #tpu.memory_space<vmem>>, vector<1x1x8x32xbf16>
    %65 = vector.shape_cast %64 : vector<1x1x8x32xbf16> to vector<8x32xbf16>
    %66 = vector.shape_cast %63 : vector<8x32xbf16> to vector<1x1x8x32xbf16>
    tpu.vector_store %arg9[%c0_36, %c1_37, %c0_38, %c0_39], %66 {strides = array<i32>} : memref<1x4x8x32xbf16, #tpu.memory_space<vmem>>, vector<1x1x8x32xbf16>,
    %67 = vector.extract_strided_slice %32 {offsets = [0, 64], sizes = [8, 32], strides = [1, 1]} : vector<8x384xf32> to vector<8x32xf32>
    %cst_40 = arith.constant 0.176776692 : f32
    %68 = vector.broadcast %cst_40 : f32 to vector<8x32xf32>
    %69 = arith.mulf %67, %68 : vector<8x32xf32>
    %70 = arith.truncf %69 : vector<8x32xf32> to vector<8x32xbf16>
    %c0_41 = arith.constant 0 : index
    %c2 = arith.constant 2 : index
    %c0_42 = arith.constant 0 : index
    %c0_43 = arith.constant 0 : index
    %71 = vector.load %arg7[%c0_41, %c2, %c0_42, %c0_43] : memref<1x4x8x32xbf16, #tpu.memory_space<vmem>>, vector<1x1x8x32xbf16>
    %72 = vector.shape_cast %71 : vector<1x1x8x32xbf16> to vector<8x32xbf16>
    %73 = vector.shape_cast %70 : vector<8x32xbf16> to vector<1x1x8x32xbf16>
    tpu.vector_store %arg7[%c0_41, %c2, %c0_42, %c0_43], %73 {strides = array<i32>} : memref<1x4x8x32xbf16, #tpu.memory_space<vmem>>, vector<1x1x8x32xbf16>,
    %74 = vector.extract_strided_slice %32 {offsets = [0, 192], sizes = [8, 32], strides = [1, 1]} : vector<8x384xf32> to vector<8x32xf32>
    %75 = arith.truncf %74 : vector<8x32xf32> to vector<8x32xbf16>
    %c0_44 = arith.constant 0 : index
    %c2_45 = arith.constant 2 : index
    %c0_46 = arith.constant 0 : index
    %c0_47 = arith.constant 0 : index
    %76 = vector.load %arg8[%c0_44, %c2_45, %c0_46, %c0_47] : memref<1x4x8x32xbf16, #tpu.memory_space<vmem>>, vector<1x1x8x32xbf16>
    %77 = vector.shape_cast %76 : vector<1x1x8x32xbf16> to vector<8x32xbf16>
    %78 = vector.shape_cast %75 : vector<8x32xbf16> to vector<1x1x8x32xbf16>
    tpu.vector_store %arg8[%c0_44, %c2_45, %c0_46, %c0_47], %78 {strides = array<i32>} : memref<1x4x8x32xbf16, #tpu.memory_space<vmem>>, vector<1x1x8x32xbf16>,
    %79 = vector.extract_strided_slice %32 {offsets = [0, 320], sizes = [8, 32], strides = [1, 1]} : vector<8x384xf32> to vector<8x32xf32>
    %80 = arith.truncf %79 : vector<8x32xf32> to vector<8x32xbf16>
    %c0_48 = arith.constant 0 : index
    %c2_49 = arith.constant 2 : index
    %c0_50 = arith.constant 0 : index
    %c0_51 = arith.constant 0 : index
    %81 = vector.load %arg9[%c0_48, %c2_49, %c0_50, %c0_51] : memref<1x4x8x32xbf16, #tpu.memory_space<vmem>>, vector<1x1x8x32xbf16>
    %82 = vector.shape_cast %81 : vector<1x1x8x32xbf16> to vector<8x32xbf16>
    %83 = vector.shape_cast %80 : vector<8x32xbf16> to vector<1x1x8x32xbf16>
    tpu.vector_store %arg9[%c0_48, %c2_49, %c0_50, %c0_51], %83 {strides = array<i32>} : memref<1x4x8x32xbf16, #tpu.memory_space<vmem>>, vector<1x1x8x32xbf16>,
    %84 = vector.extract_strided_slice %32 {offsets = [0, 96], sizes = [8, 32], strides = [1, 1]} : vector<8x384xf32> to vector<8x32xf32>
    %cst_52 = arith.constant 0.176776692 : f32
    %85 = vector.broadcast %cst_52 : f32 to vector<8x32xf32>
    %86 = arith.mulf %84, %85 : vector<8x32xf32>
    %87 = arith.truncf %86 : vector<8x32xf32> to vector<8x32xbf16>
    %c0_53 = arith.constant 0 : index
    %c3 = arith.constant 3 : index
    %c0_54 = arith.constant 0 : index
    %c0_55 = arith.constant 0 : index
    %88 = vector.load %arg7[%c0_53, %c3, %c0_54, %c0_55] : memref<1x4x8x32xbf16, #tpu.memory_space<vmem>>, vector<1x1x8x32xbf16>
    %89 = vector.shape_cast %88 : vector<1x1x8x32xbf16> to vector<8x32xbf16>
    %90 = vector.shape_cast %87 : vector<8x32xbf16> to vector<1x1x8x32xbf16>
    tpu.vector_store %arg7[%c0_53, %c3, %c0_54, %c0_55], %90 {strides = array<i32>} : memref<1x4x8x32xbf16, #tpu.memory_space<vmem>>, vector<1x1x8x32xbf16>,
    %91 = vector.extract_strided_slice %32 {offsets = [0, 224], sizes = [8, 32], strides = [1, 1]} : vector<8x384xf32> to vector<8x32xf32>
    %92 = arith.truncf %91 : vector<8x32xf32> to vector<8x32xbf16>
    %c0_56 = arith.constant 0 : index
    %c3_57 = arith.constant 3 : index
    %c0_58 = arith.constant 0 : index
    %c0_59 = arith.constant 0 : index
    %93 = vector.load %arg8[%c0_56, %c3_57, %c0_58, %c0_59] : memref<1x4x8x32xbf16, #tpu.memory_space<vmem>>, vector<1x1x8x32xbf16>
    %94 = vector.shape_cast %93 : vector<1x1x8x32xbf16> to vector<8x32xbf16>
    %95 = vector.shape_cast %92 : vector<8x32xbf16> to vector<1x1x8x32xbf16>
    tpu.vector_store %arg8[%c0_56, %c3_57, %c0_58, %c0_59], %95 {strides = array<i32>} : memref<1x4x8x32xbf16, #tpu.memory_space<vmem>>, vector<1x1x8x32xbf16>,
    %96 = vector.extract_strided_slice %32 {offsets = [0, 352], sizes = [8, 32], strides = [1, 1]} : vector<8x384xf32> to vector<8x32xf32>
    %97 = arith.truncf %96 : vector<8x32xf32> to vector<8x32xbf16>
    %c0_60 = arith.constant 0 : index
    %c3_61 = arith.constant 3 : index
    %c0_62 = arith.constant 0 : index
    %c0_63 = arith.constant 0 : index
    %98 = vector.load %arg9[%c0_60, %c3_61, %c0_62, %c0_63] : memref<1x4x8x32xbf16, #tpu.memory_space<vmem>>, vector<1x1x8x32xbf16>
    %99 = vector.shape_cast %98 : vector<1x1x8x32xbf16> to vector<8x32xbf16>
    %100 = vector.shape_cast %97 : vector<8x32xbf16> to vector<1x1x8x32xbf16>
    tpu.vector_store %arg9[%c0_60, %c3_61, %c0_62, %c0_63], %100 {strides = array<i32>} : memref<1x4x8x32xbf16, #tpu.memory_space<vmem>>, vector<1x1x8x32xbf16>,
    return
  }
  func.func @transform_0(%arg0: i32, %arg1: i32) -> (i32, i32, i32) {
    %c0_i32 = arith.constant 0 : i32
    %c0_i32_0 = arith.constant 0 : i32
    return %arg0, %arg1, %c0_i32 : i32, i32, i32
  }
  func.func @transform_1(%arg0: i32, %arg1: i32) -> (i32, i32) {
    %c0_i32 = arith.constant 0 : i32
    %c0_i32_0 = arith.constant 0 : i32
    %c0_i32_1 = arith.constant 0 : i32
    return %c0_i32, %c0_i32_0 : i32, i32
  }
  func.func @transform_2(%arg0: i32, %arg1: i32) -> (i32, i32) {
    %c0_i32 = arith.constant 0 : i32
    %c0_i32_0 = arith.constant 0 : i32
    %c0_i32_1 = arith.constant 0 : i32
    return %c0_i32, %c0_i32_0 : i32, i32
  }
  func.func @transform_3(%arg0: i32, %arg1: i32) -> (i32, i32) {
    %c0_i32 = arith.constant 0 : i32
    %c0_i32_0 = arith.constant 0 : i32
    %c0_i32_1 = arith.constant 0 : i32
    return %c0_i32, %c0_i32_0 : i32, i32
  }
  func.func @transform_4(%arg0: i32, %arg1: i32) -> (i32, i32) {
    %c0_i32 = arith.constant 0 : i32
    %c0_i32_0 = arith.constant 0 : i32
    %c0_i32_1 = arith.constant 0 : i32
    return %c0_i32, %c0_i32_0 : i32, i32
  }
  func.func @transform_5(%arg0: i32, %arg1: i32) -> (i32, i32, i32, i32) {
    %c0_i32 = arith.constant 0 : i32
    %c0_i32_0 = arith.constant 0 : i32
    %c0_i32_1 = arith.constant 0 : i32
    return %arg0, %c0_i32, %arg1, %c0_i32_0 : i32, i32, i32, i32
  }
  func.func @transform_6(%arg0: i32, %arg1: i32) -> (i32, i32, i32, i32) {
    %c0_i32 = arith.constant 0 : i32
    %c0_i32_0 = arith.constant 0 : i32
    %c0_i32_1 = arith.constant 0 : i32
    return %arg0, %c0_i32, %arg1, %c0_i32_0 : i32, i32, i32, i32
  }
  func.func @transform_7(%arg0: i32, %arg1: i32) -> (i32, i32, i32, i32) {
    %c0_i32 = arith.constant 0 : i32
    %c0_i32_0 = arith.constant 0 : i32
    %c0_i32_1 = arith.constant 0 : i32
    return %arg0, %c0_i32, %arg1, %c0_i32_0 : i32, i32, i32, i32
  }
}

module attributes {stable_mosaic.version = 11 : i64} {
  func.func @flash_kernel(%arg0: i32, %arg1: i32, %arg2: i32, %arg3: i32, %arg4: memref<1x1x8x32xbf16, #tpu.memory_space<vmem>>, %arg5: memref<1x1x8x32xbf16, #tpu.memory_space<vmem>>, %arg6: memref<1x1x8x32xbf16, #tpu.memory_space<vmem>>, %arg7: memref<1x1x8x32xbf16, #tpu.memory_space<vmem>>, %arg8: memref<8x1xf32, #tpu.memory_space<vmem>>, %arg9: memref<8x1xf32, #tpu.memory_space<vmem>>, %arg10: memref<8x32xf32, #tpu.memory_space<vmem>>) attributes {dimension_semantics = [#tpu.dimension_semantics<parallel>, #tpu.dimension_semantics<parallel>, #tpu.dimension_semantics<parallel>, #tpu.dimension_semantics<arbitrary>], iteration_bounds = array<i64: 2, 4, 2, 2>, scalar_prefetch = 0 : i64, scratch_operands = 3 : i64, tpu.core_type = #tpu.core_type<tc>, window_params = [{transform_indices = @transform_0, window_bounds = array<i64: 1, 1, 8, 32>}, {transform_indices = @transform_1, window_bounds = array<i64: 1, 1, 8, 32>}, {transform_indices = @transform_2, window_bounds = array<i64: 1, 1, 8, 32>}, {transform_indices = @transform_3, window_bounds = array<i64: 1, 1, 8, 32>}]} {
    %c0_i32 = arith.constant 0 : i32
    %0 = arith.cmpi eq, %arg3, %c0_i32 : i32
    %1 = arith.extui %0 : i1 to i32
    %c0_i32_0 = arith.constant 0 : i32
    %2 = arith.cmpi ne, %1, %c0_i32_0 : i32
    scf.if %2 {
      %cst = arith.constant 0xFF800000 : f32
      %9 = vector.broadcast %cst : f32 to vector<8x1xf32>
      %c0 = arith.constant 0 : index
      %c0_3 = arith.constant 0 : index
      %10 = vector.load %arg8[%c0, %c0_3] : memref<8x1xf32, #tpu.memory_space<vmem>>, vector<8x1xf32>
      tpu.vector_store %arg8[%c0, %c0_3], %9 {strides = array<i32>} : memref<8x1xf32, #tpu.memory_space<vmem>>, vector<8x1xf32>,
      %cst_4 = arith.constant 0.000000e+00 : f32
      %11 = vector.broadcast %cst_4 : f32 to vector<8x1xf32>
      %c0_5 = arith.constant 0 : index
      %c0_6 = arith.constant 0 : index
      %12 = vector.load %arg9[%c0_5, %c0_6] : memref<8x1xf32, #tpu.memory_space<vmem>>, vector<8x1xf32>
      tpu.vector_store %arg9[%c0_5, %c0_6], %11 {strides = array<i32>} : memref<8x1xf32, #tpu.memory_space<vmem>>, vector<8x1xf32>,
      %cst_7 = arith.constant 0.000000e+00 : f32
      %13 = vector.broadcast %cst_7 : f32 to vector<8x32xf32>
      %c0_8 = arith.constant 0 : index
      %c0_9 = arith.constant 0 : index
      %14 = vector.load %arg10[%c0_8, %c0_9] : memref<8x32xf32, #tpu.memory_space<vmem>>, vector<8x32xf32>
      tpu.vector_store %arg10[%c0_8, %c0_9], %13 {strides = array<i32>} : memref<8x32xf32, #tpu.memory_space<vmem>>, vector<8x32xf32>,
    } else {
    }
    %3 = arith.cmpi sle, %arg3, %arg2 : i32
    %4 = arith.extui %3 : i1 to i32
    %c0_i32_1 = arith.constant 0 : i32
    %5 = arith.cmpi ne, %4, %c0_i32_1 : i32
    scf.if %5 {
      %c0 = arith.constant 0 : index
      %c0_3 = arith.constant 0 : index
      %c0_4 = arith.constant 0 : index
      %c0_5 = arith.constant 0 : index
      %9 = vector.load %arg4[%c0, %c0_3, %c0_4, %c0_5] : memref<1x1x8x32xbf16, #tpu.memory_space<vmem>>, vector<1x1x8x32xbf16>
      %10 = vector.shape_cast %9 : vector<1x1x8x32xbf16> to vector<8x32xbf16>
      %c0_6 = arith.constant 0 : index
      %c0_7 = arith.constant 0 : index
      %c0_8 = arith.constant 0 : index
      %c0_9 = arith.constant 0 : index
      %11 = vector.load %arg5[%c0_6, %c0_7, %c0_8, %c0_9] : memref<1x1x8x32xbf16, #tpu.memory_space<vmem>>, vector<1x1x8x32xbf16>
      %12 = vector.shape_cast %11 : vector<1x1x8x32xbf16> to vector<8x32xbf16>
      %c0_10 = arith.constant 0 : index
      %c0_11 = arith.constant 0 : index
      %c0_12 = arith.constant 0 : index
      %c0_13 = arith.constant 0 : index
      %13 = vector.load %arg6[%c0_10, %c0_11, %c0_12, %c0_13] : memref<1x1x8x32xbf16, #tpu.memory_space<vmem>>, vector<1x1x8x32xbf16>
      %14 = vector.shape_cast %13 : vector<1x1x8x32xbf16> to vector<8x32xbf16>
      %15 = tpu.transpose %12, [1, 0] : vector<8x32xbf16> -> vector<32x8xbf16>
      %cst = arith.constant dense<0.000000e+00> : vector<8x8xf32>
      %16 = tpu.matmul %10, %15, %cst {dimension_numbers = #tpu.dot_dimension_numbers<[1], [0], [0], [1], [0, 0, 1, 1], [], []>} : vector<8x32xbf16>, vector<32x8xbf16>, vector<8x8xf32> -> vector<8x8xf32>
      %17 = tpu.iota {dimensions = array<i32: 0>} : vector<8x8xi32>
      %18 = tpu.iota {dimensions = array<i32: 1>} : vector<8x8xi32>
      %19 = arith.cmpi slt, %arg3, %arg2 : i32
      %20 = arith.cmpi sle, %18, %17 : vector<8x8xi32>
      %21 = vector.broadcast %19 : i1 to vector<8x8xi1>
      %22 = arith.ori %21, %20 : vector<8x8xi1>
      %cst_14 = arith.constant -1.000000e+04 : f32
      %23 = vector.broadcast %cst_14 : f32 to vector<8x8xf32>
      %24 = arith.select %22, %16, %23 : vector<8x8xi1>, vector<8x8xf32>
      %c0_15 = arith.constant 0 : index
      %c0_16 = arith.constant 0 : index
      %25 = vector.load %arg8[%c0_15, %c0_16] : memref<8x1xf32, #tpu.memory_space<vmem>>, vector<8x1xf32>
      %cst_17 = arith.constant dense<0xFF800000> : vector<8xf32>
      %26 = vector.multi_reduction <maximumf>, %24, %cst_17 [1] : vector<8x8xf32> to vector<8xf32>
      %27 = vector.shape_cast %26 : vector<8xf32> to vector<8x1xf32>
      %28 = arith.maximumf %25, %27 : vector<8x1xf32>
      %29 = arith.subf %25, %28 : vector<8x1xf32>
      %30 = math.exp %29 : vector<8x1xf32>
      %31 = vector.broadcast %28 : vector<8x1xf32> to vector<8x8xf32>
      %32 = arith.subf %24, %31 : vector<8x8xf32>
      %33 = math.exp %32 : vector<8x8xf32>
      %c0_18 = arith.constant 0 : index
      %c0_19 = arith.constant 0 : index
      %34 = vector.load %arg9[%c0_18, %c0_19] : memref<8x1xf32, #tpu.memory_space<vmem>>, vector<8x1xf32>
      %35 = arith.mulf %30, %34 : vector<8x1xf32>
      %cst_20 = arith.constant dense<0.000000e+00> : vector<8xf32>
      %36 = vector.multi_reduction <add>, %33, %cst_20 [1] : vector<8x8xf32> to vector<8xf32>
      %37 = vector.shape_cast %36 : vector<8xf32> to vector<8x1xf32>
      %38 = arith.addf %35, %37 : vector<8x1xf32>
      %c0_21 = arith.constant 0 : index
      %c0_22 = arith.constant 0 : index
      %39 = vector.load %arg9[%c0_21, %c0_22] : memref<8x1xf32, #tpu.memory_space<vmem>>, vector<8x1xf32>
      tpu.vector_store %arg9[%c0_21, %c0_22], %38 {strides = array<i32>} : memref<8x1xf32, #tpu.memory_space<vmem>>, vector<8x1xf32>,
      %c0_23 = arith.constant 0 : index
      %c0_24 = arith.constant 0 : index
      %40 = vector.load %arg10[%c0_23, %c0_24] : memref<8x32xf32, #tpu.memory_space<vmem>>, vector<8x32xf32>
      %41 = vector.broadcast %30 : vector<8x1xf32> to vector<8x32xf32>
      %42 = arith.mulf %41, %40 : vector<8x32xf32>
      %43 = arith.truncf %33 : vector<8x8xf32> to vector<8x8xbf16>
      %cst_25 = arith.constant dense<0.000000e+00> : vector<8x32xf32>
      %44 = tpu.matmul %43, %14, %cst_25 {dimension_numbers = #tpu.dot_dimension_numbers<[1], [0], [0], [1], [0, 0, 1, 1], [], []>} : vector<8x8xbf16>, vector<8x32xbf16>, vector<8x32xf32> -> vector<8x32xf32>
      %45 = arith.addf %42, %44 : vector<8x32xf32>
      %c0_26 = arith.constant 0 : index
      %c0_27 = arith.constant 0 : index
      %46 = vector.load %arg10[%c0_26, %c0_27] : memref<8x32xf32, #tpu.memory_space<vmem>>, vector<8x32xf32>
      tpu.vector_store %arg10[%c0_26, %c0_27], %45 {strides = array<i32>} : memref<8x32xf32, #tpu.memory_space<vmem>>, vector<8x32xf32>,
      %c0_28 = arith.constant 0 : index
      %c0_29 = arith.constant 0 : index
      %47 = vector.load %arg8[%c0_28, %c0_29] : memref<8x1xf32, #tpu.memory_space<vmem>>, vector<8x1xf32>
      tpu.vector_store %arg8[%c0_28, %c0_29], %28 {strides = array<i32>} : memref<8x1xf32, #tpu.memory_space<vmem>>, vector<8x1xf32>,
    } else {
    }
    %c1_i32 = arith.constant 1 : i32
    %6 = arith.cmpi eq, %arg3, %c1_i32 : i32
    %7 = arith.extui %6 : i1 to i32
    %c0_i32_2 = arith.constant 0 : i32
    %8 = arith.cmpi ne, %7, %c0_i32_2 : i32
    scf.if %8 {
      %c0 = arith.constant 0 : index
      %c0_3 = arith.constant 0 : index
      %9 = vector.load %arg10[%c0, %c0_3] : memref<8x32xf32, #tpu.memory_space<vmem>>, vector<8x32xf32>
      %c0_4 = arith.constant 0 : index
      %c0_5 = arith.constant 0 : index
      %10 = vector.load %arg9[%c0_4, %c0_5] : memref<8x1xf32, #tpu.memory_space<vmem>>, vector<8x1xf32>
      %11 = tpu.reciprocal %10 {approx = true} : vector<8x1xf32> -> vector<8x1xf32>
      %12 = vector.broadcast %11 : vector<8x1xf32> to vector<8x32xf32>
      %13 = arith.mulf %9, %12 : vector<8x32xf32>
      %14 = arith.truncf %13 : vector<8x32xf32> to vector<8x32xbf16>
      %c0_6 = arith.constant 0 : index
      %c0_7 = arith.constant 0 : index
      %c0_8 = arith.constant 0 : index
      %c0_9 = arith.constant 0 : index
      %15 = vector.load %arg7[%c0_6, %c0_7, %c0_8, %c0_9] : memref<1x1x8x32xbf16, #tpu.memory_space<vmem>>, vector<1x1x8x32xbf16>
      %16 = vector.shape_cast %15 : vector<1x1x8x32xbf16> to vector<8x32xbf16>
      %17 = vector.shape_cast %14 : vector<8x32xbf16> to vector<1x1x8x32xbf16>
      tpu.vector_store %arg7[%c0_6, %c0_7, %c0_8, %c0_9], %17 {strides = array<i32>} : memref<1x1x8x32xbf16, #tpu.memory_space<vmem>>, vector<1x1x8x32xbf16>,
    } else {
    }
    return
  }
  func.func @transform_0(%arg0: i32, %arg1: i32, %arg2: i32, %arg3: i32) -> (i32, i32, i32, i32) {
    %c0_i32 = arith.constant 0 : i32
    %c0_i32_0 = arith.constant 0 : i32
    return %arg0, %arg1, %arg2, %c0_i32 : i32, i32, i32, i32
  }
  func.func @transform_1(%arg0: i32, %arg1: i32, %arg2: i32, %arg3: i32) -> (i32, i32, i32, i32) {
    %0 = arith.minsi %arg3, %arg2 : i32
    %c0_i32 = arith.constant 0 : i32
    %c0_i32_0 = arith.constant 0 : i32
    return %arg0, %arg1, %0, %c0_i32 : i32, i32, i32, i32
  }
  func.func @transform_2(%arg0: i32, %arg1: i32, %arg2: i32, %arg3: i32) -> (i32, i32, i32, i32) {
    %0 = arith.minsi %arg3, %arg2 : i32
    %c0_i32 = arith.constant 0 : i32
    %c0_i32_0 = arith.constant 0 : i32
    return %arg0, %arg1, %0, %c0_i32 : i32, i32, i32, i32
  }
  func.func @transform_3(%arg0: i32, %arg1: i32, %arg2: i32, %arg3: i32) -> (i32, i32, i32, i32) {
    %c0_i32 = arith.constant 0 : i32
    %c0_i32_0 = arith.constant 0 : i32
    return %arg0, %arg1, %arg2, %c0_i32 : i32, i32, i32, i32
  }
}

module attributes {stable_mosaic.version = 11 : i64} {
  func.func @proj_mlp_kernel(%arg0: i32, %arg1: i32, %arg2: i32, %arg3: memref<1x8x128xbf16, #tpu.memory_space<vmem>>, %arg4: memref<1x4x8x32xbf16, #tpu.memory_space<vmem>>, %arg5: memref<128x128xbf16, #tpu.memory_space<vmem>>, %arg6: memref<1x128xf32, #tpu.memory_space<vmem>>, %arg7: memref<1x128xf32, #tpu.memory_space<vmem>>, %arg8: memref<1x128xf32, #tpu.memory_space<vmem>>, %arg9: memref<128x256xbf16, #tpu.memory_space<vmem>>, %arg10: memref<1x256xf32, #tpu.memory_space<vmem>>, %arg11: memref<256x128xbf16, #tpu.memory_space<vmem>>, %arg12: memref<1x128xf32, #tpu.memory_space<vmem>>, %arg13: memref<1x128xf32, #tpu.memory_space<vmem>>, %arg14: memref<1x128xf32, #tpu.memory_space<vmem>>, %arg15: memref<1x8x128xbf16, #tpu.memory_space<vmem>>, %arg16: memref<8x128xbf16, #tpu.memory_space<vmem>>, %arg17: memref<8x128xf32, #tpu.memory_space<vmem>>) attributes {dimension_semantics = [#tpu.dimension_semantics<parallel>, #tpu.dimension_semantics<parallel>, #tpu.dimension_semantics<arbitrary>], iteration_bounds = array<i64: 2, 2, 2>, scalar_prefetch = 0 : i64, scratch_operands = 2 : i64, tpu.core_type = #tpu.core_type<tc>, window_params = [{transform_indices = @transform_0, window_bounds = array<i64: 1, 8, 128>}, {transform_indices = @transform_1, window_bounds = array<i64: 1, 4, 8, 32>}, {pipeline_mode = #tpu.pipeline_mode<synchronous>, transform_indices = @transform_2, window_bounds = array<i64: 128, 128>}, {pipeline_mode = #tpu.pipeline_mode<synchronous>, transform_indices = @transform_3, window_bounds = array<i64: 1, 128>}, {pipeline_mode = #tpu.pipeline_mode<synchronous>, transform_indices = @transform_4, window_bounds = array<i64: 1, 128>}, {pipeline_mode = #tpu.pipeline_mode<synchronous>, transform_indices = @transform_5, window_bounds = array<i64: 1, 128>}, {transform_indices = @transform_6, window_bounds = array<i64: 128, 256>}, {transform_indices = @transform_7, window_bounds = array<i64: 1, 256>}, {transform_indices = @transform_8, window_bounds = array<i64: 256, 128>}, {pipeline_mode = #tpu.pipeline_mode<synchronous>, transform_indices = @transform_9, window_bounds = array<i64: 1, 128>}, {pipeline_mode = #tpu.pipeline_mode<synchronous>, transform_indices = @transform_10, window_bounds = array<i64: 1, 128>}, {pipeline_mode = #tpu.pipeline_mode<synchronous>, transform_indices = @transform_11, window_bounds = array<i64: 1, 128>}, {transform_indices = @transform_12, window_bounds = array<i64: 1, 8, 128>}]} {
    %c0_i32 = arith.constant 0 : i32
    %0 = arith.cmpi eq, %arg2, %c0_i32 : i32
    %1 = arith.extui %0 : i1 to i32
    %c0_i32_0 = arith.constant 0 : i32
    %2 = arith.cmpi ne, %1, %c0_i32_0 : i32
    scf.if %2 {
      %c0_18 = arith.constant 0 : index
      %c0_19 = arith.constant 0 : index
      %c0_20 = arith.constant 0 : index
      %31 = vector.load %arg3[%c0_18, %c0_19, %c0_20] : memref<1x8x128xbf16, #tpu.memory_space<vmem>>, vector<1x8x128xbf16>
      %32 = vector.shape_cast %31 : vector<1x8x128xbf16> to vector<8x128xbf16>
      %33 = arith.extf %32 : vector<8x128xbf16> to vector<8x128xf32>
      %cst_21 = arith.constant 0.000000e+00 : f32
      %34 = vector.broadcast %cst_21 : f32 to vector<8x128xf32>
      %c0_22 = arith.constant 0 : index
      %c0_23 = arith.constant 0 : index
      %c0_24 = arith.constant 0 : index
      %c0_25 = arith.constant 0 : index
      %35 = vector.load %arg4[%c0_22, %c0_23, %c0_24, %c0_25] : memref<1x4x8x32xbf16, #tpu.memory_space<vmem>>, vector<1x1x8x32xbf16>
      %36 = vector.shape_cast %35 : vector<1x1x8x32xbf16> to vector<8x32xbf16>
      %c0_26 = arith.constant 0 : index
      %c0_27 = arith.constant 0 : index
      %37 = vector.load %arg5[%c0_26, %c0_27] : memref<128x128xbf16, #tpu.memory_space<vmem>>, vector<32x128xbf16>
      %cst_28 = arith.constant dense<0.000000e+00> : vector<8x128xf32>
      %38 = tpu.matmul %36, %37, %cst_28 {dimension_numbers = #tpu.dot_dimension_numbers<[1], [0], [0], [1], [0, 0, 1, 1], [], []>} : vector<8x32xbf16>, vector<32x128xbf16>, vector<8x128xf32> -> vector<8x128xf32>
      %39 = arith.addf %34, %38 : vector<8x128xf32>
      %c0_29 = arith.constant 0 : index
      %c1 = arith.constant 1 : index
      %c0_30 = arith.constant 0 : index
      %c0_31 = arith.constant 0 : index
      %40 = vector.load %arg4[%c0_29, %c1, %c0_30, %c0_31] : memref<1x4x8x32xbf16, #tpu.memory_space<vmem>>, vector<1x1x8x32xbf16>
      %41 = vector.shape_cast %40 : vector<1x1x8x32xbf16> to vector<8x32xbf16>
      %c32 = arith.constant 32 : index
      %c0_32 = arith.constant 0 : index
      %42 = vector.load %arg5[%c32, %c0_32] : memref<128x128xbf16, #tpu.memory_space<vmem>>, vector<32x128xbf16>
      %cst_33 = arith.constant dense<0.000000e+00> : vector<8x128xf32>
      %43 = tpu.matmul %41, %42, %cst_33 {dimension_numbers = #tpu.dot_dimension_numbers<[1], [0], [0], [1], [0, 0, 1, 1], [], []>} : vector<8x32xbf16>, vector<32x128xbf16>, vector<8x128xf32> -> vector<8x128xf32>
      %44 = arith.addf %39, %43 : vector<8x128xf32>
      %c0_34 = arith.constant 0 : index
      %c2 = arith.constant 2 : index
      %c0_35 = arith.constant 0 : index
      %c0_36 = arith.constant 0 : index
      %45 = vector.load %arg4[%c0_34, %c2, %c0_35, %c0_36] : memref<1x4x8x32xbf16, #tpu.memory_space<vmem>>, vector<1x1x8x32xbf16>
      %46 = vector.shape_cast %45 : vector<1x1x8x32xbf16> to vector<8x32xbf16>
      %c64 = arith.constant 64 : index
      %c0_37 = arith.constant 0 : index
      %47 = vector.load %arg5[%c64, %c0_37] : memref<128x128xbf16, #tpu.memory_space<vmem>>, vector<32x128xbf16>
      %cst_38 = arith.constant dense<0.000000e+00> : vector<8x128xf32>
      %48 = tpu.matmul %46, %47, %cst_38 {dimension_numbers = #tpu.dot_dimension_numbers<[1], [0], [0], [1], [0, 0, 1, 1], [], []>} : vector<8x32xbf16>, vector<32x128xbf16>, vector<8x128xf32> -> vector<8x128xf32>
      %49 = arith.addf %44, %48 : vector<8x128xf32>
      %c0_39 = arith.constant 0 : index
      %c3 = arith.constant 3 : index
      %c0_40 = arith.constant 0 : index
      %c0_41 = arith.constant 0 : index
      %50 = vector.load %arg4[%c0_39, %c3, %c0_40, %c0_41] : memref<1x4x8x32xbf16, #tpu.memory_space<vmem>>, vector<1x1x8x32xbf16>
      %51 = vector.shape_cast %50 : vector<1x1x8x32xbf16> to vector<8x32xbf16>
      %c96 = arith.constant 96 : index
      %c0_42 = arith.constant 0 : index
      %52 = vector.load %arg5[%c96, %c0_42] : memref<128x128xbf16, #tpu.memory_space<vmem>>, vector<32x128xbf16>
      %cst_43 = arith.constant dense<0.000000e+00> : vector<8x128xf32>
      %53 = tpu.matmul %51, %52, %cst_43 {dimension_numbers = #tpu.dot_dimension_numbers<[1], [0], [0], [1], [0, 0, 1, 1], [], []>} : vector<8x32xbf16>, vector<32x128xbf16>, vector<8x128xf32> -> vector<8x128xf32>
      %54 = arith.addf %49, %53 : vector<8x128xf32>
      %c0_44 = arith.constant 0 : index
      %c0_45 = arith.constant 0 : index
      %55 = vector.load %arg6[%c0_44, %c0_45] : memref<1x128xf32, #tpu.memory_space<vmem>>, vector<1x128xf32>
      %56 = vector.broadcast %55 : vector<1x128xf32> to vector<8x128xf32>
      %57 = arith.addf %54, %56 : vector<8x128xf32>
      %58 = arith.addf %33, %57 : vector<8x128xf32>
      %c0_46 = arith.constant 0 : index
      %c0_47 = arith.constant 0 : index
      %59 = vector.load %arg7[%c0_46, %c0_47] : memref<1x128xf32, #tpu.memory_space<vmem>>, vector<1x128xf32>
      %c0_48 = arith.constant 0 : index
      %c0_49 = arith.constant 0 : index
      %60 = vector.load %arg8[%c0_48, %c0_49] : memref<1x128xf32, #tpu.memory_space<vmem>>, vector<1x128xf32>
      %cst_50 = arith.constant dense<0.000000e+00> : vector<8xf32>
      %61 = vector.multi_reduction <add>, %58, %cst_50 [1] : vector<8x128xf32> to vector<8xf32>
      %62 = vector.shape_cast %61 : vector<8xf32> to vector<8x1xf32>
      %cst_51 = arith.constant 1.280000e+02 : f32
      %63 = vector.broadcast %cst_51 : f32 to vector<8x1xf32>
      %64 = arith.divf %62, %63 : vector<8x1xf32>
      %65 = vector.broadcast %64 : vector<8x1xf32> to vector<8x128xf32>
      %66 = arith.subf %58, %65 : vector<8x128xf32>
      %67 = arith.mulf %66, %66 : vector<8x128xf32>
      %cst_52 = arith.constant dense<0.000000e+00> : vector<8xf32>
      %68 = vector.multi_reduction <add>, %67, %cst_52 [1] : vector<8x128xf32> to vector<8xf32>
      %69 = vector.shape_cast %68 : vector<8xf32> to vector<8x1xf32>
      %cst_53 = arith.constant 1.280000e+02 : f32
      %70 = vector.broadcast %cst_53 : f32 to vector<8x1xf32>
      %71 = arith.divf %69, %70 : vector<8x1xf32>
      %72 = vector.broadcast %64 : vector<8x1xf32> to vector<8x128xf32>
      %73 = arith.subf %58, %72 : vector<8x128xf32>
      %cst_54 = arith.constant 9.99999974E-6 : f32
      %74 = vector.broadcast %cst_54 : f32 to vector<8x1xf32>
      %75 = arith.addf %71, %74 : vector<8x1xf32>
      %76 = math.rsqrt %75 : vector<8x1xf32>
      %77 = vector.broadcast %76 : vector<8x1xf32> to vector<8x128xf32>
      %78 = arith.mulf %73, %77 : vector<8x128xf32>
      %79 = vector.broadcast %59 : vector<1x128xf32> to vector<8x128xf32>
      %80 = arith.mulf %78, %79 : vector<8x128xf32>
      %81 = vector.broadcast %60 : vector<1x128xf32> to vector<8x128xf32>
      %82 = arith.addf %80, %81 : vector<8x128xf32>
      %83 = arith.truncf %82 : vector<8x128xf32> to vector<8x128xbf16>
      %c0_55 = arith.constant 0 : index
      %c0_56 = arith.constant 0 : index
      %84 = vector.load %arg16[%c0_55, %c0_56] : memref<8x128xbf16, #tpu.memory_space<vmem>>, vector<8x128xbf16>
      tpu.vector_store %arg16[%c0_55, %c0_56], %83 {strides = array<i32>} : memref<8x128xbf16, #tpu.memory_space<vmem>>, vector<8x128xbf16>,
      %c0_57 = arith.constant 0 : index
      %c0_58 = arith.constant 0 : index
      %85 = vector.load %arg12[%c0_57, %c0_58] : memref<1x128xf32, #tpu.memory_space<vmem>>, vector<1x128xf32>
      %86 = vector.broadcast %85 : vector<1x128xf32> to vector<8x128xf32>
      %87 = arith.addf %58, %86 : vector<8x128xf32>
      %c0_59 = arith.constant 0 : index
      %c0_60 = arith.constant 0 : index
      %88 = vector.load %arg17[%c0_59, %c0_60] : memref<8x128xf32, #tpu.memory_space<vmem>>, vector<8x128xf32>
      tpu.vector_store %arg17[%c0_59, %c0_60], %87 {strides = array<i32>} : memref<8x128xf32, #tpu.memory_space<vmem>>, vector<8x128xf32>,
    } else {
    }
    %c0 = arith.constant 0 : index
    %c0_1 = arith.constant 0 : index
    %3 = vector.load %arg16[%c0, %c0_1] : memref<8x128xbf16, #tpu.memory_space<vmem>>, vector<8x128xbf16>
    %c0_2 = arith.constant 0 : index
    %c0_3 = arith.constant 0 : index
    %4 = vector.load %arg9[%c0_2, %c0_3] : memref<128x256xbf16, #tpu.memory_space<vmem>>, vector<128x256xbf16>
    %cst = arith.constant dense<0.000000e+00> : vector<8x256xf32>
    %5 = tpu.matmul %3, %4, %cst {dimension_numbers = #tpu.dot_dimension_numbers<[1], [0], [0], [1], [0, 0, 1, 1], [], []>} : vector<8x128xbf16>, vector<128x256xbf16>, vector<8x256xf32> -> vector<8x256xf32>
    %c0_4 = arith.constant 0 : index
    %c0_5 = arith.constant 0 : index
    %6 = vector.load %arg10[%c0_4, %c0_5] : memref<1x256xf32, #tpu.memory_space<vmem>>, vector<1x256xf32>
    %7 = vector.broadcast %6 : vector<1x256xf32> to vector<8x256xf32>
    %8 = arith.addf %5, %7 : vector<8x256xf32>
    %cst_6 = arith.constant 5.000000e-01 : f32
    %9 = vector.broadcast %cst_6 : f32 to vector<8x256xf32>
    %10 = arith.mulf %9, %8 : vector<8x256xf32>
    %11 = arith.mulf %8, %8 : vector<8x256xf32>
    %12 = arith.mulf %8, %11 : vector<8x256xf32>
    %cst_7 = arith.constant 4.471500e-02 : f32
    %13 = vector.broadcast %cst_7 : f32 to vector<8x256xf32>
    %14 = arith.mulf %13, %12 : vector<8x256xf32>
    %15 = arith.addf %8, %14 : vector<8x256xf32>
    %cst_8 = arith.constant 0.797884583 : f32
    %16 = vector.broadcast %cst_8 : f32 to vector<8x256xf32>
    %17 = arith.mulf %16, %15 : vector<8x256xf32>
    %18 = math.tanh %17 : vector<8x256xf32>
    %cst_9 = arith.constant 1.000000e+00 : f32
    %19 = vector.broadcast %cst_9 : f32 to vector<8x256xf32>
    %20 = arith.addf %19, %18 : vector<8x256xf32>
    %21 = arith.mulf %10, %20 : vector<8x256xf32>
    %c0_10 = arith.constant 0 : index
    %c0_11 = arith.constant 0 : index
    %22 = vector.load %arg17[%c0_10, %c0_11] : memref<8x128xf32, #tpu.memory_space<vmem>>, vector<8x128xf32>
    %23 = arith.truncf %21 : vector<8x256xf32> to vector<8x256xbf16>
    %c0_12 = arith.constant 0 : index
    %c0_13 = arith.constant 0 : index
    %24 = vector.load %arg11[%c0_12, %c0_13] : memref<256x128xbf16, #tpu.memory_space<vmem>>, vector<256x128xbf16>
    %cst_14 = arith.constant dense<0.000000e+00> : vector<8x128xf32>
    %25 = tpu.matmul %23, %24, %cst_14 {dimension_numbers = #tpu.dot_dimension_numbers<[1], [0], [0], [1], [0, 0, 1, 1], [], []>} : vector<8x256xbf16>, vector<256x128xbf16>, vector<8x128xf32> -> vector<8x128xf32>
    %26 = arith.addf %22, %25 : vector<8x128xf32>
    %c0_15 = arith.constant 0 : index
    %c0_16 = arith.constant 0 : index
    %27 = vector.load %arg17[%c0_15, %c0_16] : memref<8x128xf32, #tpu.memory_space<vmem>>, vector<8x128xf32>
    tpu.vector_store %arg17[%c0_15, %c0_16], %26 {strides = array<i32>} : memref<8x128xf32, #tpu.memory_space<vmem>>, vector<8x128xf32>,
    %c1_i32 = arith.constant 1 : i32
    %28 = arith.cmpi eq, %arg2, %c1_i32 : i32
    %29 = arith.extui %28 : i1 to i32
    %c0_i32_17 = arith.constant 0 : i32
    %30 = arith.cmpi ne, %29, %c0_i32_17 : i32
    scf.if %30 {
      %c0_18 = arith.constant 0 : index
      %c0_19 = arith.constant 0 : index
      %31 = vector.load %arg17[%c0_18, %c0_19] : memref<8x128xf32, #tpu.memory_space<vmem>>, vector<8x128xf32>
      %32 = arith.truncf %31 : vector<8x128xf32> to vector<8x128xbf16>
      %c0_20 = arith.constant 0 : index
      %c0_21 = arith.constant 0 : index
      %c0_22 = arith.constant 0 : index
      %33 = vector.load %arg15[%c0_20, %c0_21, %c0_22] : memref<1x8x128xbf16, #tpu.memory_space<vmem>>, vector<1x8x128xbf16>
      %34 = vector.shape_cast %33 : vector<1x8x128xbf16> to vector<8x128xbf16>
      %35 = vector.shape_cast %32 : vector<8x128xbf16> to vector<1x8x128xbf16>
      tpu.vector_store %arg15[%c0_20, %c0_21, %c0_22], %35 {strides = array<i32>} : memref<1x8x128xbf16, #tpu.memory_space<vmem>>, vector<1x8x128xbf16>,
    } else {
    }
    return
  }
  func.func @transform_0(%arg0: i32, %arg1: i32, %arg2: i32) -> (i32, i32, i32) {
    %c0_i32 = arith.constant 0 : i32
    %c0_i32_0 = arith.constant 0 : i32
    return %arg0, %arg1, %c0_i32 : i32, i32, i32
  }
  func.func @transform_1(%arg0: i32, %arg1: i32, %arg2: i32) -> (i32, i32, i32, i32) {
    %c0_i32 = arith.constant 0 : i32
    %c0_i32_0 = arith.constant 0 : i32
    %c0_i32_1 = arith.constant 0 : i32
    return %arg0, %c0_i32, %arg1, %c0_i32_0 : i32, i32, i32, i32
  }
  func.func @transform_2(%arg0: i32, %arg1: i32, %arg2: i32) -> (i32, i32) {
    %c0_i32 = arith.constant 0 : i32
    %c0_i32_0 = arith.constant 0 : i32
    %c0_i32_1 = arith.constant 0 : i32
    return %c0_i32, %c0_i32_0 : i32, i32
  }
  func.func @transform_3(%arg0: i32, %arg1: i32, %arg2: i32) -> (i32, i32) {
    %c0_i32 = arith.constant 0 : i32
    %c0_i32_0 = arith.constant 0 : i32
    %c0_i32_1 = arith.constant 0 : i32
    return %c0_i32, %c0_i32_0 : i32, i32
  }
  func.func @transform_4(%arg0: i32, %arg1: i32, %arg2: i32) -> (i32, i32) {
    %c0_i32 = arith.constant 0 : i32
    %c0_i32_0 = arith.constant 0 : i32
    %c0_i32_1 = arith.constant 0 : i32
    return %c0_i32, %c0_i32_0 : i32, i32
  }
  func.func @transform_5(%arg0: i32, %arg1: i32, %arg2: i32) -> (i32, i32) {
    %c0_i32 = arith.constant 0 : i32
    %c0_i32_0 = arith.constant 0 : i32
    %c0_i32_1 = arith.constant 0 : i32
    return %c0_i32, %c0_i32_0 : i32, i32
  }
  func.func @transform_6(%arg0: i32, %arg1: i32, %arg2: i32) -> (i32, i32) {
    %c0_i32 = arith.constant 0 : i32
    %c0_i32_0 = arith.constant 0 : i32
    return %c0_i32, %arg2 : i32, i32
  }
  func.func @transform_7(%arg0: i32, %arg1: i32, %arg2: i32) -> (i32, i32) {
    %c0_i32 = arith.constant 0 : i32
    %c0_i32_0 = arith.constant 0 : i32
    return %c0_i32, %arg2 : i32, i32
  }
  func.func @transform_8(%arg0: i32, %arg1: i32, %arg2: i32) -> (i32, i32) {
    %c0_i32 = arith.constant 0 : i32
    %c0_i32_0 = arith.constant 0 : i32
    return %arg2, %c0_i32 : i32, i32
  }
  func.func @transform_9(%arg0: i32, %arg1: i32, %arg2: i32) -> (i32, i32) {
    %c0_i32 = arith.constant 0 : i32
    %c0_i32_0 = arith.constant 0 : i32
    %c0_i32_1 = arith.constant 0 : i32
    return %c0_i32, %c0_i32_0 : i32, i32
  }
  func.func @transform_10(%arg0: i32, %arg1: i32, %arg2: i32) -> (i32, i32) {
    %c0_i32 = arith.constant 0 : i32
    %c0_i32_0 = arith.constant 0 : i32
    %c0_i32_1 = arith.constant 0 : i32
    return %c0_i32, %c0_i32_0 : i32, i32
  }
  func.func @transform_11(%arg0: i32, %arg1: i32, %arg2: i32) -> (i32, i32) {
    %c0_i32 = arith.constant 0 : i32
    %c0_i32_0 = arith.constant 0 : i32
    %c0_i32_1 = arith.constant 0 : i32
    return %c0_i32, %c0_i32_0 : i32, i32
  }
  func.func @transform_12(%arg0: i32, %arg1: i32, %arg2: i32) -> (i32, i32, i32) {
    %c0_i32 = arith.constant 0 : i32
    %c0_i32_0 = arith.constant 0 : i32
    return %arg0, %arg1, %c0_i32 : i32, i32, i32
  }
}

</mosaic_0001>

<bundles_post_ra>
// kernel: tpu_custom_call.1
= control target key start
LH: loop header
LB: loop body
LE: loop exit
PB: predicated region body
PF: predicated region fallthrough
CT: control target
= control target key end

     0   :  { %6 = vsyncpa [#allocation3], 0  ;;  %s124_s0 = inlined_call_operand.hbm [shape: f32[8,128], index: 0, kind: input, shape index: {}]   ;;  %s125_s1 = inlined_call_operand.hbm [shape: f32[8,128], index: 1, kind: output, shape index: {}]  }
   0x1   :  { %7 = vsyncpa [#allocation4], 0  ;;  %s88_s6 = smov [#allocation2]   ;;  %s40_s10 = scalar_lea.hbm %s124_s0, 128 }
   0x2   :  { %s14_s7 = sshll.u32 %s88_s6, 4  ;;  %p41_p0 = scmp.ne.s32.totalorder %s124_s0, %s40_s10  ;;  %s15_s7 = int_to_ptr.vmem [resolvable:$true] %s14_s7 }
   0x3   :  { %p44_p1 = scmp.lt.u32.totalorder %s40_s10, %s124_s0 }
   0x5   :  { %p46_p2 = pnand %p44_p1, %p41_p0 }
   0x7   :  { %49 = shalt.err (!%p46_p2)
}
   0x8   :  { %s50_s15 = scalar_lea.vmem %s15_s7, 128  ;;  %p55_p4 = scmp.lt.s32.totalorder %s15_s7, %s15_s7 }
   0x9   :  { %p51_p3 = scmp.ne.s32.totalorder %s15_s7, %s50_s15  ;;  %p56_p5 = scmp.lt.s32.totalorder %s50_s15, %s50_s15 }
   0xb   :  { %p57_p6 = por %p56_p5, %p55_p4 }
   0xd   :  { %p58_p7 = pnand %p57_p6, %p51_p3 }
   0xf   :  { %61 = shalt.err (!%p58_p7)
}
  0x10   :  { %17 = dma.hbm_to_vmem [thread:$0]  %s124_s0, 128, %s15_s7, [#allocation3]  }
  0x11   :  { %84 = dma.done.wait [#allocation3], 128  }
  0x12   :  { %85 = vsyncadd [#allocation3], 4294967168  ;;  %s89_s18 = smov [#allocation5]   ;;  %v21_v0 = vld [vmem:[#allocation2] sm:$0xff] }
  0x13   :  { %s29_s19 = sshll.u32 %s89_s18, 4  ;;  %22 = vst [vmem:[#allocation5] sm:$0xff] %v21_v0  ;;  %s30_s19 = int_to_ptr.vmem [resolvable:$true] %s29_s19 }
  0x14   :  { %s62_s20 = scalar_lea.vmem %s30_s19, 128  ;;  %p67_p9 = scmp.lt.s32.totalorder %s30_s19, %s30_s19 }
  0x15   :  { %p63_p8 = scmp.ne.s32.totalorder %s30_s19, %s62_s20  ;;  %p68_p10 = scmp.lt.s32.totalorder %s62_s20, %s62_s20 }
  0x17   :  { %p69_p11 = por %p68_p10, %p67_p9 }
  0x19   :  { %p70_p12 = pnand %p69_p11, %p63_p8 }
  0x1b   :  { %73 = shalt.err (!%p70_p12)
}
  0x1c   :  { %s74_s23 = scalar_lea.hbm %s125_s1, 128 }
  0x1d   :  { %p75_p13 = scmp.ne.s32.totalorder %s125_s1, %s74_s23  ;;  %p78_p0 = scmp.lt.u32.totalorder %s74_s23, %s125_s1 }
  0x1f   :  { %p80_p1 = pnand %p78_p0, %p75_p13 }
  0x21   :  { %83 = shalt.err (!%p80_p1)
}
  0x22   :  { %32 = dma.vmem_to_hbm [thread:$0]  %s30_s19, 128, %s125_s1, [#allocation4]  }
  0x23   :  { %86 = dma.done.wait [#allocation4], 128  }
  0x24   :  { %87 = vsyncadd [#allocation4], 4294967168 }
  0x25   :  { %36 = vsyncpa [#allocation3], 1 }
  0x26   :  { %37 = vsyncpa [#allocation4], 1 }

// kernel: gpt2_forward.7
= control target key start
LH: loop header
LB: loop body
LE: loop exit
PB: predicated region body
PF: predicated region fallthrough
CT: control target
= control target key end

     0   :  { %s925_s12 = smov 0   ;;  %s927_s13 = smov 0   ;;  %s1059_s0 = inlined_call_operand.vmem [shape: bf16[2,4,16,32], index: 0, kind: input, shape index: {}]   ;;  %s1060_s1 = inlined_call_operand.vmem [shape: bf16[2,4,16,32], index: 1, kind: input, shape index: {}]   ;;  %s1061_s2 = inlined_call_operand.vmem [shape: bf16[2,4,16,32], index: 2, kind: input, shape index: {}]   ;;  %s1062_s3 = inlined_call_operand.vmem [shape: bf16[2,4,16,32], index: 3, kind: output, shape index: {}]  }
   0x1   :  { %s929_s14 = smov 0   ;;  %s931_s15 = smov 0  }
   0x2   :  { %s933_s16 = smov 0   ;;  %s935_s17 = smov 0  }
   0x3   :  { %s937_s18 = smov 0   ;;  %s939_s19 = smov 0  }
   0x4   :  { %s941_s20 = smov 0  }
   0x5 LB: > { %s28_s21 = sadd.s32 1, %s881_s16  ;;  %s31_s22 = sadd.s32 1, %s885_s17  ;;  %s897_s20 = sphi %s941_s20, %s13_s20   ;;  %s893_s19 = sphi %s939_s19, %s1072_s19   ;;  %s889_s18 = sphi %s937_s18, %s1071_s18   ;;  %s885_s17 = sphi %s935_s17, %s1070_s17   ;;  %s881_s16 = sphi %s933_s16, %s1069_s16   ;;  %s877_s15 = sphi %s931_s15, %s1068_s15   ;;  %s873_s14 = sphi %s929_s14, %s1067_s14   ;;  %s869_s13 = sphi %s927_s13, %s1066_s13   ;;  %s865_s12 = sphi %s925_s12, %s1065_s12  }
   0x6   : > { %p29_p0 = scmp.ge.s32.totalorder %s28_s21, 2  ;;  %p704_p1 = scmp.ge.s32.totalorder %s897_s20, 1 }
   0x7   : > { %p236_p2 = scmp.lt.s32.totalorder %s897_s20, 33  ;;  %s35_s23 = sadd.s32 1, %s889_s18 }
   0x8   : > { %s1074_s21 = smov (%p29_p0, %s28_s21), 0  ;;  %s1076_s22 = smov (!%p29_p0, %s31_s22), %s885_s17 }
   0x9   : > { %p33_p3 = scmp.ge.s32.totalorder %s1076_s22, 2  ;;  %p237_p4 = pnand %p704_p1, %p236_p2 }
   0xa   : > { %s39_s24 = sadd.s32 1, %s893_s19  ;;  %p302_p7 = scmp.lt.s32.totalorder (!%p237_p4), %s877_s15, 1 }
   0xb   : > { %s1078_s22 = smov (%p33_p3, %s1076_s22), 0  ;;  %s1080_s23 = smov (!%p33_p3, %s35_s23), %s889_s18 }
   0xc   : > { %p37_p5 = scmp.ge.s32.totalorder %s1080_s23, 4  ;;  %240 = sbr.rel (%p237_p4) target bundleno = 909 (0x38d), region = 32 }
   0xd   : > { %p304_p8 = scmp.lt.s32.totalorder (!%p237_p4), %s873_s14, 3  ;;  %p306_p9 = scmp.lt.s32.totalorder (!%p237_p4), %s869_s13, 1 }
   0xe   : > { %s1082_s23 = smov (%p37_p5, %s1080_s23), 0  ;;  %s1084_s24 = smov (!%p37_p5, %s39_s24), %s893_s19 }
   0xf   : > { %p41_p6 = scmp.ge.s32.totalorder %s1084_s24, 2  ;;  %p314_p10 = scmp.lt.s32.totalorder (!%p237_p4), %s865_s12, %s869_s13 }
  0x10   : > { %p717_p12 = scmp.ne.s32.totalorder (!%p237_p4), %s865_s12, 0 }
  0x11   : > { %s1086_s24 = smov (%p41_p6, %s1084_s24), 0 }
  0x12   : > { %1063 = sst [smem:[#allocation5_spill]] %s1086_s24 }
  0x13   : > { %s1088_s15 = smov (!%p302_p7, %s877_s15), 1  ;;  %s1090_s14 = smov (!%p304_p8, %s873_s14), 3 }
  0x14   : > { %s307_s25 = scalar_select %p306_p9, %s869_s13, 1 }
  0x15   : > { %s705_s26 = sshll.u32 %s1090_s14, 1  ;;  %s706_s27 = sshll.u32 %s1088_s15, 3  ;;  %vm363_vm0 = vcmask (!%p717_p12), 7168   ;;  %vm366_vm1 = vcmask (!%p717_p12), 261120   ;;  %v899_v0 = vmov (!%p717_p12), -inf   ;;  %v900_v1 = vmov (!%p717_p12), 0.0  }
  0x16   : > { %s309_s28 = sadd.s32 %s705_s26, %s307_s25  ;;  %364 = vst.msk [vmem:[#allocation2] sm:$0xff] (!%p717_p12), %vm363_vm0, %v899_v0  ;;  %365 = vst.msk [vmem:[#allocation3] sm:$0xff] (!%p717_p12), %vm363_vm0, %v900_v1 }
  0x17   : > { %s311_s29 = sadd.s32 %s706_s27, %s309_s28  ;;  %367 = vst.msk [vmem:[#allocation4] sm:$0xff] (!%p717_p12), %vm366_vm1, %v900_v1 }
  0x18   : > { %s707_s30 = sshll.u32 %s311_s29, 2 }
  0x19   : > { %s994_s6 = scalar_lea.vmem %s1059_s0, %s707_s30  ;;  %s999_s9 = scalar_lea.vmem %s1062_s3, %s707_s30 }
  0x1a   : > { %s315_s10 = scalar_select %p314_p10, %s865_s12, %s869_s13 }
  0x1c   : > { %p320_p11 = scmp.lt.s32.totalorder %s315_s10, 1  ;;  %362 = sbr.rel (%p717_p12) target bundleno = 35 (0x23), region = 36 }
  0x1e   : > { %s1092_s10 = smov (!%p320_p11, %s315_s10), 1 }
  0x1f   : > { %s323_s11 = sadd.s32 %s705_s26, %s1092_s10 }
  0x20   : > { %s325_s14 = sadd.s32 %s706_s27, %s323_s11 }
  0x21   : > { %s710_s15 = sshll.u32 %s325_s14, 2 }
  0x22   : > { %s327_s29 = scalar_lea.vmem %s1060_s1, %s710_s15  ;;  %s1012_s5 = scalar_lea.vmem %s1061_s2, %s710_s15 }
  0x23 PF: > { %p718_p13 = scmp.gt.s32.totalorder %s865_s12, %s869_s13 }
  0x24   : > { %v373_v2 = vld [vmem:[%s327_s29] sm:$0xf] (!%p718_p13)  ;;  %vm375_vm2 = vcmask (!%p718_p13), 261120   ;;  %v901_v3 = vmov (!%p718_p13), 0.0   ;;  %vm902_vm3 = vmmov (!%p718_p13), 0   ;;  %v422_v6 = vlaneseq (!%p718_p13)  ;;  %v450_v31 = vld [vmem:[#allocation3] sm:$0xff] (!%p718_p13) }
  0x25   : > { %371 = sbr.rel (%p718_p13) target bundleno = 763 (0x2fb), region = 40  ;;  %728 = vmatprep.subr.bf16.mxu0 (!%p718_p13), %v901_v3  ;;  %v380_v4 = vsel (!%p718_p13), %vm375_vm2, %v373_v2, 0  ;;  %730 = vmatprep.mubr.msk.bf16.mxu0 (!%p718_p13), %vm902_vm3, %v901_v3  ;;  %v372_v5 = vld [vmem:[%s994_s6] sm:$0xf] (!%p718_p13)  ;;  %vm434_vm7 = vcmask (!%p718_p13), 64512   ;;  %v903_v16 = vmov (!%p718_p13), 0  }
  0x26   : > { %729 = vmatpush3.bf16.xpose.msra.mxu0 (!%p718_p13), %v380_v4  ;;  %734 = vmatprep.subr.bf16.mxu1 (!%p718_p13), %v901_v3  ;;  %v423_v7 = vshrl.u32 (!%p718_p13), %v422_v6, 7  ;;  %v425_v8 = vand.u32 (!%p718_p13), 127, %v422_v6  ;;  %v433_v17 = vld [vmem:[#allocation2] sm:$0xff] (!%p718_p13)  ;;  %vm456_vm8 = vcmask (!%p718_p13), 7168   ;;  %vm469_vm9 = vcmask (!%p718_p13), 1043456   ;;  %v458_v35 = vld [vmem:[#allocation4] sm:$0xff] (!%p718_p13) }
  0x27   : > { %736 = vmatprep.mubr.msk.bf16.mxu1 (!%p718_p13), %vm902_vm3, %v901_v3  ;;  %818 = vset.pattern.permute.xlu0 (!%p718_p13), %v903_v16  ;;  %v374_v21 = vld [vmem:[%s1012_s5] sm:$0xf] (!%p718_p13) }
  0x28   : > { %vm427_vm4 = vcmp.le.s32.totalorder (!%p718_p13), %v425_v8, %v423_v7  ;;  %819 = vset.pattern.permute.xlu1 (!%p718_p13), %v903_v16  ;;  %v471_v22 = vsel (!%p718_p13), %vm469_vm9, %v374_v21, 0 }
  0x29   : > { %735 = vmatpush3.bf16.msra.mxu1 (!%p718_p13), %v471_v22 }
  0x2c   : > { %s428_s24 = scalar_select %p314_p10, 1, 0 }
  0x2d   : > { %731 = vmatmul.mubr.msk.bf16.vlgmr.msra.gmra.mrb[0].mxu0 %vm375_vm2, %v372_v5 }
  0x2e   : > { %v429_v9 = vstv %s428_s24 }
  0x2f   : > { %vm430_vm5 = vcmp.eq.s32.totalorder %v429_v9, 1 }
  0x30   : > { %vm431_vm6 = vmor %vm430_vm5, %vm427_vm4 }
 0x100   : > { %v416_v10 = vpop.f32.mrb[0].mxu0 }
 0x101   : > { %v432_v11 = vsel %vm431_vm6, %v416_v10, -10000.0  ;;  %v732_v12 = vpop.f32.mrb[1].mxu0 }
 0x102   : > { %v419_v13 = vpop.f32.mrb[2].mxu0  ;;  %v435_v14 = vsel %vm434_vm7, %v432_v11, -inf }
 0x103   : > { %436 = vmax.xlane.f32.xlu0 %v435_v14  ;;  %v733_v15 = vpop.f32.mrb[3].mxu0 }
 0x190   : > { %v437_v18 = vpop.xlane.xlu0 %436 }
 0x191   : > { %v438_v19 = vmax.f32 %v433_v17, %v437_v18 }
 0x193   : > { %v439_v20 = vsub.f32 %v433_v17, %v438_v19  ;;  %515 = vst.msk [vmem:[#allocation2] sm:$0xff] %vm456_vm8, %v438_v19  ;;  %444 = vperm.xlu0 %818, %v438_v19  }
 0x195   : > { %v440_v29 = vmul.f32 1.442695, %v439_v20 }
 0x212   : > { %v445_v23 = vpop.permute.xlu0 %444 }
 0x213   : > { %v447_v24 = vsub.f32 %v432_v11, %v445_v23 }
 0x215   : > { %v448_v25 = vmul.f32 1.442695, %v447_v24 }
 0x217   : > { %820 = vpow2.f32 %v448_v25 }
 0x218   : > { %822 = vpow2.f32 %v440_v29 }
 0x221   : > { %v821_v26 = vpop.eup %820 }
 0x222   : > { %v452_v27 = vsel %vm434_vm7, %v821_v26, 0.0  ;;  %v465_v28 = vpack.c.bf16 %v821_v26, %v821_v26  ;;  %v823_v30 = vpop.eup %822 }
 0x223   : > { %453 = vadd.xlane.f32.xlu1 %v452_v27  ;;  %v451_v32 = vmul.f32 %v823_v30, %v450_v31 }
 0x224   : > { %737 = vmatmul.mubr.msk.bf16.vlgmr.msra.gmra.mrb[0].mxu1 %vm434_vm7, %v465_v28 }
 0x234   : > { %461 = vperm.xlu1 %819, %v823_v30  }
 0x2b0   : > { %v454_v33 = vpop.xlane.xlu1 %453 }
 0x2b1   : > { %v455_v34 = vadd.f32 %v454_v33, %v451_v32 }
 0x2b3   : > { %457 = vst.msk [vmem:[#allocation3] sm:$0xff] %vm456_vm8, %v455_v34 }
 0x2b4   : > { %v462_v36 = vpop.permute.xlu1 %461 }
 0x2b5   : > { %v464_v37 = vmul.f32 %v462_v36, %v458_v35 }
 0x2f7   : > { %v507_v38 = vpop.f32.mrb[0].mxu1 }
 0x2f8   : > { %v513_v39 = vadd.f32 %v507_v38, %v464_v37  ;;  %v738_v40 = vpop.f32.mrb[1].mxu1 }
 0x2f9   : > { %v510_v41 = vpop.f32.mrb[2].mxu1 }
 0x2fa   : > { %514 = vst.msk [vmem:[#allocation4] sm:$0xff] %vm375_vm2, %v513_v39  ;;  %v739_v42 = vpop.f32.mrb[3].mxu1 }
 0x2fb PF: > { %p721_p0 = scmp.ne.s32.totalorder %s865_s12, 1 }
 0x2fc   : > { %v521_v43 = vld [vmem:[#allocation3] sm:$0xff] (!%p721_p0)  ;;  %v904_v44 = vmov (!%p721_p0), 0   ;;  %vm530_vm10 = vcmask (!%p721_p0), 257024  }
 0x2fd   : > { %519 = sbr.rel (%p721_p0) target bundleno = 909 (0x38d), region = 44  ;;  %824 = vset.pattern.permute.xlu0 (!%p721_p0), %v904_v44  ;;  %825 = vrcp.f32 (!%p721_p0), %v521_v43 }
 0x301   : > { %v520_v46 = vld [vmem:[#allocation4] sm:$0xff] (!%p721_p0) }
 0x307   : > { %v826_v45 = vpop.eup %825 }
 0x308   : > { %525 = vperm.xlu0 %824, %v826_v45  }
 0x387   : > { %v526_v47 = vpop.permute.xlu0 %525 }
 0x388   : > { %v528_v48 = vmul.f32 %v526_v47, %v520_v46 }
 0x38a   : > { %v529_v49 = vpack.c.bf16 %v528_v48, %v528_v48 }
 0x38c   : > { %531 = vst.msk [vmem:[%s999_s9] sm:$0xf] %vm530_vm10, %v529_v49 }
 0x38d PF: > { %s13_s20 = sadd.s32 1, %s897_s20   ;;  %s1064_s26 = sld [smem:[#allocation5_spill]] }
 0x38e   : > { %p10_p1 = scmp.ge.s32.totalorder %s13_s20, 34   ;;  %s1065_s12 = smov %s881_s16 }
 0x38f   : > { %s1066_s13 = smov %s885_s17  ;;  %s1067_s14 = smov %s889_s18 }
 0x390   : > { %s1068_s15 = smov %s893_s19  ;;  %s1069_s16 = smov %s1074_s21 }
 0x391   : > { %s1070_s17 = smov %s1078_s22  ;;  %s1071_s18 = smov %s1082_s23 }
 0x392   :  { %12 = sbr.rel (!%p10_p1) target bundleno = 5 (0x5), region = 80 }
 0x393   : > { %s1072_s19 = smov %s1064_s26 }

// kernel: gpt2_forward.11
= control target key start
LH: loop header
LB: loop body
LE: loop exit
PB: predicated region body
PF: predicated region fallthrough
CT: control target
= control target key end

     0   :  { %s2368_s0 = inlined_call_operand.vmem [shape: bf16[2,16,128], index: 0, kind: input, shape index: {}]   ;;  %s2369_s1 = inlined_call_operand.vmem [shape: bf16[2,4,16,32], index: 1, kind: input, shape index: {}]   ;;  %s2370_s2 = inlined_call_operand.vmem [shape: bf16[128,128], index: 2, kind: input, shape index: {}]   ;;  %s2371_s3 = inlined_call_operand.vmem [shape: f32[1,128], index: 3, kind: input, shape index: {}]   ;;  %s2372_s4 = inlined_call_operand.vmem [shape: f32[1,128], index: 4, kind: input, shape index: {}]   ;;  %s2373_s5 = inlined_call_operand.vmem [shape: f32[1,128], index: 5, kind: input, shape index: {}]   ;;  %s2374_s6 = inlined_call_operand.vmem [shape: bf16[128,512], index: 6, kind: input, shape index: {}]   ;;  %s2375_s7 = inlined_call_operand.vmem [shape: f32[1,512], index: 7, kind: input, shape index: {}]   ;;  %s2376_s8 = inlined_call_operand.vmem [shape: bf16[512,128], index: 8, kind: input, shape index: {}]   ;;  %s2377_s9 = inlined_call_operand.vmem [shape: f32[1,128], index: 9, kind: input, shape index: {}]   ;;  %s2378_s10 = inlined_call_operand.vmem [shape: f32[1,128], index: 10, kind: input, shape index: {}]   ;;  %s2379_s11 = inlined_call_operand.vmem [shape: f32[1,128], index: 11, kind: input, shape index: {}]   ;;  %s2380_s12 = inlined_call_operand.hbm [shape: f32[2,16,128], index: 12, kind: output, shape index: {}]  }
   0x1   :  { %2390 = sst [smem:[#allocation19_spill]] %s2368_s0 }
   0x2   :  { %2391 = sst [smem:[#allocation20_spill]] %s2369_s1 }
   0x3   :  { %2392 = sst [smem:[#allocation21_spill]] %s2372_s4 }
   0x4   :  { %2393 = sst [smem:[#allocation22_spill]] %s2373_s5 }
   0x5   :  { %2394 = sst [smem:[#allocation23_spill]] %s2374_s6 }
   0x6   :  { %2395 = sst [smem:[#allocation24_spill]] %s2377_s9 }
   0x7   :  { %2396 = sst [smem:[#allocation25_spill]] %s2378_s10 }
   0x8   :  { %2397 = sst [smem:[#allocation26_spill]] %s2379_s11 }
   0x9   :  { %2398 = sst [smem:[#allocation27_spill]] %s2380_s12 }
   0xa   :  { %17 = vsyncpa [#allocation7], 0 }
   0xb   :  { %19 = vsyncpa [#allocation7 + $0x1], 0  ;;  %s2018_s21 = smov 0   ;;  %s2020_s22 = smov 0  }
   0xc   :  { %s2022_s23 = smov 0   ;;  %s2024_s24 = smov 0  }
   0xd   :  { %s2026_s25 = smov 0   ;;  %s2028_s26 = smov 0  }
   0xe   :  { %s2030_s27 = smov 0   ;;  %s2032_s28 = smov 0  }
   0xf   :  { %s2034_s29 = smov 0   ;;  %s2036_s30 = smov 0  }
  0x10   :  { %s2038_s13 = smov 0   ;;  %s2040_s14 = smov 0  }
  0x11 LB: > { %2399 = sst [smem:[#allocation9_spill]] %s1903_s21  ;;  %s1513_s15 = sadd.s32 4294967295, %s1947_s14   ;;  %s1947_s14 = sphi %s2040_s14, %s25_s14   ;;  %s1943_s13 = sphi %s2038_s13, %s2431_s13   ;;  %s1939_s30 = sphi %s2036_s30, %s2430_s30   ;;  %s1935_s29 = sphi %s2034_s29, %s2429_s29   ;;  %s1931_s28 = sphi %s2032_s28, %s2428_s28   ;;  %s1927_s27 = sphi %s2030_s27, %s2427_s27   ;;  %s1923_s26 = sphi %s2028_s26, %s2426_s26   ;;  %s1919_s25 = sphi %s2026_s25, %s2436_s25   ;;  %s1915_s24 = sphi %s2024_s24, %s2435_s24   ;;  %s1911_s23 = sphi %s2022_s23, %s2434_s23   ;;  %s1907_s22 = sphi %s2020_s22, %s2433_s22   ;;  %s1903_s21 = sphi %s2018_s21, %s2432_s21  }
  0x12   : > { %2400 = sst [smem:[#allocation10_spill]] %s1935_s29  ;;  %s1514_s16 = sadd.s32 4294967294, %s1947_s14  }
  0x13   : > { %2401 = sst [smem:[#allocation11_spill]] %s1939_s30  ;;  %s37_s17 = sadd.s32 1, %s1935_s29 }
  0x14   : > { %2402 = sst [smem:[#allocation12_spill]] %s1943_s13  ;;  %s40_s18 = sadd.s32 1, %s1939_s30 }
  0x15   : > { %p38_p0 = scmp.ge.s32.totalorder %s37_s17, 2  ;;  %s44_s19 = sadd.s32 1, %s1943_s13 }
  0x16   : > { %s81_s20 = sadd.s32 1, %s1919_s25  ;;  %p88_p1 = scmp.ne.s32.totalorder %s1919_s25, %s1915_s24 }
  0x17   : > { %s2438_s17 = smov (%p38_p0, %s37_s17), 0  ;;  %s2440_s18 = smov (!%p38_p0, %s40_s18), %s1939_s30 }
  0x18   : > { %2403 = sst [smem:[#allocation13_spill]] %s2438_s17  ;;  %p89_p2 = scmp.eq.s32.totalorder %s1947_s14, 0 }
  0x19   : > { %s188_s12 = ssub.s32 %s1935_s29, %s2438_s17  ;;  %p42_p3 = scmp.ge.s32.totalorder %s2440_s18, 2 }
  0x1a   : > { %p189_p4 = scmp.eq.s32.totalorder %s188_s12, 0  ;;  %p2097_p5 = por %p89_p2, %p88_p1 }
  0x1b   : > { %s191_s10 = sadd.s32 1, %s1911_s23  ;;  %s2442_s18 = smov (%p42_p3, %s2440_s18), 0 }
  0x1c   : > { %2405 = sst [smem:[#allocation14_spill]] %s2442_s18  ;;  %s2444_s19 = smov (!%p42_p3, %s44_s19), %s1943_s13 }
  0x1d   : > { %s77_s5 = ssub.s32 %s1939_s30, %s2442_s18  ;;  %p198_p6 = scmp.ne.s32.totalorder %s1911_s23, %s1907_s22 }
  0x1e   : > { %p46_p7 = scmp.ge.s32.totalorder %s2444_s19, 2  ;;  %p345_p8 = scmp.eq.s32.totalorder %s1513_s15, 7 }
  0x1f   : > { %s2110_s17 = scalar_select %p189_p4, %s1911_s23, %s191_s10  }
  0x20   : > { %s2446_s19 = smov (%p46_p7, %s2444_s19), 0  ;;  %p2116_p9 = por %p198_p6, %p89_p2 }
  0x21   : > { %2406 = sst [smem:[#allocation15_spill]] %s2110_s17  ;;  %p2123_p10 = por %p345_p8, %p88_p1 }
  0x22   : > { %2407 = sst [smem:[#allocation16_spill]] %s2446_s19  ;;  %s76_s9 = ssub.s32 %s1943_s13, %s2446_s19 }
  0x23   : > { %p350_p11 = scmp.ne.s32.totalorder %s1915_s24, %s1903_s21  ;;  %s78_s18 = sor.u32 %s77_s5, %s76_s9 }
  0x24   : > { %p351_p12 = scmp.eq.s32.totalorder %s1514_s16, 7  ;;  %p79_p13 = scmp.eq.s32.totalorder %s78_s18, 0 }
  0x25   : > { %p1516_p2 = scmp.ge.s32.totalorder %s1947_s14, 8 }
  0x26   : > { %p2131_p0 = por %p351_p12, %p350_p11 }
  0x27   : > { %s2136_s15 = scalar_select %p79_p13, %s1919_s25, %s81_s20  }
  0x28   : > { %s2410_s10 = scalar_select %p2131_p0, 1, 0 }
  0x29   : > { %2412 = sst [smem:[#allocation18_spill]] %s2136_s15  ;;  %388 = sbr.rel (%p1516_p2) target bundleno = 78 (0x4e), region = 44 }
  0x2a   : > { %2411 = sst [smem:[#allocation17_spill]] %s2410_s10 }
  0x30   : > { %402 = sbr.rel (!%p2097_p5) target bundleno = 60 (0x3c), region = 52  ;;  %s404_s19 = sand.u32 (%p2097_p5), 1, %s1919_s25  }
  0x31   : > { %s1518_s17 = sshll.u32 (%p2097_p5), %s1943_s13, 3  ;;  %s1517_s5 = sshll.u32 (%p2097_p5), %s404_s19, 4 }
  0x32   : > { %s408_s9 = sadd.s32 (%p2097_p5), %s1939_s30, %s1518_s17  ;;  %s2413_s1 = sld [smem:[#allocation20_spill]] (%p2097_p5) }
  0x33   : > { %s1519_s16 = sshll.u32 (%p2097_p5), %s408_s9, 2  ;;  %s406_s20 = scalar_lea.vmem (%p2097_p5), [#allocation4], %s1517_s5 }
  0x38   : > { %s410_s10 = scalar_lea.vmem %s2413_s1, %s1519_s16 }
  0x39   : > { %v426_v0 = vld [vmem:[%s410_s10] sm:$0xf]  ;;  %v428_v1 = vld [vmem:[%s410_s10 + $0x8] sm:$0xf]  ;;  %v430_v2 = vld [vmem:[%s410_s10 + $0x10] sm:$0xf] }
  0x3a   : > { %427 = vst [vmem:[%s406_s20] sm:$0xf] %v426_v0  ;;  %429 = vst [vmem:[%s406_s20 + $0x4] sm:$0xf] %v428_v1  ;;  %v432_v3 = vld [vmem:[%s410_s10 + $0x18] sm:$0xf] }
  0x3b   : > { %431 = vst [vmem:[%s406_s20 + $0x8] sm:$0xf] %v430_v2  ;;  %433 = vst [vmem:[%s406_s20 + $0xc] sm:$0xf] %v432_v3 }
  0x3c PF: > { %464 = sbr.rel (!%p2116_p9) target bundleno = 78 (0x4e), region = 93  ;;  %s466_s11 = sand.u32 (%p2116_p9), 1, %s1911_s23  }
  0x3d   : > { %s1592_s17 = sshll.u32 (%p2116_p9), %s1935_s29, 3  ;;  %s1520_s19 = sshll.u32 (%p2116_p9), %s466_s11, 7 }
  0x3e   : > { %s2414_s6 = sld [smem:[#allocation23_spill]] (%p2116_p9)  ;;  %s468_s12 = scalar_lea.vmem (%p2116_p9), [#allocation5], %s1520_s19 }
  0x44   : > { %s2154_s16 = scalar_lea.vmem %s2414_s6, %s1592_s17 }
  0x45   : > { %v529_v4 = vld [vmem:[%s2154_s16] sm:$0xff]  ;;  %v531_v5 = vld [vmem:[%s2154_s16 + $0x10] sm:$0xff] }
  0x46   : > { %v533_v6 = vld [vmem:[%s2154_s16 + $0x20] sm:$0xff]  ;;  %530 = vst [vmem:[%s468_s12] sm:$0xff] %v529_v4  ;;  %532 = vst [vmem:[%s468_s12 + $0x8] sm:$0xff] %v531_v5  ;;  %v535_v7 = vld [vmem:[%s2154_s16 + $0x30] sm:$0xff] }
  0x47   : > { %534 = vst [vmem:[%s468_s12 + $0x10] sm:$0xff] %v533_v6  ;;  %v537_v8 = vld [vmem:[%s2154_s16 + $0x40] sm:$0xff]  ;;  %v539_v9 = vld [vmem:[%s2154_s16 + $0x50] sm:$0xff]  ;;  %536 = vst [vmem:[%s468_s12 + $0x18] sm:$0xff] %v535_v7 }
  0x48   : > { %538 = vst [vmem:[%s468_s12 + $0x20] sm:$0xff] %v537_v8  ;;  %540 = vst [vmem:[%s468_s12 + $0x28] sm:$0xff] %v539_v9  ;;  %v541_v10 = vld [vmem:[%s2154_s16 + $0x60] sm:$0xff]  ;;  %v543_v11 = vld [vmem:[%s2154_s16 + $0x70] sm:$0xff] }
  0x49   : > { %v545_v12 = vld [vmem:[%s2154_s16 + $0x80] sm:$0xff]  ;;  %542 = vst [vmem:[%s468_s12 + $0x30] sm:$0xff] %v541_v10  ;;  %544 = vst [vmem:[%s468_s12 + $0x38] sm:$0xff] %v543_v11  ;;  %v547_v13 = vld [vmem:[%s2154_s16 + $0x90] sm:$0xff] }
  0x4a   : > { %546 = vst [vmem:[%s468_s12 + $0x40] sm:$0xff] %v545_v12  ;;  %v549_v14 = vld [vmem:[%s2154_s16 + $0xa0] sm:$0xff]  ;;  %v551_v15 = vld [vmem:[%s2154_s16 + $0xb0] sm:$0xff]  ;;  %548 = vst [vmem:[%s468_s12 + $0x48] sm:$0xff] %v547_v13 }
  0x4b   : > { %550 = vst [vmem:[%s468_s12 + $0x50] sm:$0xff] %v549_v14  ;;  %552 = vst [vmem:[%s468_s12 + $0x58] sm:$0xff] %v551_v15  ;;  %v553_v16 = vld [vmem:[%s2154_s16 + $0xc0] sm:$0xff]  ;;  %v555_v17 = vld [vmem:[%s2154_s16 + $0xd0] sm:$0xff] }
  0x4c   : > { %v557_v18 = vld [vmem:[%s2154_s16 + $0xe0] sm:$0xff]  ;;  %554 = vst [vmem:[%s468_s12 + $0x60] sm:$0xff] %v553_v16  ;;  %556 = vst [vmem:[%s468_s12 + $0x68] sm:$0xff] %v555_v17  ;;  %v559_v19 = vld [vmem:[%s2154_s16 + $0xf0] sm:$0xff] }
  0x4d   : > { %558 = vst [vmem:[%s468_s12 + $0x70] sm:$0xff] %v557_v18  ;;  %560 = vst [vmem:[%s468_s12 + $0x78] sm:$0xff] %v559_v19 }
  0x4e PF: > { %p1523_p1 = scmp.ge.s32.totalorder %s1947_s14, 1  ;;  %p582_p3 = scmp.lt.s32.totalorder %s1947_s14, 9 }
  0x50   : > { %p583_p4 = pnand %p1523_p1, %p582_p3 }
  0x51   : > { %s2175_s10 = sand.u32 (!%p583_p4), 1, %s1915_s24   ;;  %s596_s5 = sand.u32 (!%p583_p4), 1, %s1907_s22  }
  0x52   : > { %586 = sbr.rel (%p583_p4) target bundleno = 1480 (0x5c8), region = 139  ;;  %s1524_s18 = sshll.u32 (!%p583_p4), %s2175_s10, 4 }
  0x53   : > { %s1525_s20 = sshll.u32 (!%p583_p4), %s596_s5, 7  ;;  %s1526_s11 = sshll.u32 (!%p583_p4), %s2175_s10, 3 }
  0x54   : > { %p658_p5 = scmp.lt.s32.totalorder (!%p583_p4), %s1931_s28, 1  ;;  %p660_p6 = scmp.lt.s32.totalorder (!%p583_p4), %s1927_s27, 1 }
  0x55   : > { %s1529_s9 = sshll.u32 (!%p583_p4), %s1923_s26, 1  ;;  %s1530_s1 = sshll.u32 (!%p583_p4), %s1923_s26, 5 }
  0x56   : > { %p668_p7 = scmp.lt.s32.totalorder (!%p583_p4), %s1529_s9, 3  ;;  %s2415_s0 = sld [smem:[#allocation19_spill]] (!%p583_p4) }
  0x57   : > { %p673_p8 = scmp.lt.s32.totalorder (!%p583_p4), %s1530_s1, 63  ;;  %s2204_s6 = scalar_lea.vmem (!%p583_p4), [#allocation5], %s1525_s20 }
  0x58   : > { %s2206_s13 = scalar_lea.vmem (!%p583_p4), [#allocation6], %s1526_s11  ;;  %p1532_p9 = scmp.ne.s32.totalorder (!%p583_p4), %s1923_s26, 0 }
  0x59   : > { %s659_s17 = scalar_select %p658_p5, %s1931_s28, 1 }
  0x5a   : > { %s661_s19 = scalar_select %p660_p6, %s1927_s27, 1 }
  0x5b   : > { %s1527_s21 = sshll.u32 %s659_s17, 1  ;;  %s2448_s9 = smov (!%p668_p7, %s1529_s9), 3  ;;  %v1765_v20 = vld [vmem:[%s2370_s2 + $0x10] sm:$0xff] (!%p1532_p9)   ;;  %v1949_v21 = vmov (!%p1532_p9), 0.0   ;;  %v1766_v22 = vld [vmem:[%s2370_s2] sm:$0xff] (!%p1532_p9)   ;;  %v1767_v23 = vld [vmem:[%s2370_s2 + $0x18] sm:$0xff] (!%p1532_p9)  }
  0x5c   : > { %s663_s16 = sadd.s32 %s1527_s21, %s661_s19  ;;  %s2450_s1 = smov (!%p673_p8, %s1530_s1), 63  ;;  %1627 = vmatprep.subr.bf16.mxu0 (!%p1532_p9), %v1949_v21  ;;  %1635 = vmatprep.subr.bf16.mxu1 (!%p1532_p9), %v1949_v21  ;;  %vm1950_vm0 = vmmov (!%p1532_p9), 0   ;;  %v1768_v24 = vld [vmem:[%s2370_s2 + $0x8] sm:$0xff] (!%p1532_p9)   ;;  %vm708_vm1 = vcmask (!%p1532_p9), 261120   ;;  %v1769_v27 = vld [vmem:[%s2370_s2 + $0x20] sm:$0xff] (!%p1532_p9)   ;;  %v1770_v28 = vld [vmem:[%s2370_s2 + $0x30] sm:$0xff] (!%p1532_p9)  }
  0x5d   : > { %s1528_s12 = sshll.u32 %s663_s16, 2  ;;  %s670_s29 = scalar_lea.vmem %s2375_s7, %s2448_s9  ;;  %1628 = vmatpush3.bf16.msra.mxu0 (!%p1532_p9), %v1765_v20  ;;  %1631 = vmatprep.mubr.msk.bf16.mxu0 (!%p1532_p9), %vm1950_vm0, %v1949_v21  ;;  %v1771_v29 = vld [vmem:[%s2370_s2 + $0x28] sm:$0xff] (!%p1532_p9)   ;;  %v1772_v30 = vld [vmem:[%s2370_s2 + $0x38] sm:$0xff] (!%p1532_p9)   ;;  %v1548_v47 = vld [vmem:[%s2371_s3] ss:$0 sm:$0xff] (!%p1532_p9) }
  0x5e   : > { %s2189_s30 = scalar_lea.vmem %s2415_s0, %s1528_s12  ;;  %s1531_s17 = sshll.u32 %s2450_s1, 2  ;;  %1636 = vmatpush3.bf16.msra.mxu1 (!%p1532_p9), %v1766_v22  ;;  %1629 = vmatprep.subr.bf16.mxu0 (!%p1532_p9), %v1949_v21 }
  0x5f   : > { %s2200_s21 = scalar_lea.vmem %s2376_s8, %s1531_s17  ;;  %s2202_s16 = scalar_lea.vmem [#allocation4], %s1524_s18  ;;  %1637 = vmatprep.subr.bf16.mxu1 (!%p1532_p9), %v1949_v21  ;;  %1639 = vmatprep.mubr.msk.bf16.mxu1 (!%p1532_p9), %vm1950_vm0, %v1949_v21  ;;  %v683_v43 = vld [vmem:[%s2189_s30] sm:$0xf] (!%p1532_p9) }
  0x60   : > { %682 = sbr.rel (%p1532_p9) target bundleno = 642 (0x282), region = 151  ;;  %v1533_v25 = vld [vmem:[%s2202_s16 + $0x4] sm:$0xf] (!%p1532_p9)  ;;  %v685_v26 = vld [vmem:[%s2202_s16] sm:$0xf] (!%p1532_p9)  ;;  %v684_v53 = vunpack.c.l.bf16 (!%p1532_p9), %v683_v43  ;;  %s2416_s22 = sld [smem:[#allocation24_spill]] (!%p1532_p9) }
  0x61   : > { %1630 = vmatpush3.bf16.msra.mxu0 (!%p1532_p9), %v1767_v23  ;;  %v1540_v31 = vld [vmem:[%s2202_s16 + $0x8] sm:$0xf] (!%p1532_p9)  ;;  %v1544_v32 = vld [vmem:[%s2202_s16 + $0xc] sm:$0xf] (!%p1532_p9)  ;;  %s2417_s17 = sld [smem:[#allocation21_spill]] (!%p1532_p9)  ;;  %s2418_s1 = sld [smem:[#allocation22_spill]] (!%p1532_p9) }
  0x62   : > { %1638 = vmatpush3.bf16.msra.mxu1 (!%p1532_p9), %v1768_v24  ;;  %1643 = vmatprep.subr.bf16.mxu0 (!%p1532_p9), %v1949_v21 }
  0x63   : > { %1651 = vmatprep.subr.bf16.mxu1 (!%p1532_p9), %v1949_v21 }
  0x64   : > { %1632 = vmatmul.mubr.msk.bf16.vlgmr.msra.gmra.mrb[0].mxu0 (!%p1532_p9), %vm708_vm1, %v1533_v25 }
  0x65   : > { %1640 = vmatmul.mubr.msk.bf16.vlgmr.msra.gmra.mrb[0].mxu1 (!%p1532_p9), %vm708_vm1, %v685_v26  ;;  %1644 = vmatpush3.bf16.msra.mxu0 (!%p1532_p9), %v1769_v27 }
  0x66   : > { %1652 = vmatpush3.bf16.msra.mxu1 (!%p1532_p9), %v1770_v28  ;;  %1645 = vmatprep.subr.bf16.mxu0 (!%p1532_p9), %v1949_v21  ;;  %v1551_v56 = vld [vmem:[%s2416_s22] ss:$0 sm:$0xff] (!%p1532_p9) }
  0x67   : > { %1653 = vmatprep.subr.bf16.mxu1 %v1949_v21  ;;  %1647 = vmatprep.mubr.msk.bf16.mxu0 %vm1950_vm0, %v1949_v21  ;;  %v1549_v3 = vld [vmem:[%s2417_s17] ss:$0 sm:$0xff] }
  0x68   : > { %1655 = vmatprep.mubr.msk.bf16.mxu1 %vm1950_vm0, %v1949_v21  ;;  %v1550_v5 = vld [vmem:[%s2418_s1] ss:$0 sm:$0xff] }
  0x69   : > { %1646 = vmatpush3.bf16.msra.mxu0 %v1771_v29 }
  0x6a   : > { %1654 = vmatpush3.bf16.msra.mxu1 %v1772_v30 }
  0x6c   : > { %1648 = vmatmul.mubr.msk.bf16.vlgmr.msra.gmra.mrb[4].mxu0 %vm708_vm1, %v1540_v31 }
  0x6d   : > { %1656 = vmatmul.mubr.msk.bf16.vlgmr.msra.gmra.mrb[4].mxu1 %vm708_vm1, %v1544_v32 }
 0x137   : > { %v746_v33 = vpop.f32.mrb[0].mxu0 }
 0x138   : > { %v801_v34 = vpop.f32.mrb[0].mxu1  ;;  %v1633_v35 = vpop.f32.mrb[1].mxu0 }
 0x139   : > { %v802_v36 = vadd.f32 %v801_v34, %v746_v33  ;;  %v1641_v37 = vpop.f32.mrb[1].mxu1  ;;  %v749_v38 = vpop.f32.mrb[2].mxu0 }
 0x13a   : > { %v804_v39 = vpop.f32.mrb[2].mxu1  ;;  %v1634_v40 = vpop.f32.mrb[3].mxu0 }
 0x13b   : > { %v1642_v41 = vpop.f32.mrb[3].mxu1 }
 0x13f   : > { %v862_v42 = vpop.f32.mrb[4].mxu0 }
 0x140   : > { %v868_v44 = vadd.f32 %v862_v42, %v802_v36  ;;  %v924_v45 = vpop.f32.mrb[4].mxu1  ;;  %v1649_v46 = vpop.f32.mrb[5].mxu0 }
 0x141   : > { %v1657_v48 = vpop.f32.mrb[5].mxu1  ;;  %v865_v49 = vpop.f32.mrb[6].mxu0 }
 0x142   : > { %v930_v50 = vadd.f32 %v924_v45, %v868_v44  ;;  %v927_v51 = vpop.f32.mrb[6].mxu1  ;;  %v1650_v52 = vpop.f32.mrb[7].mxu0 }
 0x143   : > { %v1658_v54 = vpop.f32.mrb[7].mxu1 }
 0x144   : > { %v938_v55 = vadd.f32 %v1548_v47, %v930_v50 }
 0x146   : > { %v939_v57 = vadd.f32 %v938_v55, %v684_v53 }
 0x148   : > { %942 = vadd.xlane.f32.xlu0 %v939_v57  ;;  %v977_v58 = vadd.f32 %v1551_v56, %v939_v57 }
 0x14a   : > { %978 = vst [vmem:[#allocation3] sm:$0xff] %v977_v58 }
 0x1d5   : > { %v943_v59 = vpop.xlane.xlu0 %942 }
 0x1d6   : > { %v945_v60 = vmul.f32 0.0078125, %v943_v59 }
 0x1d8   : > { %v946_v61 = vsub.f32 %v939_v57, %v945_v60 }
 0x1da   : > { %v947_v62 = vmul.f32 %v946_v61, %v946_v61 }
 0x1dc   : > { %948 = vadd.xlane.f32.xlu0 %v947_v62 }
 0x269   : > { %v949_v63 = vpop.xlane.xlu0 %948 }
 0x26a   : > { %v950_v0 = vmul.f32 0.0078125, %v949_v63 }
 0x26c   : > { %v951_v1 = vadd.f32 1e-05, %v950_v0 }
 0x26e   : > { %1773 = vrsqrt.f32 %v951_v1 }
 0x278   : > { %v1774_v2 = vpop.eup %1773 }
 0x279   : > { %v953_v4 = vmul.f32 %v1774_v2, %v946_v61 }
 0x27b   : > { %v960_v6 = vmul.f32 %v1549_v3, %v953_v4 }
 0x27d   : > { %v967_v7 = vadd.f32 %v1550_v5, %v960_v6 }
 0x27f   : > { %v968_v8 = vpack.c.bf16 %v967_v7, %v967_v7 }
 0x281   : > { %969 = vst [vmem:[#allocation2] sm:$0xf] %v968_v8 }
 0x282 PF: > { %v1775_v9 = vld [vmem:[%s2204_s6 + $0x4] ss:$8 sps:$4 sm:$0xff]   ;;  %v1777_v10 = vld [vmem:[%s2204_s6] ss:$8 sps:$4 sm:$0xff]   ;;  %v1951_v11 = vmov 0   ;;  %v1799_v27 = vld [vmem:[%s2200_s21 + $0x40] sm:$0xff]   ;;  %v998_v43 = vlaneseq }
 0x283   : > { %1120 = vmatprep.mubr.bf16.mxu0 %v1951_v11  ;;  %1088 = vmatprep.subr.bf16.mxu0 %v1775_v9  ;;  %v1778_v12 = vld [vmem:[%s2204_s6 + $0x14] ss:$8 sps:$4 sm:$0xff]   ;;  %v1780_v13 = vld [vmem:[%s2204_s6 + $0x10] ss:$8 sps:$4 sm:$0xff]   ;;  %v1781_v14 = vld [vmem:[%s2204_s6 + $0x24] ss:$8 sps:$4 sm:$0xff]  }
 0x284   : > { %1089 = vmatpush1.bf16.msra.mxu0 %v1777_v10  ;;  %v1783_v15 = vld [vmem:[%s2204_s6 + $0x20] ss:$8 sps:$4 sm:$0xff]   ;;  %v1784_v16 = vld [vmem:[%s2204_s6 + $0x34] ss:$8 sps:$4 sm:$0xff]   ;;  %v1786_v17 = vld [vmem:[%s2204_s6 + $0x30] ss:$8 sps:$4 sm:$0xff]   ;;  %1605 = vmatprep.subr.bf16.mxu1 %v1799_v27 }
 0x285   : > { %1090 = vmatprep.subr.bf16.mxu0 %v1778_v12  ;;  %v1787_v18 = vld [vmem:[%s2204_s6 + $0x44] ss:$8 sps:$4 sm:$0xff]   ;;  %v1789_v19 = vld [vmem:[%s2204_s6 + $0x40] ss:$8 sps:$4 sm:$0xff]   ;;  %v1790_v20 = vld [vmem:[%s2204_s6 + $0x54] ss:$8 sps:$4 sm:$0xff]  }
 0x286   : > { %v1792_v21 = vld [vmem:[%s2204_s6 + $0x50] ss:$8 sps:$4 sm:$0xff]   ;;  %v1793_v22 = vld [vmem:[%s2204_s6 + $0x64] ss:$8 sps:$4 sm:$0xff]   ;;  %v1795_v23 = vld [vmem:[%s2204_s6 + $0x60] ss:$8 sps:$4 sm:$0xff]  }
 0x287   : > { %v1796_v24 = vld [vmem:[%s2204_s6 + $0x74] ss:$8 sps:$4 sm:$0xff]   ;;  %v1798_v25 = vld [vmem:[%s2204_s6 + $0x70] ss:$8 sps:$4 sm:$0xff]   ;;  %v1803_v31 = vld [vmem:[%s2200_s21 + $0x50] sm:$0xff]   ;;  %v999_v44 = vshrl.u32 %v998_v43, 7 }
 0x288   : > { %1091 = vmatpush1.bf16.msra.mxu0 %v1780_v13  ;;  %v979_v26 = vld [vmem:[#allocation2] sm:$0xf]  ;;  %v1801_v29 = vld [vmem:[%s2200_s21 + $0x48] sm:$0xff]   ;;  %v1804_v32 = vld [vmem:[%s2200_s21 + $0x10] sm:$0xff]   ;;  %p1584_p11 = scmp.ne.s32.totalorder %s1923_s26, 1 }
 0x289   : > { %1092 = vmatprep.subr.bf16.mxu0 %v1781_v14  ;;  %v1800_v28 = vld [vmem:[%s2200_s21] sm:$0xff]   ;;  %v1802_v30 = vld [vmem:[%s2200_s21 + $0x8] sm:$0xff]   ;;  %v1805_v33 = vld [vmem:[%s2200_s21 + $0x58] sm:$0xff]   ;;  %v1000_v45 = vsub.s32 0, %v999_v44  ;;  %v1004_v47 = vsub.s32 1, %v999_v44  ;;  %s2420_s20 = sld [smem:[#allocation26_spill]] (!%p1584_p11) }
 0x28a   : > { %1606 = vmatpush3.bf16.msra.mxu1 %v1800_v28  ;;  %v1806_v34 = vld [vmem:[%s2200_s21 + $0x18] sm:$0xff]   ;;  %v1807_v35 = vld [vmem:[%s2200_s21 + $0x60] sm:$0xff]   ;;  %v1809_v37 = vld [vmem:[%s2200_s21 + $0x68] sm:$0xff]  }
 0x28b   : > { %1607 = vmatprep.subr.bf16.mxu1 %v1801_v29  ;;  %v1808_v36 = vld [vmem:[%s2200_s21 + $0x20] sm:$0xff]   ;;  %v1810_v38 = vld [vmem:[%s2200_s21 + $0x28] sm:$0xff]   ;;  %v1811_v39 = vld [vmem:[%s2200_s21 + $0x70] sm:$0xff]  }
 0x28c   : > { %1093 = vmatpush1.bf16.msra.mxu0 %v1783_v15  ;;  %v1812_v40 = vld [vmem:[%s2200_s21 + $0x30] sm:$0xff]   ;;  %v1813_v41 = vld [vmem:[%s2200_s21 + $0x78] sm:$0xff]   ;;  %v996_v46 = vld [vmem:[%s670_s29] sm:$0x3] }
 0x28d   : > { %1094 = vmatprep.subr.bf16.mxu0 %v1784_v16  ;;  %v1814_v42 = vld [vmem:[%s2200_s21 + $0x38] sm:$0xff]   ;;  %v1001_v48 = vrot.slane %v996_v46, %v1000_v45  ;;  %v1005_v49 = vrot.slane %v996_v46, %v1004_v47  ;;  %v1147_v13 = vld [vmem:[#allocation3] sm:$0xff]  ;;  %s2419_s21 = sld [smem:[#allocation25_spill]] (!%p1584_p11) }
 0x28e   : > { %1608 = vmatpush3.bf16.msra.mxu1 %v1802_v30 }
 0x28f   : > { %1609 = vmatprep.subr.bf16.mxu1 %v1803_v31  ;;  %v1586_v30 = vld [vmem:[%s2420_s20] ss:$0 sm:$0xff] (!%p1584_p11) }
 0x290   : > { %1095 = vmatpush1.bf16.msra.mxu0 %v1786_v17 }
 0x291   : > { %1096 = vmatprep.subr.bf16.mxu0 %v1787_v18 }
 0x292   : > { %1610 = vmatpush3.bf16.msra.mxu1 %v1804_v32 }
 0x293   : > { %1611 = vmatprep.subr.bf16.mxu1 %v1805_v33  ;;  %v1585_v28 = vld [vmem:[%s2419_s21] ss:$0 sm:$0xff] (!%p1584_p11) }
 0x294   : > { %1097 = vmatpush1.bf16.msra.mxu0 %v1789_v19 }
 0x295   : > { %1098 = vmatprep.subr.bf16.mxu0 %v1790_v20 }
 0x296   : > { %1612 = vmatpush3.bf16.msra.mxu1 %v1806_v34 }
 0x297   : > { %1613 = vmatprep.subr.bf16.mxu1 %v1807_v35 }
 0x298   : > { %1099 = vmatpush1.bf16.msra.mxu0 %v1792_v21 }
 0x299   : > { %1100 = vmatprep.subr.bf16.mxu0 %v1793_v22 }
 0x29a   : > { %1614 = vmatpush3.bf16.msra.mxu1 %v1808_v36 }
 0x29b   : > { %1615 = vmatprep.subr.bf16.mxu1 %v1809_v37 }
 0x29c   : > { %1101 = vmatpush1.bf16.msra.mxu0 %v1795_v23 }
 0x29d   : > { %1102 = vmatprep.subr.bf16.mxu0 %v1796_v24 }
 0x29e   : > { %1616 = vmatpush3.bf16.msra.mxu1 %v1810_v38 }
 0x29f   : > { %1617 = vmatprep.subr.bf16.mxu1 %v1811_v39 }
 0x2a0   : > { %1103 = vmatpush1.bf16.msra.mxu0 %v1798_v25 }
 0x2a2   : > { %1618 = vmatpush3.bf16.msra.mxu1 %v1812_v40 }
 0x2a3   : > { %1121 = vmatmul.mubr.bf16.vlgmr.msra.gmra.mrb[0].mxu0 %v979_v26  ;;  %1619 = vmatprep.subr.bf16.mxu1 %v1813_v41 }
 0x2a6   : > { %1620 = vmatpush3.bf16.msra.mxu1 %v1814_v42 }
 0x376   : > { %v1122_v50 = vpop.f32.mrb[0].mxu0 }
 0x377   : > { %v1123_v51 = vadd.f32 %v1122_v50, %v1001_v48  ;;  %v1124_v52 = vpop.f32.mrb[1].mxu0 }
 0x378   : > { %v1125_v53 = vadd.f32 %v1124_v52, %v1005_v49  ;;  %v1126_v54 = vpop.f32.mrb[2].mxu0 }
 0x379   : > { %v1131_v55 = vmul.f32 %v1123_v51, %v1123_v51  ;;  %v1127_v56 = vpop.f32.mrb[3].mxu0  ;;  %v1129_v4 = vmul.f32 0.5, %v1123_v51 }
 0x37a   : > { %v1132_v57 = vmul.f32 %v1125_v53, %v1125_v53  ;;  %v1130_v6 = vmul.f32 0.5, %v1125_v53 }
 0x37b   : > { %v1133_v58 = vmul.f32 %v1131_v55, %v1123_v51 }
 0x37c   : > { %v1134_v59 = vmul.f32 %v1132_v57, %v1125_v53 }
 0x37d   : > { %v1135_v60 = vmul.f32 0.044715, %v1133_v58 }
 0x37e   : > { %v1136_v61 = vmul.f32 0.044715, %v1134_v59 }
 0x37f   : > { %v1137_v62 = vadd.f32 %v1135_v60, %v1123_v51 }
 0x380   : > { %v1138_v63 = vadd.f32 %v1136_v61, %v1125_v53 }
 0x381   : > { %v1139_v0 = vmul.f32 0.7978846, %v1137_v62 }
 0x382   : > { %v1140_v1 = vmul.f32 0.7978846, %v1138_v63 }
 0x383   : > { %1815 = vtanh.f32 %v1139_v0 }
 0x384   : > { %1817 = vtanh.f32 %v1140_v1 }
 0x38d   : > { %v1816_v2 = vpop.eup %1815 }
 0x38e   : > { %v1818_v3 = vpop.eup %1817  ;;  %v1143_v5 = vadd.f32 1.0, %v1816_v2 }
 0x38f   : > { %v1144_v7 = vadd.f32 1.0, %v1818_v3 }
 0x390   : > { %v1145_v8 = vmul.f32 %v1143_v5, %v1129_v4 }
 0x391   : > { %v1146_v9 = vmul.f32 %v1144_v7, %v1130_v6 }
 0x392   : > { %v1148_v11 = vpack.c.bf16 %v1145_v8, %v1145_v8 }
 0x393   : > { %v1149_v10 = vpack.c.bf16 %v1146_v9, %v1146_v9 }
 0x395   : > { %1310 = vmatprep.mubr.bf16.mxu1 %v1149_v10 }
 0x396   : > { %1311 = vmatmul.mubr.bf16.vlgmr.msra.gmra.mrb[0].mxu1 %v1148_v11 }
 0x469   : > { %v1621_v12 = vpop.f32.mrb[0].mxu1  ;;  %1323 = sbr.rel (%p1584_p11) target bundleno = 1455 (0x5af), region = 155 }
 0x46a   : > { %v1622_v14 = vpop.f32.mrb[1].mxu1 }
 0x46b   : > { %v1623_v15 = vadd.f32 %v1622_v14, %v1621_v12  ;;  %v1624_v16 = vpop.f32.mrb[2].mxu1 }
 0x46c   : > { %v1625_v17 = vpop.f32.mrb[3].mxu1 }
 0x46d   : > { %v1318_v18 = vadd.f32 %v1623_v15, %v1147_v13 }
 0x46f   : > { %1319 = vst [vmem:[#allocation3] sm:$0xff] %v1318_v18 }
 0x476   : > { %v1324_v19 = vld [vmem:[#allocation3] sm:$0xff] }
 0x477   : > { %1327 = vadd.xlane.f32.xlu0 %v1324_v19 }
 0x504   : > { %v1328_v20 = vpop.xlane.xlu0 %1327 }
 0x505   : > { %v1330_v21 = vmul.f32 0.0078125, %v1328_v20 }
 0x507   : > { %v1331_v22 = vsub.f32 %v1324_v19, %v1330_v21 }
 0x509   : > { %v1332_v23 = vmul.f32 %v1331_v22, %v1331_v22 }
 0x50b   : > { %1333 = vadd.xlane.f32.xlu0 %v1332_v23 }
 0x598   : > { %v1334_v24 = vpop.xlane.xlu0 %1333 }
 0x599   : > { %v1335_v25 = vmul.f32 0.0078125, %v1334_v24 }
 0x59b   : > { %v1336_v26 = vadd.f32 1e-05, %v1335_v25 }
 0x59d   : > { %1819 = vrsqrt.f32 %v1336_v26 }
 0x5a7   : > { %v1820_v27 = vpop.eup %1819 }
 0x5a8   : > { %v1338_v29 = vmul.f32 %v1820_v27, %v1331_v22 }
 0x5aa   : > { %v1345_v31 = vmul.f32 %v1585_v28, %v1338_v29 }
 0x5ac   : > { %v1352_v32 = vadd.f32 %v1586_v30, %v1345_v31 }
 0x5ae   : > { %1353 = vst [vmem:[%s2206_s13] sm:$0xff] %v1352_v32 }
 0x5af PF: > { %s1588_s16 = sshll.u32 %s1931_s28, 1  ;;  %s1370_s11 = sshll.u32 %s2206_s13, 4  ;;  %s2306_s11 = int_to_ptr.vmem [resolvable:$true] %s1370_s11 }
 0x5b0   : > { %s1366_s0 = sadd.s32 %s1927_s27, %s1588_s16  ;;  %s2421_s17 = sld [smem:[#allocation27_spill]] }
 0x5b1   : > { %s1589_s22 = sshll.u32 %s1366_s0, 7  ;;  %s1355_s12 = scalar_lea.sflag [#allocation7], %s2175_s10 }
 0x5b2   : > { %s1821_s1 = scalar_lea.vmem %s2306_s11, 128  ;;  %s1952_s6 = smov [#allocation6]  }
 0x5b3   : > { %p1822_p12 = scmp.ne.s32.totalorder %s2306_s11, %s1821_s1  ;;  %s1825_s28 = sshll.u32 %s1952_s6, 4  ;;  %s1826_s28 = int_to_ptr.vmem [resolvable:$false] %s1825_s28 }
 0x5b4   : > { %s1827_s27 = scalar_lea.vmem %s1826_s28, 256  ;;  %p1828_p1 = scmp.lt.s32.totalorder %s2306_s11, %s1826_s28 }
 0x5b5   : > { %p1823_p13 = pnand %p1822_p12, %p2123_p10  ;;  %p1829_p3 = scmp.lt.s32.totalorder %s1827_s27, %s1821_s1 }
 0x5b6   : > { %s1368_s19 = scalar_lea.hbm %s2421_s17, %s1589_s22 }
 0x5b7   : > { %p1824_p2 = pneg %p1823_p13  ;;  %p1830_p4 = por %p1829_p3, %p1828_p1 }
 0x5b9   : > { %p1831_p5 = pnand %p1830_p4, %p1824_p2 }
 0x5bb   : > { %1834 = shalt.err (!%p1831_p5)
}
 0x5bc   : > { %s1835_s13 = scalar_lea.hbm %s1368_s19, 128  ;;  %s1839_s29 = scalar_lea.hbm %s2421_s17, 512 }
 0x5bd   : > { %p1836_p6 = scmp.ne.s32.totalorder %s1368_s19, %s1835_s13  ;;  %p1840_p9 = scmp.lt.u32.totalorder %s1368_s19, %s2421_s17 }
 0x5be   : > { %p1841_p11 = scmp.lt.u32.totalorder %s1839_s29, %s1835_s13  ;;  %p1843_p13 = scmp.lt.u32.totalorder %s1835_s13, %s1368_s19 }
 0x5bf   : > { %p1837_p7 = pnand %p1836_p6, %p2123_p10 }
 0x5c0   : > { %p1842_p12 = por %p1841_p11, %p1840_p9 }
 0x5c1   : > { %p1838_p8 = pneg %p1837_p7 }
 0x5c2   : > { %p1844_p1 = por %p1843_p13, %p1842_p12 }
 0x5c4   : > { %p1845_p2 = pnand %p1844_p1, %p1838_p8 }
 0x5c6   : > { %1848 = shalt.err (!%p1845_p2)
}
 0x5c7   : > { %1659 = dma.vmem_to_hbm [thread:$0]  (%p2123_p10), %s2306_s11, 128, %s1368_s19, %s1355_s12  }
 0x5c8 PF: > { %s2422_s26 = sld [smem:[#allocation9_spill]]  ;;  %p1665_p3 = scmp.ge.s32.totalorder %s1947_s14, 2 }
 0x5ca   : > { %p1662_p4 = pnand %p1665_p3, %p2131_p0 }
 0x5ce   : > { %s1382_s20 = sand.u32 1, %s2422_s26  }
 0x5cf   : > { %s1383_s16 = scalar_lea.sflag [#allocation7], %s1382_s20 }
 0x5d0   : > { %1898 = dma.done.wait (!%p1662_p4), %s1383_s16, 128  }
 0x5d1   : > { %1900 = vsyncadd (!%p1662_p4), %s1383_s16, 4294967168  ;;  %s25_s14 = sadd.s32 1, %s1947_s14   ;;  %s2424_s0 = sld [smem:[#allocation15_spill]] }
 0x5d2   : > { %p22_p5 = scmp.ge.s32.totalorder %s25_s14, 10   ;;  %s2425_s4 = sld [smem:[#allocation18_spill]] }
 0x5d3   : > { %s2426_s26 = sld [smem:[#allocation10_spill]]  ;;  %s2427_s27 = sld [smem:[#allocation11_spill]] }
 0x5d4   : > { %s2428_s28 = sld [smem:[#allocation12_spill]]  ;;  %s2429_s29 = sld [smem:[#allocation13_spill]] }
 0x5d5   : > { %s2430_s30 = sld [smem:[#allocation14_spill]]  ;;  %s2431_s13 = sld [smem:[#allocation16_spill]] }
 0x5d6   : > { %s2432_s21 = smov %s1915_s24  ;;  %s2433_s22 = smov %s1911_s23 }
 0x5d7   : > { %s2434_s23 = smov %s2424_s0  ;;  %s2435_s24 = smov %s1919_s25 }
 0x5d8   : > { %s2436_s25 = smov %s2425_s4  ;;  %24 = sbr.rel (!%p22_p5) target bundleno = 17 (0x11), region = 215 }
 0x5df   :  { %1388 = vsyncpa [#allocation7], 1 }
 0x5e0   :  { %1390 = vsyncpa [#allocation7 + $0x1], 1 }

// kernel: gpt2_forward.6
= control target key start
LH: loop header
LB: loop body
LE: loop exit
PB: predicated region body
PF: predicated region fallthrough
CT: control target
= control target key end

     0   :  { %s1272_s24 = smov 0   ;;  %s1274_s25 = smov 0   ;;  %s1504_s0 = inlined_call_operand.vmem [shape: bf16[2,16,128], index: 0, kind: input, shape index: {}]   ;;  %s1505_s1 = inlined_call_operand.vmem [shape: f32[1,128], index: 1, kind: input, shape index: {}]   ;;  %s1506_s2 = inlined_call_operand.vmem [shape: f32[1,128], index: 2, kind: input, shape index: {}]   ;;  %s1507_s3 = inlined_call_operand.vmem [shape: bf16[128,384], index: 3, kind: input, shape index: {}]   ;;  %s1508_s4 = inlined_call_operand.vmem [shape: f32[1,384], index: 4, kind: input, shape index: {}]   ;;  %s1509_s5 = inlined_call_operand.vmem [shape: bf16[2,4,16,32], index: 5, kind: output, shape index: {0}]   ;;  %s1510_s6 = inlined_call_operand.vmem [shape: bf16[2,4,16,32], index: 6, kind: output, shape index: {1}]   ;;  %s1511_s7 = inlined_call_operand.vmem [shape: bf16[2,4,16,32], index: 7, kind: output, shape index: {2}]  }
   0x1   :  { %s1276_s26 = smov 0   ;;  %s1278_s27 = smov 0  }
   0x2   :  { %s1280_s28 = smov 0   ;;  %s1282_s29 = smov 0  }
   0x3   :  { %s1284_s30 = smov 0  }
   0x4 LB: > { %s27_s8 = sadd.s32 1, %s1216_s28  ;;  %s30_s9 = sadd.s32 1, %s1220_s29  ;;  %s1224_s30 = sphi %s1284_s30, %s18_s30   ;;  %s1220_s29 = sphi %s1282_s29, %s1518_s29   ;;  %s1216_s28 = sphi %s1280_s28, %s1517_s28   ;;  %s1212_s27 = sphi %s1278_s27, %s1516_s27   ;;  %s1208_s26 = sphi %s1276_s26, %s1515_s26   ;;  %s1204_s25 = sphi %s1274_s25, %s1514_s25   ;;  %s1200_s24 = sphi %s1272_s24, %s1513_s24  }
   0x5   : > { %p28_p0 = scmp.ge.s32.totalorder %s27_s8, 2  ;;  %s983_s10 = sadd.s32 4294967295, %s1224_s30  }
   0x6   : > { %p161_p1 = scmp.ne.s32.totalorder %s1204_s25, %s1200_s24  ;;  %p162_p2 = scmp.eq.s32.totalorder %s983_s10, 3 }
   0x7   : > { %s1520_s8 = smov (%p28_p0, %s27_s8), 0  ;;  %s1522_s9 = smov (!%p28_p0, %s30_s9), %s1220_s29 }
   0x8   : > { %s147_s11 = ssub.s32 %s1216_s28, %s1520_s8  ;;  %p32_p3 = scmp.ge.s32.totalorder %s1522_s9, 2 }
   0x9   : > { %p987_p4 = scmp.ge.s32.totalorder %s1224_s30, 1  ;;  %p1318_p5 = por %p162_p2, %p161_p1 }
   0xa   : > { %p265_p6 = scmp.lt.s32.totalorder %s1224_s30, 5  ;;  %s1524_s9 = smov (%p32_p3, %s1522_s9), 0 }
   0xb   : > { %s146_s13 = ssub.s32 %s1220_s29, %s1524_s9  ;;  %s151_s15 = sadd.s32 1, %s1204_s25 }
   0xc   : > { %p266_p7 = pnand %p987_p4, %p265_p6  ;;  %s148_s14 = sor.u32 %s147_s11, %s146_s13 }
   0xd   : > { %p149_p8 = scmp.eq.s32.totalorder %s148_s14, 0  ;;  %p307_p9 = scmp.lt.s32.totalorder (!%p266_p7), %s1212_s27, 1  ;;  %v1136_v2 = vld [vmem:[%s1507_s3 + $0x4] ss:$12 sps:$4 sm:$0xff] (!%p266_p7)   ;;  %v1138_v3 = vld [vmem:[%s1507_s3] ss:$12 sps:$4 sm:$0xff] (!%p266_p7)   ;;  %v381_v42 = vlaneseq (!%p266_p7) }
   0xe   : > { %269 = sbr.rel (%p266_p7) target bundleno = 721 (0x2d1), region = 40  ;;  %p309_p10 = scmp.lt.s32.totalorder (!%p266_p7), %s1208_s26, 1  ;;  %v1226_v4 = vmov (!%p266_p7), 0.0   ;;  %v1139_v5 = vld [vmem:[%s1507_s3 + $0x8] ss:$12 sps:$4 sm:$0xff] (!%p266_p7)   ;;  %524 = vmatprep.subr.bf16.mxu0 (!%p266_p7), %v1136_v2  ;;  %v1227_v26 = vmov (!%p266_p7), 0  }
   0xf   : > { %s1329_s16 = scalar_select %p149_p8, %s1204_s25, %s151_s15  }
  0x10   : > { %1054 = vmatprep.subr.bf16.mxu1 (!%p266_p7), %v1226_v4  ;;  %v1140_v6 = vld [vmem:[%s1507_s3 + $0x1c] ss:$12 sps:$4 sm:$0xff] (!%p266_p7)   ;;  %525 = vmatpush1.bf16.msra.mxu0 (!%p266_p7), %v1138_v3  ;;  %v1142_v7 = vld [vmem:[%s1507_s3 + $0x18] ss:$12 sps:$4 sm:$0xff] (!%p266_p7)   ;;  %v1143_v8 = vld [vmem:[%s1507_s3 + $0x20] ss:$12 sps:$4 sm:$0xff] (!%p266_p7)  }
  0x11   : > { %1055 = vmatpush3.bf16.msra.mxu1 (!%p266_p7), %v1139_v5  ;;  %526 = vmatprep.subr.bf16.mxu0 (!%p266_p7), %v1140_v6  ;;  %v1144_v9 = vld [vmem:[%s1507_s3 + $0x34] ss:$12 sps:$4 sm:$0xff] (!%p266_p7)   ;;  %v1146_v14 = vld [vmem:[%s1507_s3 + $0x30] ss:$12 sps:$4 sm:$0xff] (!%p266_p7)   ;;  %v1147_v15 = vld [vmem:[%s1507_s3 + $0x38] ss:$12 sps:$4 sm:$0xff] (!%p266_p7)  }
  0x12   : > { %1056 = vmatprep.subr.bf16.mxu1 (!%p266_p7), %v1226_v4  ;;  %v1148_v16 = vld [vmem:[%s1507_s3 + $0x4c] ss:$12 sps:$4 sm:$0xff] (!%p266_p7)   ;;  %v1150_v17 = vld [vmem:[%s1507_s3 + $0x48] ss:$12 sps:$4 sm:$0xff] (!%p266_p7)   ;;  %v1151_v18 = vld [vmem:[%s1507_s3 + $0x50] ss:$12 sps:$4 sm:$0xff] (!%p266_p7)   ;;  %556 = vmatprep.mubr.bf16.mxu0 (!%p266_p7), %v1227_v26 }
  0x13   : > { %v1152_v19 = vld [vmem:[%s1507_s3 + $0x64] ss:$12 sps:$4 sm:$0xff] (!%p266_p7)   ;;  %v1154_v20 = vld [vmem:[%s1507_s3 + $0x60] ss:$12 sps:$4 sm:$0xff] (!%p266_p7)   ;;  %v1155_v21 = vld [vmem:[%s1507_s3 + $0x68] ss:$12 sps:$4 sm:$0xff] (!%p266_p7)  }
  0x14   : > { %527 = vmatpush1.bf16.msra.mxu0 (!%p266_p7), %v1142_v7  ;;  %v1156_v22 = vld [vmem:[%s1507_s3 + $0x7c] ss:$12 sps:$4 sm:$0xff] (!%p266_p7)   ;;  %v1158_v23 = vld [vmem:[%s1507_s3 + $0x78] ss:$12 sps:$4 sm:$0xff] (!%p266_p7)   ;;  %v1159_v24 = vld [vmem:[%s1507_s3 + $0x80] ss:$12 sps:$4 sm:$0xff] (!%p266_p7)  }
  0x15   : > { %s308_s17 = scalar_select %p307_p9, %s1212_s27, 1  ;;  %1057 = vmatpush3.bf16.msra.mxu1 %v1143_v8  ;;  %528 = vmatprep.subr.bf16.mxu0 %v1144_v9  ;;  %v1160_v25 = vld [vmem:[%s1507_s3 + $0x94] ss:$12 sps:$4 sm:$0xff]   ;;  %vm1228_vm0 = vmmov 0   ;;  %v1162_v27 = vld [vmem:[%s1507_s3 + $0x90] ss:$12 sps:$4 sm:$0xff]  }
  0x16   : > { %s310_s18 = scalar_select %p309_p10, %s1208_s26, 1  ;;  %1058 = vmatprep.subr.bf16.mxu1 %v1226_v4  ;;  %1070 = vmatprep.mubr.msk.bf16.mxu1 %vm1228_vm0, %v1226_v4  ;;  %v1163_v28 = vld [vmem:[%s1507_s3 + $0x98] ss:$12 sps:$4 sm:$0xff]   ;;  %v1166_v30 = vld [vmem:[%s1507_s3 + $0xa8] ss:$12 sps:$4 sm:$0xff]   ;;  %v382_v43 = vshrl.u32 %v381_v42, 7 }
  0x17   : > { %s991_s19 = sshll.u32 %s308_s17, 1  ;;  %v1164_v29 = vld [vmem:[%s1507_s3 + $0xac] ss:$12 sps:$4 sm:$0xff]   ;;  %v1167_v31 = vld [vmem:[%s1507_s3 + $0xb0] ss:$12 sps:$4 sm:$0xff]   ;;  %vm607_vm1 = vcmask 257024  }
  0x18   : > { %s312_s20 = sadd.s32 %s991_s19, %s310_s18  ;;  %529 = vmatpush1.bf16.msra.mxu0 %v1146_v14  ;;  %v993_v36 = vld [vmem:[%s1505_s1] ss:$0 sm:$0xff]  ;;  %v383_v44 = vsub.s32 0, %v382_v43  ;;  %v391_v45 = vsub.s32 2, %v382_v43  ;;  %v387_v47 = vsub.s32 1, %v382_v43  ;;  %s292_s19 = sand.u32 1, %s1200_s24  }
  0x19   : > { %s992_s21 = sshll.u32 %s312_s20, 2  ;;  %1059 = vmatpush3.bf16.msra.mxu1 %v1147_v15  ;;  %530 = vmatprep.subr.bf16.mxu0 %v1148_v16  ;;  %v994_v38 = vld [vmem:[%s1506_s2] ss:$0 sm:$0xff]  ;;  %s988_s20 = sshll.u32 %s292_s19, 4 }
  0x1a   : > { %s314_s10 = scalar_lea.vmem %s1504_s0, %s992_s21  ;;  %1060 = vmatprep.subr.bf16.mxu1 %v1226_v4  ;;  %v379_v46 = vld [vmem:[%s1508_s4] sm:$0x7]  ;;  %s1229_s24 = smov 64  }
  0x1b   : > { %v316_v0 = vld [vmem:[%s314_s10] sm:$0xf]  ;;  %v384_v48 = vrot.slane %v379_v46, %v383_v44  ;;  %v392_v49 = vrot.slane %v379_v46, %v391_v45  ;;  %v388_v50 = vrot.slane %v379_v46, %v387_v47  ;;  %s1230_s21 = smov 96   ;;  %s1420_s22 = scalar_lea.vmem [#allocation4], %s988_s20 }
  0x1c   : > { %v317_v1 = vunpack.c.l.bf16 %v316_v0  ;;  %531 = vmatpush1.bf16.msra.mxu0 %v1150_v17  ;;  %s1424_s23 = scalar_lea.vmem [#allocation3], %s988_s20  ;;  %s1428_s10 = scalar_lea.vmem [#allocation2], %s988_s20 }
  0x1d   : > { %1061 = vmatpush3.bf16.msra.mxu1 %v1151_v18  ;;  %532 = vmatprep.subr.bf16.mxu0 %v1152_v19  ;;  %s1231_s11 = smov 32   ;;  %s1034_s13 = sshll.u32 (%p1318_p5), %s1212_s27, 3 }
  0x1e   : > { %320 = vadd.xlane.f32.xlu0 %v317_v1  ;;  %1062 = vmatprep.subr.bf16.mxu1 %v1226_v4  ;;  %s683_s14 = sadd.s32 (%p1318_p5), %s1208_s26, %s1034_s13 }
  0x1f   : > { %s1035_s15 = sshll.u32 (%p1318_p5), %s683_s14, 2 }
  0x20   : > { %533 = vmatpush1.bf16.msra.mxu0 %v1154_v20  ;;  %s685_s19 = scalar_lea.vmem (%p1318_p5), %s1509_s5, %s1035_s15 }
  0x21   : > { %1063 = vmatpush3.bf16.msra.mxu1 %v1155_v21  ;;  %534 = vmatprep.subr.bf16.mxu0 %v1156_v22 }
  0x22   : > { %1064 = vmatprep.subr.bf16.mxu1 %v1226_v4 }
  0x24   : > { %535 = vmatpush1.bf16.msra.mxu0 %v1158_v23 }
  0x25   : > { %1065 = vmatpush3.bf16.msra.mxu1 %v1159_v24  ;;  %536 = vmatprep.subr.bf16.mxu0 %v1160_v25 }
  0x26   : > { %1066 = vmatprep.subr.bf16.mxu1 %v1226_v4 }
  0x28   : > { %537 = vmatpush1.bf16.msra.mxu0 %v1162_v27 }
  0x29   : > { %1067 = vmatpush3.bf16.msra.mxu1 %v1163_v28  ;;  %538 = vmatprep.subr.bf16.mxu0 %v1164_v29 }
  0x2a   : > { %1068 = vmatprep.subr.bf16.mxu1 %v1226_v4 }
  0x2c   : > { %539 = vmatpush1.bf16.msra.mxu0 %v1166_v30 }
  0x2d   : > { %1069 = vmatpush3.bf16.msra.mxu1 %v1167_v31 }
  0xab   : > { %v321_v10 = vpop.xlane.xlu0 %320 }
  0xac   : > { %v323_v11 = vmul.f32 0.0078125, %v321_v10 }
  0xae   : > { %v324_v12 = vsub.f32 %v317_v1, %v323_v11 }
  0xb0   : > { %v325_v13 = vmul.f32 %v324_v12, %v324_v12 }
  0xb2   : > { %326 = vadd.xlane.f32.xlu0 %v325_v13 }
 0x13f   : > { %v327_v32 = vpop.xlane.xlu0 %326 }
 0x140   : > { %v328_v33 = vmul.f32 0.0078125, %v327_v32 }
 0x142   : > { %v329_v34 = vadd.f32 1e-05, %v328_v33 }
 0x144   : > { %1168 = vrsqrt.f32 %v329_v34 }
 0x14e   : > { %v1169_v35 = vpop.eup %1168 }
 0x14f   : > { %v331_v37 = vmul.f32 %v1169_v35, %v324_v12 }
 0x151   : > { %v338_v39 = vmul.f32 %v993_v36, %v331_v37 }
 0x153   : > { %v345_v40 = vadd.f32 %v994_v38, %v338_v39 }
 0x155   : > { %v346_v41 = vpack.c.bf16 %v345_v40, %v345_v40 }
 0x157   : > { %557 = vmatmul.mubr.bf16.vlgmr.msra.gmra.mrb[0].mxu0 %v346_v41  ;;  %1071 = vmatmul.mubr.bf16.vlgmr.msra.gmra.mrb[0].mxu1 %v346_v41 }
 0x22a   : > { %v558_v51 = vpop.f32.mrb[0].mxu0  ;;  %v599_v52 = vpop.f32.mrb[0].mxu1 }
 0x22b   : > { %v559_v53 = vadd.f32 %v558_v51, %v384_v48  ;;  %v600_v54 = vadd.f32 %v599_v52, %v392_v49  ;;  %v560_v55 = vpop.f32.mrb[1].mxu0  ;;  %v1072_v56 = vpop.f32.mrb[1].mxu1 }
 0x22c   : > { %v561_v57 = vadd.f32 %v560_v55, %v388_v50  ;;  %v562_v58 = vpop.f32.mrb[2].mxu0  ;;  %v602_v59 = vpop.f32.mrb[2].mxu1 }
 0x22d   : > { %v605_v60 = vmul.f32 0.17677669, %v559_v53  ;;  %v611_v61 = vpack.c.bf16 %v600_v54, %v600_v54  ;;  %v563_v62 = vpop.f32.mrb[3].mxu0  ;;  %v1073_v63 = vpop.f32.mrb[3].mxu1 }
 0x22e   : > { %v609_v0 = vpack.c.bf16 %v561_v57, %v561_v57 }
 0x22f   : > { %v606_v1 = vpack.c.bf16 %v605_v60, %v605_v60  ;;  %647 = vrot.lane.b32.xlu1 %v611_v61, %s1229_s24  ;;  %632 = vrot.lane.b32.xlu0 %v611_v61, %s1230_s21  ;;  %612 = vst.msk [vmem:[%s1420_s22] sm:$0xf] %vm607_vm1, %v611_v61 }
 0x230   : > { %610 = vst.msk [vmem:[%s1424_s23] sm:$0xf] %vm607_vm1, %v609_v0 }
 0x231   : > { %608 = vst.msk [vmem:[%s1428_s10] sm:$0xf] %vm607_vm1, %v606_v1 }
 0x233   : > { %624 = vrot.lane.b32.xlu1 %v609_v0, %s1230_s21 }
 0x237   : > { %642 = vrot.lane.b32.xlu1 %v609_v0, %s1229_s24 }
 0x238   : > { %v701_v11 = vld [vmem:[%s1428_s10] sm:$0xf] (%p1318_p5) }
 0x239   : > { %702 = vst [vmem:[%s685_s19] sm:$0xf] (%p1318_p5), %v701_v11 }
 0x23b   : > { %657 = vrot.lane.b32.xlu1 %v609_v0, %s1231_s11 }
 0x23f   : > { %616 = vrot.lane.b32.xlu1 %v606_v1, %s1230_s21 }
 0x243   : > { %637 = vrot.lane.b32.xlu1 %v606_v1, %s1229_s24 }
 0x247   : > { %652 = vrot.lane.b32.xlu1 %v606_v1, %s1231_s11 }
 0x24b   : > { %662 = vrot.lane.b32.xlu1 %v611_v61, %s1231_s11 }
 0x2a1   : > { %v648_v2 = vpop.permute.xlu1 %647  ;;  %v633_v3 = vpop.permute.xlu0 %632 }
 0x2a2   : > { %1027 = vst.msk [vmem:[%s1420_s22 + $0x8] sm:$0xf] %vm607_vm1, %v648_v2  ;;  %1024 = vst.msk [vmem:[%s1420_s22 + $0x4] sm:$0xf] %vm607_vm1, %v633_v3 }
 0x2a5   : > { %v625_v4 = vpop.permute.xlu1 %624 }
 0x2a6   : > { %1022 = vst.msk [vmem:[%s1424_s23 + $0x4] sm:$0xf] %vm607_vm1, %v625_v4 }
 0x2a9   : > { %v643_v5 = vpop.permute.xlu1 %642 }
 0x2aa   : > { %1026 = vst.msk [vmem:[%s1424_s23 + $0x8] sm:$0xf] %vm607_vm1, %v643_v5 }
 0x2ad   : > { %v658_v6 = vpop.permute.xlu1 %657 }
 0x2ae   : > { %1029 = vst.msk [vmem:[%s1424_s23 + $0xc] sm:$0xf] %vm607_vm1, %v658_v6 }
 0x2b1   : > { %v617_v7 = vpop.permute.xlu1 %616 }
 0x2b2   : > { %1020 = vst.msk [vmem:[%s1428_s10 + $0x4] sm:$0xf] %vm607_vm1, %v617_v7 }
 0x2b5   : > { %v638_v8 = vpop.permute.xlu1 %637 }
 0x2b6   : > { %1025 = vst.msk [vmem:[%s1428_s10 + $0x8] sm:$0xf] %vm607_vm1, %v638_v8 }
 0x2b8   : > { %681 = sbr.rel (!%p1318_p5) target bundleno = 707 (0x2c3), region = 44 }
 0x2b9   : > { %v653_v9 = vpop.permute.xlu1 %652  ;;  %v703_v12 = vld [vmem:[%s1428_s10 + $0x4] sm:$0xf] (%p1318_p5) }
 0x2ba   : > { %1028 = vst.msk [vmem:[%s1428_s10 + $0xc] sm:$0xf] %vm607_vm1, %v653_v9  ;;  %704 = vst [vmem:[%s685_s19 + $0x8] sm:$0xf] (%p1318_p5), %v703_v12 }
 0x2bd   : > { %v663_v10 = vpop.permute.xlu1 %662  ;;  %v705_v13 = vld [vmem:[%s1428_s10 + $0x8] sm:$0xf] (%p1318_p5) }
 0x2be   : > { %1030 = vst.msk [vmem:[%s1420_s22 + $0xc] sm:$0xf] %vm607_vm1, %v663_v10  ;;  %706 = vst [vmem:[%s685_s19 + $0x10] sm:$0xf] (%p1318_p5), %v705_v13 }
 0x2c1   : > { %v707_v14 = vld [vmem:[%s1428_s10 + $0xc] sm:$0xf] }
 0x2c2   : > { %708 = vst [vmem:[%s685_s19 + $0x18] sm:$0xf] %v707_v14 }
 0x2c3 PF: > { %739 = sbr.rel (!%p1318_p5) target bundleno = 714 (0x2ca), region = 85  ;;  %s1036_s20 = sshll.u32 (%p1318_p5), %s1212_s27, 3  ;;  %v759_v15 = vld [vmem:[%s1424_s23] sm:$0xf] (%p1318_p5)  ;;  %v761_v16 = vld [vmem:[%s1424_s23 + $0x4] sm:$0xf] (%p1318_p5) }
 0x2c4   : > { %s741_s24 = sadd.s32 (%p1318_p5), %s1208_s26, %s1036_s20  ;;  %v763_v17 = vld [vmem:[%s1424_s23 + $0x8] sm:$0xf] (%p1318_p5)  ;;  %v765_v18 = vld [vmem:[%s1424_s23 + $0xc] sm:$0xf] (%p1318_p5) }
 0x2c5   : > { %s1037_s21 = sshll.u32 (%p1318_p5), %s741_s24, 2 }
 0x2c6   : > { %s743_s13 = scalar_lea.vmem (%p1318_p5), %s1510_s6, %s1037_s21 }
 0x2c7   : > { %760 = vst [vmem:[%s743_s13] sm:$0xf] (%p1318_p5), %v759_v15  ;;  %762 = vst [vmem:[%s743_s13 + $0x8] sm:$0xf] (%p1318_p5), %v761_v16 }
 0x2c8   : > { %764 = vst [vmem:[%s743_s13 + $0x10] sm:$0xf] (%p1318_p5), %v763_v17  ;;  %766 = vst [vmem:[%s743_s13 + $0x18] sm:$0xf] (%p1318_p5), %v765_v18 }
 0x2ca PF: > { %797 = sbr.rel (!%p1318_p5) target bundleno = 721 (0x2d1), region = 126  ;;  %s1038_s23 = sshll.u32 (%p1318_p5), %s1212_s27, 3  ;;  %v817_v19 = vld [vmem:[%s1420_s22] sm:$0xf] (%p1318_p5)  ;;  %v819_v20 = vld [vmem:[%s1420_s22 + $0x4] sm:$0xf] (%p1318_p5) }
 0x2cb   : > { %s799_s14 = sadd.s32 (%p1318_p5), %s1208_s26, %s1038_s23  ;;  %v821_v21 = vld [vmem:[%s1420_s22 + $0x8] sm:$0xf] (%p1318_p5)  ;;  %v823_v22 = vld [vmem:[%s1420_s22 + $0xc] sm:$0xf] (%p1318_p5) }
 0x2cc   : > { %s1039_s15 = sshll.u32 (%p1318_p5), %s799_s14, 2 }
 0x2cd   : > { %s801_s19 = scalar_lea.vmem (%p1318_p5), %s1511_s7, %s1039_s15 }
 0x2ce   : > { %818 = vst [vmem:[%s801_s19] sm:$0xf] (%p1318_p5), %v817_v19  ;;  %820 = vst [vmem:[%s801_s19 + $0x8] sm:$0xf] (%p1318_p5), %v819_v20 }
 0x2cf   : > { %822 = vst [vmem:[%s801_s19 + $0x10] sm:$0xf] (%p1318_p5), %v821_v21  ;;  %824 = vst [vmem:[%s801_s19 + $0x18] sm:$0xf] (%p1318_p5), %v823_v22 }
 0x2d1 PF: > { %s18_s30 = sadd.s32 1, %s1224_s30   ;;  %s1513_s24 = smov %s1204_s25 }
 0x2d2   : > { %p15_p11 = scmp.ge.s32.totalorder %s18_s30, 6   ;;  %s1514_s25 = smov %s1329_s16 }
 0x2d3   : > { %s1515_s26 = smov %s1216_s28  ;;  %s1516_s27 = smov %s1220_s29 }
 0x2d4   : > { %s1517_s28 = smov %s1520_s8  ;;  %s1518_s29 = smov %s1524_s9 }
 0x2d5   :  { %17 = sbr.rel (!%p15_p11) target bundleno = 4 (0x4), region = 226 }

// kernel: gpt2_forward.8
= control target key start
LH: loop header
LB: loop body
LE: loop exit
PB: predicated region body
PF: predicated region fallthrough
CT: control target
= control target key end

     0   :  { %s2217_s0 = inlined_call_operand.vmem [shape: bf16[2,16,128], index: 0, kind: input, shape index: {}, may-alias: {0,12}]   ;;  %s2218_s1 = inlined_call_operand.vmem [shape: bf16[2,4,16,32], index: 1, kind: input, shape index: {}]   ;;  %s2219_s2 = inlined_call_operand.vmem [shape: bf16[128,128], index: 2, kind: input, shape index: {}]   ;;  %s2220_s3 = inlined_call_operand.vmem [shape: f32[1,128], index: 3, kind: input, shape index: {}]   ;;  %s2221_s4 = inlined_call_operand.vmem [shape: f32[1,128], index: 4, kind: input, shape index: {}]   ;;  %s2222_s5 = inlined_call_operand.vmem [shape: f32[1,128], index: 5, kind: input, shape index: {}]   ;;  %s2223_s6 = inlined_call_operand.vmem [shape: bf16[128,512], index: 6, kind: input, shape index: {}]   ;;  %s2224_s7 = inlined_call_operand.vmem [shape: f32[1,512], index: 7, kind: input, shape index: {}]   ;;  %s2225_s8 = inlined_call_operand.vmem [shape: bf16[512,128], index: 8, kind: input, shape index: {}]   ;;  %s2226_s9 = inlined_call_operand.vmem [shape: f32[1,128], index: 9, kind: input, shape index: {}]   ;;  %s2227_s10 = inlined_call_operand.vmem [shape: f32[1,128], index: 10, kind: input, shape index: {}]   ;;  %s2228_s11 = inlined_call_operand.vmem [shape: f32[1,128], index: 11, kind: input, shape index: {}]   ;;  %s2229_s12 = inlined_call_operand.vmem [shape: bf16[2,16,128], index: 12, kind: output, shape index: {}, may-alias: {0,12}]  }
   0x1   :  { %2233 = sst [smem:[#allocation10_spill]] %s2217_s0 }
   0x2   :  { %2234 = sst [smem:[#allocation11_spill]] %s2218_s1 }
   0x3   :  { %2235 = sst [smem:[#allocation12_spill]] %s2220_s3 }
   0x4   :  { %2236 = sst [smem:[#allocation13_spill]] %s2221_s4 }
   0x5   :  { %2237 = sst [smem:[#allocation14_spill]] %s2222_s5 }
   0x6   :  { %2238 = sst [smem:[#allocation15_spill]] %s2226_s9 }
   0x7   :  { %s1929_s21 = smov 0   ;;  %s1931_s22 = smov 0  }
   0x8   :  { %s1933_s23 = smov 0   ;;  %s1935_s24 = smov 0  }
   0x9   :  { %s1937_s25 = smov 0   ;;  %s1939_s26 = smov 0  }
   0xa   :  { %s1941_s27 = smov 0   ;;  %s1943_s10 = smov 0  }
   0xb   :  { %s1945_s11 = smov 0   ;;  %s1947_s28 = smov 0  }
   0xc   :  { %s1949_s29 = smov 0  }
   0xd LB: > { %s34_s30 = sadd.s32 1, %s1847_s10  ;;  %s37_s13 = sadd.s32 1, %s1851_s11  ;;  %s1859_s29 = sphi %s1949_s29, %s22_s29   ;;  %s1855_s28 = sphi %s1947_s28, %s2264_s28   ;;  %s1851_s11 = sphi %s1945_s11, %s2263_s11   ;;  %s1847_s10 = sphi %s1943_s10, %s2262_s10   ;;  %s1843_s27 = sphi %s1941_s27, %s2261_s27   ;;  %s1839_s26 = sphi %s1939_s26, %s2260_s26   ;;  %s1835_s25 = sphi %s1937_s25, %s2259_s25   ;;  %s1831_s24 = sphi %s1935_s24, %s2258_s24   ;;  %s1827_s23 = sphi %s1933_s23, %s2257_s23   ;;  %s1823_s22 = sphi %s1931_s22, %s2256_s22   ;;  %s1819_s21 = sphi %s1929_s21, %s2255_s21  }
   0xe   : > { %p35_p0 = scmp.ge.s32.totalorder %s34_s30, 2  ;;  %s41_s14 = sadd.s32 1, %s1855_s28 }
   0xf   : > { %p85_p1 = scmp.ne.s32.totalorder %s1831_s24, %s1827_s23  ;;  %p86_p2 = scmp.eq.s32.totalorder %s1859_s29, 0 }
  0x10   : > { %s2266_s30 = smov (%p35_p0, %s34_s30), 0  ;;  %s2268_s13 = smov (!%p35_p0, %s37_s13), %s1851_s11 }
  0x11   : > { %2239 = sst [smem:[#allocation6_spill]] %s2266_s30  ;;  %s185_s15 = ssub.s32 %s1847_s10, %s2266_s30 }
  0x12   : > { %p39_p3 = scmp.ge.s32.totalorder %s2268_s13, 2  ;;  %p186_p4 = scmp.eq.s32.totalorder %s185_s15, 0 }
  0x13   : > { %p1997_p5 = por %p86_p2, %p85_p1  ;;  %s188_s17 = sadd.s32 1, %s1823_s22 }
  0x14   : > { %s2270_s13 = smov (%p39_p3, %s2268_s13), 0  ;;  %s2272_s14 = smov (!%p39_p3, %s41_s14), %s1855_s28 }
  0x15   : > { %2241 = sst [smem:[#allocation7_spill]] %s2270_s13  ;;  %p195_p6 = scmp.ne.s32.totalorder %s1823_s22, %s1819_s21 }
  0x16   : > { %p43_p7 = scmp.ge.s32.totalorder %s2272_s14, 2  ;;  %s74_s18 = ssub.s32 %s1851_s11, %s2270_s13 }
  0x17   : > { %s2010_s19 = scalar_select %p186_p4, %s1823_s22, %s188_s17  }
  0x18   : > { %s2274_s14 = smov (%p43_p7, %s2272_s14), 0  ;;  %p2016_p8 = por %p195_p6, %p86_p2 }
  0x19   : > { %2242 = sst [smem:[#allocation8_spill]] %s2010_s19  ;;  %s73_s15 = ssub.s32 %s1855_s28, %s2274_s14 }
  0x1a   : > { %2243 = sst [smem:[#allocation9_spill]] %s2274_s14  ;;  %s75_s30 = sor.u32 %s74_s18, %s73_s15 }
  0x1b   : > { %s78_s5 = sadd.s32 1, %s1831_s24  ;;  %p76_p9 = scmp.eq.s32.totalorder %s75_s30, 0 }
  0x1c   : > { %p1489_p10 = scmp.ge.s32.totalorder %s1859_s29, 8 }
  0x1d   : > { %s2024_s4 = scalar_select %p76_p9, %s1831_s24, %s78_s5  }
  0x1e   : > { %385 = sbr.rel (%p1489_p10) target bundleno = 61 (0x3d), region = 44 }
  0x25   : > { %399 = sbr.rel (!%p1997_p5) target bundleno = 49 (0x31), region = 52  ;;  %s401_s17 = sand.u32 (%p1997_p5), 1, %s1831_s24  }
  0x26   : > { %s1491_s13 = sshll.u32 (%p1997_p5), %s1855_s28, 3  ;;  %s1490_s19 = sshll.u32 (%p1997_p5), %s401_s17, 4 }
  0x27   : > { %s405_s9 = sadd.s32 (%p1997_p5), %s1851_s11, %s1491_s13  ;;  %s2245_s1 = sld [smem:[#allocation11_spill]] (%p1997_p5) }
  0x28   : > { %s1492_s3 = sshll.u32 (%p1997_p5), %s405_s9, 2  ;;  %s403_s5 = scalar_lea.vmem (%p1997_p5), [#allocation4], %s1490_s19 }
  0x2d   : > { %s407_s30 = scalar_lea.vmem %s2245_s1, %s1492_s3 }
  0x2e   : > { %v423_v0 = vld [vmem:[%s407_s30] sm:$0xf]  ;;  %v425_v1 = vld [vmem:[%s407_s30 + $0x8] sm:$0xf]  ;;  %v427_v2 = vld [vmem:[%s407_s30 + $0x10] sm:$0xf] }
  0x2f   : > { %424 = vst [vmem:[%s403_s5] sm:$0xf] %v423_v0  ;;  %426 = vst [vmem:[%s403_s5 + $0x4] sm:$0xf] %v425_v1  ;;  %v429_v3 = vld [vmem:[%s407_s30 + $0x18] sm:$0xf] }
  0x30   : > { %428 = vst [vmem:[%s403_s5 + $0x8] sm:$0xf] %v427_v2  ;;  %430 = vst [vmem:[%s403_s5 + $0xc] sm:$0xf] %v429_v3 }
  0x31 PF: > { %461 = sbr.rel (!%p2016_p8) target bundleno = 61 (0x3d), region = 93  ;;  %s463_s9 = sand.u32 (%p2016_p8), 1, %s1823_s22  }
  0x32   : > { %s1561_s13 = sshll.u32 (%p2016_p8), %s1847_s10, 3  ;;  %s1493_s16 = sshll.u32 (%p2016_p8), %s463_s9, 7 }
  0x33   : > { %s2042_s15 = scalar_lea.vmem (%p2016_p8), %s2223_s6, %s1561_s13  ;;  %s465_s19 = scalar_lea.vmem (%p2016_p8), [#allocation5], %s1493_s16 }
  0x34   : > { %v526_v4 = vld [vmem:[%s2042_s15] sm:$0xff] (%p2016_p8)  ;;  %v528_v5 = vld [vmem:[%s2042_s15 + $0x10] sm:$0xff] (%p2016_p8) }
  0x35   : > { %v530_v6 = vld [vmem:[%s2042_s15 + $0x20] sm:$0xff] (%p2016_p8)  ;;  %527 = vst [vmem:[%s465_s19] sm:$0xff] (%p2016_p8), %v526_v4  ;;  %529 = vst [vmem:[%s465_s19 + $0x8] sm:$0xff] (%p2016_p8), %v528_v5  ;;  %v532_v7 = vld [vmem:[%s2042_s15 + $0x30] sm:$0xff] (%p2016_p8) }
  0x36   : > { %531 = vst [vmem:[%s465_s19 + $0x10] sm:$0xff] (%p2016_p8), %v530_v6  ;;  %v534_v8 = vld [vmem:[%s2042_s15 + $0x40] sm:$0xff] (%p2016_p8)  ;;  %v536_v9 = vld [vmem:[%s2042_s15 + $0x50] sm:$0xff] (%p2016_p8)  ;;  %533 = vst [vmem:[%s465_s19 + $0x18] sm:$0xff] (%p2016_p8), %v532_v7 }
  0x37   : > { %535 = vst [vmem:[%s465_s19 + $0x20] sm:$0xff] (%p2016_p8), %v534_v8  ;;  %537 = vst [vmem:[%s465_s19 + $0x28] sm:$0xff] (%p2016_p8), %v536_v9  ;;  %v538_v10 = vld [vmem:[%s2042_s15 + $0x60] sm:$0xff] (%p2016_p8)  ;;  %v540_v11 = vld [vmem:[%s2042_s15 + $0x70] sm:$0xff] (%p2016_p8) }
  0x38   : > { %v542_v12 = vld [vmem:[%s2042_s15 + $0x80] sm:$0xff]  ;;  %539 = vst [vmem:[%s465_s19 + $0x30] sm:$0xff] %v538_v10  ;;  %541 = vst [vmem:[%s465_s19 + $0x38] sm:$0xff] %v540_v11  ;;  %v544_v13 = vld [vmem:[%s2042_s15 + $0x90] sm:$0xff] }
  0x39   : > { %543 = vst [vmem:[%s465_s19 + $0x40] sm:$0xff] %v542_v12  ;;  %v546_v14 = vld [vmem:[%s2042_s15 + $0xa0] sm:$0xff]  ;;  %v548_v15 = vld [vmem:[%s2042_s15 + $0xb0] sm:$0xff]  ;;  %545 = vst [vmem:[%s465_s19 + $0x48] sm:$0xff] %v544_v13 }
  0x3a   : > { %547 = vst [vmem:[%s465_s19 + $0x50] sm:$0xff] %v546_v14  ;;  %549 = vst [vmem:[%s465_s19 + $0x58] sm:$0xff] %v548_v15  ;;  %v550_v16 = vld [vmem:[%s2042_s15 + $0xc0] sm:$0xff]  ;;  %v552_v17 = vld [vmem:[%s2042_s15 + $0xd0] sm:$0xff] }
  0x3b   : > { %v554_v18 = vld [vmem:[%s2042_s15 + $0xe0] sm:$0xff]  ;;  %551 = vst [vmem:[%s465_s19 + $0x60] sm:$0xff] %v550_v16  ;;  %553 = vst [vmem:[%s465_s19 + $0x68] sm:$0xff] %v552_v17  ;;  %v556_v19 = vld [vmem:[%s2042_s15 + $0xf0] sm:$0xff] }
  0x3c   : > { %555 = vst [vmem:[%s465_s19 + $0x70] sm:$0xff] %v554_v18  ;;  %557 = vst [vmem:[%s465_s19 + $0x78] sm:$0xff] %v556_v19 }
  0x3d PF: > { %p1496_p11 = scmp.ge.s32.totalorder %s1859_s29, 1  ;;  %p579_p12 = scmp.lt.s32.totalorder %s1859_s29, 9 }
  0x3f   : > { %p580_p13 = pnand %p1496_p11, %p579_p12 }
  0x40   : > { %s586_s20 = sand.u32 (!%p580_p13), 1, %s1827_s23   ;;  %s593_s17 = sand.u32 (!%p580_p13), 1, %s1819_s21  }
  0x41   : > { %583 = sbr.rel (%p580_p13) target bundleno = 1128 (0x468), region = 139  ;;  %s1497_s18 = sshll.u32 (!%p580_p13), %s586_s20, 4 }
  0x42   : > { %s1498_s30 = sshll.u32 (!%p580_p13), %s593_s17, 7  ;;  %p658_p0 = scmp.lt.s32.totalorder (!%p580_p13), %s1843_s27, 1 }
  0x43   : > { %p660_p1 = scmp.lt.s32.totalorder (!%p580_p13), %s1839_s26, 1  ;;  %s1501_s5 = sshll.u32 (!%p580_p13), %s1835_s25, 1 }
  0x44   : > { %s1502_s9 = sshll.u32 (!%p580_p13), %s1835_s25, 5  ;;  %p668_p2 = scmp.lt.s32.totalorder (!%p580_p13), %s1501_s5, 3 }
  0x45   : > { %p673_p3 = scmp.lt.s32.totalorder (!%p580_p13), %s1502_s9, 63  ;;  %s2246_s0 = sld [smem:[#allocation10_spill]] (!%p580_p13) }
  0x46   : > { %s2091_s15 = scalar_lea.vmem (!%p580_p13), [#allocation4], %s1497_s18  ;;  %p1506_p4 = scmp.ne.s32.totalorder (!%p580_p13), %s1835_s25, 0 }
  0x48   : > { %s2276_s27 = smov (!%p658_p0, %s1843_s27), 1  ;;  %s2278_s26 = smov (!%p660_p1, %s1839_s26), 1 }
  0x49   : > { %s1499_s13 = sshll.u32 %s2276_s27, 1  ;;  %s2280_s5 = smov (!%p668_p2, %s1501_s5), 3  ;;  %v1719_v20 = vld [vmem:[%s2219_s2 + $0x10] sm:$0xff] (!%p1506_p4)   ;;  %v1861_v21 = vmov (!%p1506_p4), 0.0   ;;  %v1720_v22 = vld [vmem:[%s2219_s2] sm:$0xff] (!%p1506_p4)   ;;  %v1721_v23 = vld [vmem:[%s2219_s2 + $0x18] sm:$0xff] (!%p1506_p4)  }
  0x4a   : > { %s663_s16 = sadd.s32 %s1499_s13, %s2278_s26  ;;  %s2282_s9 = smov (!%p673_p3, %s1502_s9), 63  ;;  %1596 = vmatprep.subr.bf16.mxu0 (!%p1506_p4), %v1861_v21  ;;  %1604 = vmatprep.subr.bf16.mxu1 (!%p1506_p4), %v1861_v21  ;;  %vm1862_vm0 = vmmov (!%p1506_p4), 0   ;;  %v1722_v24 = vld [vmem:[%s2219_s2 + $0x8] sm:$0xff] (!%p1506_p4)   ;;  %v1507_v25 = vld [vmem:[%s2091_s15 + $0x4] sm:$0xf] (!%p1506_p4)  ;;  %vm716_vm1 = vcmask (!%p1506_p4), 261120  }
  0x4b   : > { %s1500_s14 = sshll.u32 %s663_s16, 2  ;;  %s670_s26 = scalar_lea.vmem %s2224_s7, %s2280_s5  ;;  %1597 = vmatpush3.bf16.msra.mxu0 (!%p1506_p4), %v1719_v20  ;;  %1600 = vmatprep.mubr.msk.bf16.mxu0 (!%p1506_p4), %vm1862_vm0, %v1861_v21  ;;  %v693_v26 = vld [vmem:[%s2091_s15] sm:$0xf] (!%p1506_p4)  ;;  %v1723_v27 = vld [vmem:[%s2219_s2 + $0x20] sm:$0xff] (!%p1506_p4)   ;;  %v1724_v28 = vld [vmem:[%s2219_s2 + $0x30] sm:$0xff] (!%p1506_p4)  }
  0x4c   : > { %s2073_s19 = scalar_lea.vmem %s2246_s0, %s1500_s14  ;;  %s2078_s20 = scalar_lea.vmem %s2229_s12, %s1500_s14  ;;  %1605 = vmatpush3.bf16.msra.mxu1 (!%p1506_p4), %v1720_v22  ;;  %1598 = vmatprep.subr.bf16.mxu0 (!%p1506_p4), %v1861_v21  ;;  %v1725_v29 = vld [vmem:[%s2219_s2 + $0x28] sm:$0xff] (!%p1506_p4)   ;;  %v1726_v30 = vld [vmem:[%s2219_s2 + $0x38] sm:$0xff] (!%p1506_p4)   ;;  %v1514_v31 = vld [vmem:[%s2091_s15 + $0x8] sm:$0xf] (!%p1506_p4) }
  0x4d   : > { %s1503_s13 = sshll.u32 %s2282_s9, 2  ;;  %s2093_s0 = scalar_lea.vmem [#allocation5], %s1498_s30  ;;  %1606 = vmatprep.subr.bf16.mxu1 (!%p1506_p4), %v1861_v21  ;;  %1608 = vmatprep.mubr.msk.bf16.mxu1 (!%p1506_p4), %vm1862_vm0, %v1861_v21  ;;  %v1518_v32 = vld [vmem:[%s2091_s15 + $0xc] sm:$0xf] (!%p1506_p4)  ;;  %v691_v43 = vld [vmem:[%s2073_s19] sm:$0xf] (!%p1506_p4) }
  0x4e   : > { %s2089_s3 = scalar_lea.vmem %s2225_s8, %s1503_s13  ;;  %690 = sbr.rel (%p1506_p4) target bundleno = 624 (0x270), region = 151  ;;  %v692_v53 = vunpack.c.l.bf16 (!%p1506_p4), %v691_v43 }
  0x4f   : > { %1599 = vmatpush3.bf16.msra.mxu0 (!%p1506_p4), %v1721_v23  ;;  %s2247_s21 = sld [smem:[#allocation12_spill]] (!%p1506_p4)  ;;  %s2248_s13 = sld [smem:[#allocation15_spill]] (!%p1506_p4) }
  0x50   : > { %1607 = vmatpush3.bf16.msra.mxu1 (!%p1506_p4), %v1722_v24  ;;  %1612 = vmatprep.subr.bf16.mxu0 (!%p1506_p4), %v1861_v21  ;;  %s2249_s14 = sld [smem:[#allocation13_spill]] (!%p1506_p4)  ;;  %s2250_s1 = sld [smem:[#allocation14_spill]] (!%p1506_p4) }
  0x51   : > { %1620 = vmatprep.subr.bf16.mxu1 (!%p1506_p4), %v1861_v21 }
  0x52   : > { %1601 = vmatmul.mubr.msk.bf16.vlgmr.msra.gmra.mrb[0].mxu0 (!%p1506_p4), %vm716_vm1, %v1507_v25 }
  0x53   : > { %1609 = vmatmul.mubr.msk.bf16.vlgmr.msra.gmra.mrb[0].mxu1 (!%p1506_p4), %vm716_vm1, %v693_v26  ;;  %1613 = vmatpush3.bf16.msra.mxu0 (!%p1506_p4), %v1723_v27 }
  0x54   : > { %1621 = vmatpush3.bf16.msra.mxu1 (!%p1506_p4), %v1724_v28  ;;  %1614 = vmatprep.subr.bf16.mxu0 (!%p1506_p4), %v1861_v21 }
  0x55   : > { %1622 = vmatprep.subr.bf16.mxu1 %v1861_v21  ;;  %1616 = vmatprep.mubr.msk.bf16.mxu0 %vm1862_vm0, %v1861_v21  ;;  %v1522_v47 = vld [vmem:[%s2247_s21] ss:$0 sm:$0xff] }
  0x56   : > { %1624 = vmatprep.mubr.msk.bf16.mxu1 %vm1862_vm0, %v1861_v21  ;;  %v1525_v56 = vld [vmem:[%s2248_s13] ss:$0 sm:$0xff] }
  0x57   : > { %1615 = vmatpush3.bf16.msra.mxu0 %v1725_v29  ;;  %v1523_v3 = vld [vmem:[%s2249_s14] ss:$0 sm:$0xff] }
  0x58   : > { %1623 = vmatpush3.bf16.msra.mxu1 %v1726_v30  ;;  %v1524_v5 = vld [vmem:[%s2250_s1] ss:$0 sm:$0xff] }
  0x5a   : > { %1617 = vmatmul.mubr.msk.bf16.vlgmr.msra.gmra.mrb[4].mxu0 %vm716_vm1, %v1514_v31 }
  0x5b   : > { %1625 = vmatmul.mubr.msk.bf16.vlgmr.msra.gmra.mrb[4].mxu1 %vm716_vm1, %v1518_v32 }
 0x125   : > { %v754_v33 = vpop.f32.mrb[0].mxu0 }
 0x126   : > { %v809_v34 = vpop.f32.mrb[0].mxu1  ;;  %v1602_v35 = vpop.f32.mrb[1].mxu0 }
 0x127   : > { %v810_v36 = vadd.f32 %v809_v34, %v754_v33  ;;  %v1610_v37 = vpop.f32.mrb[1].mxu1  ;;  %v757_v38 = vpop.f32.mrb[2].mxu0 }
 0x128   : > { %v812_v39 = vpop.f32.mrb[2].mxu1  ;;  %v1603_v40 = vpop.f32.mrb[3].mxu0 }
 0x129   : > { %v1611_v41 = vpop.f32.mrb[3].mxu1 }
 0x12d   : > { %v870_v42 = vpop.f32.mrb[4].mxu0 }
 0x12e   : > { %v876_v44 = vadd.f32 %v870_v42, %v810_v36  ;;  %v932_v45 = vpop.f32.mrb[4].mxu1  ;;  %v1618_v46 = vpop.f32.mrb[5].mxu0 }
 0x12f   : > { %v1626_v48 = vpop.f32.mrb[5].mxu1  ;;  %v873_v49 = vpop.f32.mrb[6].mxu0 }
 0x130   : > { %v938_v50 = vadd.f32 %v932_v45, %v876_v44  ;;  %v935_v51 = vpop.f32.mrb[6].mxu1  ;;  %v1619_v52 = vpop.f32.mrb[7].mxu0 }
 0x131   : > { %v1627_v54 = vpop.f32.mrb[7].mxu1 }
 0x132   : > { %v946_v55 = vadd.f32 %v1522_v47, %v938_v50 }
 0x134   : > { %v947_v57 = vadd.f32 %v946_v55, %v692_v53 }
 0x136   : > { %950 = vadd.xlane.f32.xlu0 %v947_v57  ;;  %v985_v58 = vadd.f32 %v1525_v56, %v947_v57 }
 0x138   : > { %986 = vst [vmem:[#allocation3] sm:$0xff] %v985_v58 }
 0x1c3   : > { %v951_v59 = vpop.xlane.xlu0 %950 }
 0x1c4   : > { %v953_v60 = vmul.f32 0.0078125, %v951_v59 }
 0x1c6   : > { %v954_v61 = vsub.f32 %v947_v57, %v953_v60 }
 0x1c8   : > { %v955_v62 = vmul.f32 %v954_v61, %v954_v61 }
 0x1ca   : > { %956 = vadd.xlane.f32.xlu0 %v955_v62 }
 0x257   : > { %v957_v63 = vpop.xlane.xlu0 %956 }
 0x258   : > { %v958_v0 = vmul.f32 0.0078125, %v957_v63 }
 0x25a   : > { %v959_v1 = vadd.f32 1e-05, %v958_v0 }
 0x25c   : > { %1727 = vrsqrt.f32 %v959_v1 }
 0x266   : > { %v1728_v2 = vpop.eup %1727 }
 0x267   : > { %v961_v4 = vmul.f32 %v1728_v2, %v954_v61 }
 0x269   : > { %v968_v6 = vmul.f32 %v1523_v3, %v961_v4 }
 0x26b   : > { %v975_v7 = vadd.f32 %v1524_v5, %v968_v6 }
 0x26d   : > { %v976_v8 = vpack.c.bf16 %v975_v7, %v975_v7 }
 0x26f   : > { %977 = vst [vmem:[#allocation2] sm:$0xf] %v976_v8 }
 0x270 PF: > { %v1729_v9 = vld [vmem:[%s2093_s0 + $0x4] ss:$8 sps:$4 sm:$0xff]   ;;  %v1731_v10 = vld [vmem:[%s2093_s0] ss:$8 sps:$4 sm:$0xff]   ;;  %v1863_v11 = vmov 0   ;;  %v1753_v27 = vld [vmem:[%s2089_s3 + $0x40] sm:$0xff]   ;;  %v1006_v43 = vlaneseq }
 0x271   : > { %1128 = vmatprep.mubr.bf16.mxu0 %v1863_v11  ;;  %1096 = vmatprep.subr.bf16.mxu0 %v1729_v9  ;;  %v1732_v12 = vld [vmem:[%s2093_s0 + $0x14] ss:$8 sps:$4 sm:$0xff]   ;;  %v1734_v13 = vld [vmem:[%s2093_s0 + $0x10] ss:$8 sps:$4 sm:$0xff]   ;;  %v1735_v14 = vld [vmem:[%s2093_s0 + $0x24] ss:$8 sps:$4 sm:$0xff]  }
 0x272   : > { %1097 = vmatpush1.bf16.msra.mxu0 %v1731_v10  ;;  %v1737_v15 = vld [vmem:[%s2093_s0 + $0x20] ss:$8 sps:$4 sm:$0xff]   ;;  %v1738_v16 = vld [vmem:[%s2093_s0 + $0x34] ss:$8 sps:$4 sm:$0xff]   ;;  %v1740_v17 = vld [vmem:[%s2093_s0 + $0x30] ss:$8 sps:$4 sm:$0xff]   ;;  %1574 = vmatprep.subr.bf16.mxu1 %v1753_v27 }
 0x273   : > { %1098 = vmatprep.subr.bf16.mxu0 %v1732_v12  ;;  %v1741_v18 = vld [vmem:[%s2093_s0 + $0x44] ss:$8 sps:$4 sm:$0xff]   ;;  %v1743_v19 = vld [vmem:[%s2093_s0 + $0x40] ss:$8 sps:$4 sm:$0xff]   ;;  %v1744_v20 = vld [vmem:[%s2093_s0 + $0x54] ss:$8 sps:$4 sm:$0xff]  }
 0x274   : > { %v1746_v21 = vld [vmem:[%s2093_s0 + $0x50] ss:$8 sps:$4 sm:$0xff]   ;;  %v1747_v22 = vld [vmem:[%s2093_s0 + $0x64] ss:$8 sps:$4 sm:$0xff]   ;;  %v1749_v23 = vld [vmem:[%s2093_s0 + $0x60] ss:$8 sps:$4 sm:$0xff]  }
 0x275   : > { %v1750_v24 = vld [vmem:[%s2093_s0 + $0x74] ss:$8 sps:$4 sm:$0xff]   ;;  %v1752_v25 = vld [vmem:[%s2093_s0 + $0x70] ss:$8 sps:$4 sm:$0xff]   ;;  %v1757_v31 = vld [vmem:[%s2089_s3 + $0x50] sm:$0xff]   ;;  %v1007_v44 = vshrl.u32 %v1006_v43, 7 }
 0x276   : > { %1099 = vmatpush1.bf16.msra.mxu0 %v1734_v13  ;;  %v987_v26 = vld [vmem:[#allocation2] sm:$0xf]  ;;  %v1755_v29 = vld [vmem:[%s2089_s3 + $0x48] sm:$0xff]   ;;  %v1758_v32 = vld [vmem:[%s2089_s3 + $0x10] sm:$0xff]   ;;  %p1558_p5 = scmp.ne.s32.totalorder %s1835_s25, 1 }
 0x277   : > { %1100 = vmatprep.subr.bf16.mxu0 %v1735_v14  ;;  %v1754_v28 = vld [vmem:[%s2089_s3] sm:$0xff]   ;;  %v1756_v30 = vld [vmem:[%s2089_s3 + $0x8] sm:$0xff]   ;;  %v1759_v33 = vld [vmem:[%s2089_s3 + $0x58] sm:$0xff]   ;;  %v1008_v45 = vsub.s32 0, %v1007_v44  ;;  %v1012_v47 = vsub.s32 1, %v1007_v44 }
 0x278   : > { %1575 = vmatpush3.bf16.msra.mxu1 %v1754_v28  ;;  %v1760_v34 = vld [vmem:[%s2089_s3 + $0x18] sm:$0xff]   ;;  %v1761_v35 = vld [vmem:[%s2089_s3 + $0x60] sm:$0xff]   ;;  %v1763_v37 = vld [vmem:[%s2089_s3 + $0x68] sm:$0xff]  }
 0x279   : > { %1576 = vmatprep.subr.bf16.mxu1 %v1755_v29  ;;  %v1762_v36 = vld [vmem:[%s2089_s3 + $0x20] sm:$0xff]   ;;  %v1764_v38 = vld [vmem:[%s2089_s3 + $0x28] sm:$0xff]   ;;  %v1765_v39 = vld [vmem:[%s2089_s3 + $0x70] sm:$0xff]  }
 0x27a   : > { %1101 = vmatpush1.bf16.msra.mxu0 %v1737_v15  ;;  %v1766_v40 = vld [vmem:[%s2089_s3 + $0x30] sm:$0xff]   ;;  %v1767_v41 = vld [vmem:[%s2089_s3 + $0x78] sm:$0xff]   ;;  %v1004_v46 = vld [vmem:[%s670_s26] sm:$0x3] }
 0x27b   : > { %1102 = vmatprep.subr.bf16.mxu0 %v1738_v16  ;;  %v1768_v42 = vld [vmem:[%s2089_s3 + $0x38] sm:$0xff]   ;;  %v1009_v48 = vrot.slane %v1004_v46, %v1008_v45  ;;  %v1013_v49 = vrot.slane %v1004_v46, %v1012_v47  ;;  %v1155_v13 = vld [vmem:[#allocation3] sm:$0xff] }
 0x27c   : > { %1577 = vmatpush3.bf16.msra.mxu1 %v1756_v30 }
 0x27d   : > { %1578 = vmatprep.subr.bf16.mxu1 %v1757_v31 }
 0x27e   : > { %1103 = vmatpush1.bf16.msra.mxu0 %v1740_v17 }
 0x27f   : > { %1104 = vmatprep.subr.bf16.mxu0 %v1741_v18 }
 0x280   : > { %1579 = vmatpush3.bf16.msra.mxu1 %v1758_v32 }
 0x281   : > { %1580 = vmatprep.subr.bf16.mxu1 %v1759_v33 }
 0x282   : > { %1105 = vmatpush1.bf16.msra.mxu0 %v1743_v19 }
 0x283   : > { %1106 = vmatprep.subr.bf16.mxu0 %v1744_v20 }
 0x284   : > { %1581 = vmatpush3.bf16.msra.mxu1 %v1760_v34 }
 0x285   : > { %1582 = vmatprep.subr.bf16.mxu1 %v1761_v35 }
 0x286   : > { %1107 = vmatpush1.bf16.msra.mxu0 %v1746_v21 }
 0x287   : > { %1108 = vmatprep.subr.bf16.mxu0 %v1747_v22 }
 0x288   : > { %1583 = vmatpush3.bf16.msra.mxu1 %v1762_v36 }
 0x289   : > { %1584 = vmatprep.subr.bf16.mxu1 %v1763_v37 }
 0x28a   : > { %1109 = vmatpush1.bf16.msra.mxu0 %v1749_v23 }
 0x28b   : > { %1110 = vmatprep.subr.bf16.mxu0 %v1750_v24 }
 0x28c   : > { %1585 = vmatpush3.bf16.msra.mxu1 %v1764_v38 }
 0x28d   : > { %1586 = vmatprep.subr.bf16.mxu1 %v1765_v39 }
 0x28e   : > { %1111 = vmatpush1.bf16.msra.mxu0 %v1752_v25 }
 0x290   : > { %1587 = vmatpush3.bf16.msra.mxu1 %v1766_v40 }
 0x291   : > { %1129 = vmatmul.mubr.bf16.vlgmr.msra.gmra.mrb[0].mxu0 %v987_v26  ;;  %1588 = vmatprep.subr.bf16.mxu1 %v1767_v41 }
 0x294   : > { %1589 = vmatpush3.bf16.msra.mxu1 %v1768_v42 }
 0x364   : > { %v1130_v50 = vpop.f32.mrb[0].mxu0 }
 0x365   : > { %v1131_v51 = vadd.f32 %v1130_v50, %v1009_v48  ;;  %v1132_v52 = vpop.f32.mrb[1].mxu0 }
 0x366   : > { %v1133_v53 = vadd.f32 %v1132_v52, %v1013_v49  ;;  %v1134_v54 = vpop.f32.mrb[2].mxu0 }
 0x367   : > { %v1139_v55 = vmul.f32 %v1131_v51, %v1131_v51  ;;  %v1135_v56 = vpop.f32.mrb[3].mxu0  ;;  %v1137_v4 = vmul.f32 0.5, %v1131_v51 }
 0x368   : > { %v1140_v57 = vmul.f32 %v1133_v53, %v1133_v53  ;;  %v1138_v6 = vmul.f32 0.5, %v1133_v53 }
 0x369   : > { %v1141_v58 = vmul.f32 %v1139_v55, %v1131_v51 }
 0x36a   : > { %v1142_v59 = vmul.f32 %v1140_v57, %v1133_v53 }
 0x36b   : > { %v1143_v60 = vmul.f32 0.044715, %v1141_v58 }
 0x36c   : > { %v1144_v61 = vmul.f32 0.044715, %v1142_v59 }
 0x36d   : > { %v1145_v62 = vadd.f32 %v1143_v60, %v1131_v51 }
 0x36e   : > { %v1146_v63 = vadd.f32 %v1144_v61, %v1133_v53 }
 0x36f   : > { %v1147_v0 = vmul.f32 0.7978846, %v1145_v62 }
 0x370   : > { %v1148_v1 = vmul.f32 0.7978846, %v1146_v63 }
 0x371   : > { %1769 = vtanh.f32 %v1147_v0 }
 0x372   : > { %1771 = vtanh.f32 %v1148_v1 }
 0x37b   : > { %v1770_v2 = vpop.eup %1769 }
 0x37c   : > { %v1772_v3 = vpop.eup %1771  ;;  %v1151_v5 = vadd.f32 1.0, %v1770_v2 }
 0x37d   : > { %v1152_v7 = vadd.f32 1.0, %v1772_v3 }
 0x37e   : > { %v1153_v8 = vmul.f32 %v1151_v5, %v1137_v4 }
 0x37f   : > { %v1154_v9 = vmul.f32 %v1152_v7, %v1138_v6 }
 0x380   : > { %v1156_v11 = vpack.c.bf16 %v1153_v8, %v1153_v8 }
 0x381   : > { %v1157_v10 = vpack.c.bf16 %v1154_v9, %v1154_v9 }
 0x383   : > { %1318 = vmatprep.mubr.bf16.mxu1 %v1157_v10 }
 0x384   : > { %1319 = vmatmul.mubr.bf16.vlgmr.msra.gmra.mrb[0].mxu1 %v1156_v11 }
 0x457   : > { %v1590_v12 = vpop.f32.mrb[0].mxu1  ;;  %1331 = sbr.rel (%p1558_p5) target bundleno = 1128 (0x468), region = 155 }
 0x458   : > { %v1591_v14 = vpop.f32.mrb[1].mxu1 }
 0x459   : > { %v1592_v15 = vadd.f32 %v1591_v14, %v1590_v12  ;;  %v1593_v16 = vpop.f32.mrb[2].mxu1 }
 0x45a   : > { %v1594_v17 = vpop.f32.mrb[3].mxu1 }
 0x45b   : > { %v1326_v18 = vadd.f32 %v1592_v15, %v1155_v13 }
 0x45d   : > { %1327 = vst [vmem:[#allocation3] sm:$0xff] %v1326_v18 }
 0x464   : > { %v1332_v19 = vld [vmem:[#allocation3] sm:$0xff] }
 0x465   : > { %v1333_v20 = vpack.c.bf16 %v1332_v19, %v1332_v19 }
 0x467   : > { %1334 = vst [vmem:[%s2078_s20] sm:$0xf] %v1333_v20 }
 0x468 PF: > { %s22_s29 = sadd.s32 1, %s1859_s29   ;;  %s2251_s5 = sld [smem:[#allocation8_spill]] }
 0x469   : > { %p19_p6 = scmp.ge.s32.totalorder %s22_s29, 10   ;;  %s2252_s3 = sld [smem:[#allocation6_spill]] }
 0x46a   : > { %s2253_s30 = sld [smem:[#allocation7_spill]]  ;;  %s2254_s15 = sld [smem:[#allocation9_spill]] }
 0x46b   : > { %s2255_s21 = smov %s1823_s22  ;;  %s2257_s23 = smov %s1831_s24 }
 0x46c   : > { %s2258_s24 = smov %s2024_s4  ;;  %s2259_s25 = smov %s1847_s10 }
 0x46d   : > { %s2260_s26 = smov %s1851_s11  ;;  %s2261_s27 = smov %s1855_s28 }
 0x46e   : > { %s2256_s22 = smov %s2251_s5  ;;  %21 = sbr.rel (!%p19_p6) target bundleno = 13 (0xd), region = 210 }
 0x46f   : > { %s2262_s10 = smov %s2252_s3 }
 0x470   : > { %s2263_s11 = smov %s2253_s30  ;;  %s2264_s28 = smov %s2254_s15 }

</bundles_post_ra>
